<compile_context>
chip_gen: v7x
topology: tpu7x:2x2x1
jax: 0.10.0
libtpu: 0.0.40
codegen_flags: <defaults>
</compile_context>

<pallas_src>
import jax
import jax.numpy as jnp
from jax.experimental import pallas as pl
from jax.experimental.pallas import tpu as pltpu

# Model dimensions (VGGSlim-style; deterministic since no checkpoint is provided).
IN_CH = 3
C1 = 8            # conv1 out channels
C2 = 16           # conv2 out channels
IMG = 16          # input spatial size
FEAT = C2 * (IMG // 4) * (IMG // 4)   # 256 = classifier_input_size
HID = 32          # prunable FC width (= last_layer_in_feats)
NUM_CLASSES = 10
HEAD_PAD = 128    # head output padded to a full 128-lane store
CIN_PAD = 8       # conv1 input channels zero-padded 3 -> 8 (friendlier K)


# ---------------------------------------------------------------------------
# In-kernel helpers
# ---------------------------------------------------------------------------
def _maxpool2x2(x_flat, H, W, C):
    """MaxPool2d(2,2). x_flat: (H*W, C) row-major (h, w) -> (H//2, W//2, C)."""
    t = x_flat.reshape(H, W // 2, 2, C)
    t = jnp.maximum(t[:, :, 0, :], t[:, :, 1, :])      # pool over W
    t = t.reshape(H // 2, 2, W // 2, C)
    return jnp.maximum(t[:, 0], t[:, 1])               # pool over H


def _fused_forward_kernel(x_ref, w1_ref, b1_ref, w2_ref, b2_ref,
                          fc1w_ref, fc1b_ref, hw_ref, hb_ref,
                          o_ref, xpad2_ref):
    """One image per grid step; everything stays in VMEM."""
    f32 = jnp.float32

    # ---- conv1 3x3 (pad=1, input pre-padded) + ReLU: 9 shifted VMEM matmuls ----
    acc1 = jnp.zeros((IMG * IMG, C1), f32)
    for di in range(3):
        for dj in range(3):
            patch = x_ref[0, di:di + IMG, dj:dj + IMG, :]            # (16,16,8)
            acc1 = acc1 + jnp.dot(patch.reshape(IMG * IMG, CIN_PAD),
                                  w1_ref[di, dj],
                                  preferred_element_type=f32)
    h1 = jnp.maximum(acc1 + b1_ref[...], 0.0)                        # (256, 8)

    # ---- maxpool 2x2 ----
    p1 = _maxpool2x2(h1, IMG, IMG, C1)                               # (8, 8, 8)

    # ---- conv2 3x3 (pad=1) + ReLU: zero-pad in VMEM scratch, 9 shifted matmuls ----
    H2 = IMG // 2
    xpad2_ref[...] = jnp.zeros((H2 + 2, H2 + 2, C1), f32)
    xpad2_ref[1:H2 + 1, 1:H2 + 1, :] = p1
    acc2 = jnp.zeros((H2 * H2, C2), f32)
    for di in range(3):
        for dj in range(3):
            patch = xpad2_ref[di:di + H2, dj:dj + H2, :]             # (8, 8, 8)
            acc2 = acc2 + jnp.dot(patch.reshape(H2 * H2, C1),
                                  w2_ref[di, dj],
                                  preferred_element_type=f32)
    h2 = jnp.maximum(acc2 + b2_ref[...], 0.0)                        # (64, 16)

    # ---- maxpool 2x2 ----
    p2 = _maxpool2x2(h2, H2, H2, C2)                                 # (4, 4, 16)
    p2 = p2.reshape((H2 // 2) * (H2 // 2), C2)                       # (16, 16)  rows = (h, w)

    # ---- fc1 (256 -> 32) + ReLU ----
    # fc1 weight rows were pre-permuted to (h, w, c) order, so the spatial-major layout of
    # p2 matches PyTorch's NCHW View flatten.  Contract as 16 small K=16 matmuls to keep the
    # lane/sublane layout simple (no lane-merging reshape needed).
    acc3 = jnp.zeros((1, HID), f32)
    for r in range(16):
        acc3 = acc3 + jnp.dot(p2[r:r + 1, :],
                              fc1w_ref[r * C2:(r + 1) * C2, :],
                              preferred_element_type=f32)
    z1 = jnp.maximum(acc3 + fc1b_ref[...], 0.0)                      # (1, 32)

    # ---- classifier head (32 -> 10, padded to 128 lanes for a lane-dense HBM store) ----
    logits = jnp.dot(z1, hw_ref[...], preferred_element_type=f32) + hb_ref[...]   # (1, 128)
    o_ref[...] = logits.reshape(1, 1, HEAD_PAD)


# ---------------------------------------------------------------------------
# Parameters: PyTorch-layout init + one-time pre-baking to kernel-ready layouts
# ---------------------------------------------------------------------------
def init_torch_style_params(key):
    """Deterministic parameters in PyTorch layout (Conv2d: (Cout,Cin,KH,KW); Linear: (out,in))."""
    ks = jax.random.split(key, 8)

    def w(k, shape, fan_in):
        return jax.random.normal(k, shape, jnp.float32) / jnp.sqrt(fan_in)

    return {
        "conv1_w": w(ks[0], (C1, IN_CH, 3, 3), IN_CH * 9),
        "conv1_b": w(ks[1], (C1,), IN_CH * 9),
        "conv2_w": w(ks[2], (C2, C1, 3, 3), C1 * 9),
        "conv2_b": w(ks[3], (C2,), C1 * 9),
        "fc1_w":   w(ks[4], (HID, FEAT), FEAT),     # prunable_post_feat_extractor Linear
        "fc1_b":   w(ks[5], (HID,), FEAT),
        "head_w":  w(ks[6], (NUM_CLASSES, HID), HID),   # active classifier head
        "head_b":  w(ks[7], (NUM_CLASSES,), HID),
    }


def prepare_kernel_params(p):
    """Pre-bake all weights ONCE (outside the hot path) into kernel-ready layouts."""
    f32 = jnp.float32
    # Conv weights: (Cout,Cin,KH,KW) -> (KH,KW,Cin,Cout); conv1 Cin zero-padded 3 -> 8.
    w1 = jnp.transpose(p["conv1_w"].astype(f32), (2, 3, 1, 0))            # (3,3,3,8)
    w1 = jnp.pad(w1, ((0, 0), (0, 0), (0, CIN_PAD - IN_CH), (0, 0)))      # (3,3,8,8)
    w2 = jnp.transpose(p["conv2_w"].astype(f32), (2, 3, 1, 0))            # (3,3,8,16)
    # fc1: PyTorch flattens NCHW -> rows in (c,h,w) order; permute rows to the kernel's
    # (h,w,c) flatten order so no transpose is needed inside the kernel.
    s = IMG // 4
    fc1 = p["fc1_w"].astype(f32).T.reshape(C2, s, s, HID)                 # (c,h,w,out)
    fc1 = jnp.transpose(fc1, (1, 2, 0, 3)).reshape(FEAT, HID)             # (256,32)
    # Head: (out,in) -> (in,out), zero-padded to 128 output lanes.
    hw = jnp.pad(p["head_w"].astype(f32).T, ((0, 0), (0, HEAD_PAD - NUM_CLASSES)))
    hb = jnp.pad(p["head_b"].astype(f32), (0, HEAD_PAD - NUM_CLASSES)).reshape(1, HEAD_PAD)
    return {
        "w1": w1, "b1": p["conv1_b"].astype(f32).reshape(1, C1),
        "w2": w2, "b2": p["conv2_b"].astype(f32).reshape(1, C2),
        "fc1_w": fc1, "fc1_b": p["fc1_b"].astype(f32).reshape(1, HID),
        "head_w": hw, "head_b": hb,
    }


# ---------------------------------------------------------------------------
# Forward pass (single fused pallas_call)
# ---------------------------------------------------------------------------
@jax.jit
def modified_wrapper_forward(kp, x_nchw):
    n = x_nchw.shape[0]
    # Glue: NCHW -> NHWC, single zero-pad (spatial +1 border for conv1, channels 3 -> 8).
    x = jnp.transpose(x_nchw.astype(jnp.float32), (0, 2, 3, 1))           # (N,16,16,3)
    xp = jnp.pad(x, ((0, 0), (1, 1), (1, 1), (0, CIN_PAD - IN_CH)))       # (N,18,18,8)

    out = pl.pallas_call(
        _fused_forward_kernel,
        grid=(n,),
        in_specs=[
            pl.BlockSpec((1, IMG + 2, IMG + 2, CIN_PAD), lambda i: (i, 0, 0, 0)),
            pl.BlockSpec((3, 3, CIN_PAD, C1), lambda i: (0, 0, 0, 0)),
            pl.BlockSpec((1, C1), lambda i: (0, 0)),
            pl.BlockSpec((3, 3, C1, C2), lambda i: (0, 0, 0, 0)),
            pl.BlockSpec((1, C2), lambda i: (0, 0)),
            pl.BlockSpec((FEAT, HID), lambda i: (0, 0)),
            pl.BlockSpec((1, HID), lambda i: (0, 0)),
            pl.BlockSpec((HID, HEAD_PAD), lambda i: (0, 0)),
            pl.BlockSpec((1, HEAD_PAD), lambda i: (0, 0)),
        ],
        out_specs=pl.BlockSpec((1, 1, HEAD_PAD), lambda i: (i, 0, 0)),
        out_shape=jax.ShapeDtypeStruct((n, 1, HEAD_PAD), jnp.float32),
        scratch_shapes=[pltpu.VMEM((IMG // 2 + 2, IMG // 2 + 2, C1), jnp.float32)],
        compiler_params=pltpu.CompilerParams(
            dimension_semantics=("parallel",),   # lets v7x shard the batch across its 2 TCs
        ),
    )(xp, kp["w1"], kp["b1"], kp["w2"], kp["b2"],
      kp["fc1_w"], kp["fc1_b"], kp["head_w"], kp["head_b"])

    # Drop the zero-padded head columns (10 real classes).
    return out[:, 0, :NUM_CLASSES]


if __name__ == "__main__":
    key = jax.random.PRNGKey(0)
    pkey, xkey = jax.random.split(key)

    torch_params = init_torch_style_params(pkey)
    kparams = prepare_kernel_params(torch_params)   # pre-baked once, outside the hot path

    # Deterministic small input, NCHW like PyTorch: batch=2, channels=3, spatial=16.
    x = jax.random.normal(xkey, (2, IN_CH, IMG, IMG), jnp.float32)

    out = modified_wrapper_forward(kparams, x)
    jax.block_until_ready(out)
    assert out.shape == (2, NUM_CLASSES) and out.dtype == jnp.float32
    print("KERNEL_OK")
</pallas_src>

<mosaic_0001>
module attributes {stable_mosaic.version = 11 : i64} {
  func.func @_fused_forward_kernel(%arg0: i32, %arg1: memref<1x18x18x8xf32, #tpu.memory_space<vmem>>, %arg2: memref<3x3x8x8xf32, #tpu.memory_space<vmem>>, %arg3: memref<1x8xf32, #tpu.memory_space<vmem>>, %arg4: memref<3x3x8x16xf32, #tpu.memory_space<vmem>>, %arg5: memref<1x16xf32, #tpu.memory_space<vmem>>, %arg6: memref<256x32xf32, #tpu.memory_space<vmem>>, %arg7: memref<1x32xf32, #tpu.memory_space<vmem>>, %arg8: memref<32x128xf32, #tpu.memory_space<vmem>>, %arg9: memref<1x128xf32, #tpu.memory_space<vmem>>, %arg10: memref<1x1x128xf32, #tpu.memory_space<vmem>>, %arg11: memref<10x10x8xf32, #tpu.memory_space<vmem>>) attributes {dimension_semantics = [#tpu.dimension_semantics<parallel>], iteration_bounds = array<i64: 2>, scalar_prefetch = 0 : i64, scratch_operands = 1 : i64, tpu.core_type = #tpu.core_type<tc>, window_params = [{transform_indices = @transform_0, window_bounds = array<i64: 1, 18, 18, 8>}, {pipeline_mode = #tpu.pipeline_mode<synchronous>, transform_indices = @transform_1, window_bounds = array<i64: 3, 3, 8, 8>}, {pipeline_mode = #tpu.pipeline_mode<synchronous>, transform_indices = @transform_2, window_bounds = array<i64: 1, 8>}, {pipeline_mode = #tpu.pipeline_mode<synchronous>, transform_indices = @transform_3, window_bounds = array<i64: 3, 3, 8, 16>}, {pipeline_mode = #tpu.pipeline_mode<synchronous>, transform_indices = @transform_4, window_bounds = array<i64: 1, 16>}, {pipeline_mode = #tpu.pipeline_mode<synchronous>, transform_indices = @transform_5, window_bounds = array<i64: 256, 32>}, {pipeline_mode = #tpu.pipeline_mode<synchronous>, transform_indices = @transform_6, window_bounds = array<i64: 1, 32>}, {pipeline_mode = #tpu.pipeline_mode<synchronous>, transform_indices = @transform_7, window_bounds = array<i64: 32, 128>}, {pipeline_mode = #tpu.pipeline_mode<synchronous>, transform_indices = @transform_8, window_bounds = array<i64: 1, 128>}, {transform_indices = @transform_9, window_bounds = array<i64: 1, 1, 128>}]} {
    %cst = arith.constant 0.000000e+00 : f32
    %0 = vector.broadcast %cst : f32 to vector<256x8xf32>
    %c0 = arith.constant 0 : index
    %c0_0 = arith.constant 0 : index
    %c0_1 = arith.constant 0 : index
    %c0_2 = arith.constant 0 : index
    %1 = vector.load %arg1[%c0, %c0_0, %c0_1, %c0_2] : memref<1x18x18x8xf32, #tpu.memory_space<vmem>>, vector<1x16x16x8xf32>
    %2 = vector.shape_cast %1 : vector<1x16x16x8xf32> to vector<16x16x8xf32>
    %3 = vector.shape_cast %2 : vector<16x16x8xf32> to vector<256x8xf32>
    %c0_3 = arith.constant 0 : index
    %c0_4 = arith.constant 0 : index
    %c0_5 = arith.constant 0 : index
    %c0_6 = arith.constant 0 : index
    %4 = vector.load %arg2[%c0_3, %c0_4, %c0_5, %c0_6] : memref<3x3x8x8xf32, #tpu.memory_space<vmem>>, vector<1x1x8x8xf32>
    %5 = vector.shape_cast %4 : vector<1x1x8x8xf32> to vector<8x8xf32>
    %cst_7 = arith.constant dense<0.000000e+00> : vector<256x8xf32>
    %6 = tpu.matmul %3, %5, %cst_7 {dimension_numbers = #tpu.dot_dimension_numbers<[1], [0], [0], [1], [0, 0, 1, 1], [], []>} : vector<256x8xf32>, vector<8x8xf32>, vector<256x8xf32> -> vector<256x8xf32>
    %7 = arith.addf %0, %6 : vector<256x8xf32>
    %c0_8 = arith.constant 0 : index
    %c0_9 = arith.constant 0 : index
    %c1 = arith.constant 1 : index
    %c0_10 = arith.constant 0 : index
    %8 = vector.load %arg1[%c0_8, %c0_9, %c1, %c0_10] : memref<1x18x18x8xf32, #tpu.memory_space<vmem>>, vector<1x16x16x8xf32>
    %9 = vector.shape_cast %8 : vector<1x16x16x8xf32> to vector<16x16x8xf32>
    %10 = vector.shape_cast %9 : vector<16x16x8xf32> to vector<256x8xf32>
    %c0_11 = arith.constant 0 : index
    %c1_12 = arith.constant 1 : index
    %c0_13 = arith.constant 0 : index
    %c0_14 = arith.constant 0 : index
    %11 = vector.load %arg2[%c0_11, %c1_12, %c0_13, %c0_14] : memref<3x3x8x8xf32, #tpu.memory_space<vmem>>, vector<1x1x8x8xf32>
    %12 = vector.shape_cast %11 : vector<1x1x8x8xf32> to vector<8x8xf32>
    %cst_15 = arith.constant dense<0.000000e+00> : vector<256x8xf32>
    %13 = tpu.matmul %10, %12, %cst_15 {dimension_numbers = #tpu.dot_dimension_numbers<[1], [0], [0], [1], [0, 0, 1, 1], [], []>} : vector<256x8xf32>, vector<8x8xf32>, vector<256x8xf32> -> vector<256x8xf32>
    %14 = arith.addf %7, %13 : vector<256x8xf32>
    %c0_16 = arith.constant 0 : index
    %c0_17 = arith.constant 0 : index
    %c2 = arith.constant 2 : index
    %c0_18 = arith.constant 0 : index
    %15 = vector.load %arg1[%c0_16, %c0_17, %c2, %c0_18] : memref<1x18x18x8xf32, #tpu.memory_space<vmem>>, vector<1x16x16x8xf32>
    %16 = vector.shape_cast %15 : vector<1x16x16x8xf32> to vector<16x16x8xf32>
    %17 = vector.shape_cast %16 : vector<16x16x8xf32> to vector<256x8xf32>
    %c0_19 = arith.constant 0 : index
    %c2_20 = arith.constant 2 : index
    %c0_21 = arith.constant 0 : index
    %c0_22 = arith.constant 0 : index
    %18 = vector.load %arg2[%c0_19, %c2_20, %c0_21, %c0_22] : memref<3x3x8x8xf32, #tpu.memory_space<vmem>>, vector<1x1x8x8xf32>
    %19 = vector.shape_cast %18 : vector<1x1x8x8xf32> to vector<8x8xf32>
    %cst_23 = arith.constant dense<0.000000e+00> : vector<256x8xf32>
    %20 = tpu.matmul %17, %19, %cst_23 {dimension_numbers = #tpu.dot_dimension_numbers<[1], [0], [0], [1], [0, 0, 1, 1], [], []>} : vector<256x8xf32>, vector<8x8xf32>, vector<256x8xf32> -> vector<256x8xf32>
    %21 = arith.addf %14, %20 : vector<256x8xf32>
    %c0_24 = arith.constant 0 : index
    %c1_25 = arith.constant 1 : index
    %c0_26 = arith.constant 0 : index
    %c0_27 = arith.constant 0 : index
    %22 = vector.load %arg1[%c0_24, %c1_25, %c0_26, %c0_27] : memref<1x18x18x8xf32, #tpu.memory_space<vmem>>, vector<1x16x16x8xf32>
    %23 = vector.shape_cast %22 : vector<1x16x16x8xf32> to vector<16x16x8xf32>
    %24 = vector.shape_cast %23 : vector<16x16x8xf32> to vector<256x8xf32>
    %c1_28 = arith.constant 1 : index
    %c0_29 = arith.constant 0 : index
    %c0_30 = arith.constant 0 : index
    %c0_31 = arith.constant 0 : index
    %25 = vector.load %arg2[%c1_28, %c0_29, %c0_30, %c0_31] : memref<3x3x8x8xf32, #tpu.memory_space<vmem>>, vector<1x1x8x8xf32>
    %26 = vector.shape_cast %25 : vector<1x1x8x8xf32> to vector<8x8xf32>
    %cst_32 = arith.constant dense<0.000000e+00> : vector<256x8xf32>
    %27 = tpu.matmul %24, %26, %cst_32 {dimension_numbers = #tpu.dot_dimension_numbers<[1], [0], [0], [1], [0, 0, 1, 1], [], []>} : vector<256x8xf32>, vector<8x8xf32>, vector<256x8xf32> -> vector<256x8xf32>
    %28 = arith.addf %21, %27 : vector<256x8xf32>
    %c0_33 = arith.constant 0 : index
    %c1_34 = arith.constant 1 : index
    %c1_35 = arith.constant 1 : index
    %c0_36 = arith.constant 0 : index
    %29 = vector.load %arg1[%c0_33, %c1_34, %c1_35, %c0_36] : memref<1x18x18x8xf32, #tpu.memory_space<vmem>>, vector<1x16x16x8xf32>
    %30 = vector.shape_cast %29 : vector<1x16x16x8xf32> to vector<16x16x8xf32>
    %31 = vector.shape_cast %30 : vector<16x16x8xf32> to vector<256x8xf32>
    %c1_37 = arith.constant 1 : index
    %c1_38 = arith.constant 1 : index
    %c0_39 = arith.constant 0 : index
    %c0_40 = arith.constant 0 : index
    %32 = vector.load %arg2[%c1_37, %c1_38, %c0_39, %c0_40] : memref<3x3x8x8xf32, #tpu.memory_space<vmem>>, vector<1x1x8x8xf32>
    %33 = vector.shape_cast %32 : vector<1x1x8x8xf32> to vector<8x8xf32>
    %cst_41 = arith.constant dense<0.000000e+00> : vector<256x8xf32>
    %34 = tpu.matmul %31, %33, %cst_41 {dimension_numbers = #tpu.dot_dimension_numbers<[1], [0], [0], [1], [0, 0, 1, 1], [], []>} : vector<256x8xf32>, vector<8x8xf32>, vector<256x8xf32> -> vector<256x8xf32>
    %35 = arith.addf %28, %34 : vector<256x8xf32>
    %c0_42 = arith.constant 0 : index
    %c1_43 = arith.constant 1 : index
    %c2_44 = arith.constant 2 : index
    %c0_45 = arith.constant 0 : index
    %36 = vector.load %arg1[%c0_42, %c1_43, %c2_44, %c0_45] : memref<1x18x18x8xf32, #tpu.memory_space<vmem>>, vector<1x16x16x8xf32>
    %37 = vector.shape_cast %36 : vector<1x16x16x8xf32> to vector<16x16x8xf32>
    %38 = vector.shape_cast %37 : vector<16x16x8xf32> to vector<256x8xf32>
    %c1_46 = arith.constant 1 : index
    %c2_47 = arith.constant 2 : index
    %c0_48 = arith.constant 0 : index
    %c0_49 = arith.constant 0 : index
    %39 = vector.load %arg2[%c1_46, %c2_47, %c0_48, %c0_49] : memref<3x3x8x8xf32, #tpu.memory_space<vmem>>, vector<1x1x8x8xf32>
    %40 = vector.shape_cast %39 : vector<1x1x8x8xf32> to vector<8x8xf32>
    %cst_50 = arith.constant dense<0.000000e+00> : vector<256x8xf32>
    %41 = tpu.matmul %38, %40, %cst_50 {dimension_numbers = #tpu.dot_dimension_numbers<[1], [0], [0], [1], [0, 0, 1, 1], [], []>} : vector<256x8xf32>, vector<8x8xf32>, vector<256x8xf32> -> vector<256x8xf32>
    %42 = arith.addf %35, %41 : vector<256x8xf32>
    %c0_51 = arith.constant 0 : index
    %c2_52 = arith.constant 2 : index
    %c0_53 = arith.constant 0 : index
    %c0_54 = arith.constant 0 : index
    %43 = vector.load %arg1[%c0_51, %c2_52, %c0_53, %c0_54] : memref<1x18x18x8xf32, #tpu.memory_space<vmem>>, vector<1x16x16x8xf32>
    %44 = vector.shape_cast %43 : vector<1x16x16x8xf32> to vector<16x16x8xf32>
    %45 = vector.shape_cast %44 : vector<16x16x8xf32> to vector<256x8xf32>
    %c2_55 = arith.constant 2 : index
    %c0_56 = arith.constant 0 : index
    %c0_57 = arith.constant 0 : index
    %c0_58 = arith.constant 0 : index
    %46 = vector.load %arg2[%c2_55, %c0_56, %c0_57, %c0_58] : memref<3x3x8x8xf32, #tpu.memory_space<vmem>>, vector<1x1x8x8xf32>
    %47 = vector.shape_cast %46 : vector<1x1x8x8xf32> to vector<8x8xf32>
    %cst_59 = arith.constant dense<0.000000e+00> : vector<256x8xf32>
    %48 = tpu.matmul %45, %47, %cst_59 {dimension_numbers = #tpu.dot_dimension_numbers<[1], [0], [0], [1], [0, 0, 1, 1], [], []>} : vector<256x8xf32>, vector<8x8xf32>, vector<256x8xf32> -> vector<256x8xf32>
    %49 = arith.addf %42, %48 : vector<256x8xf32>
    %c0_60 = arith.constant 0 : index
    %c2_61 = arith.constant 2 : index
    %c1_62 = arith.constant 1 : index
    %c0_63 = arith.constant 0 : index
    %50 = vector.load %arg1[%c0_60, %c2_61, %c1_62, %c0_63] : memref<1x18x18x8xf32, #tpu.memory_space<vmem>>, vector<1x16x16x8xf32>
    %51 = vector.shape_cast %50 : vector<1x16x16x8xf32> to vector<16x16x8xf32>
    %52 = vector.shape_cast %51 : vector<16x16x8xf32> to vector<256x8xf32>
    %c2_64 = arith.constant 2 : index
    %c1_65 = arith.constant 1 : index
    %c0_66 = arith.constant 0 : index
    %c0_67 = arith.constant 0 : index
    %53 = vector.load %arg2[%c2_64, %c1_65, %c0_66, %c0_67] : memref<3x3x8x8xf32, #tpu.memory_space<vmem>>, vector<1x1x8x8xf32>
    %54 = vector.shape_cast %53 : vector<1x1x8x8xf32> to vector<8x8xf32>
    %cst_68 = arith.constant dense<0.000000e+00> : vector<256x8xf32>
    %55 = tpu.matmul %52, %54, %cst_68 {dimension_numbers = #tpu.dot_dimension_numbers<[1], [0], [0], [1], [0, 0, 1, 1], [], []>} : vector<256x8xf32>, vector<8x8xf32>, vector<256x8xf32> -> vector<256x8xf32>
    %56 = arith.addf %49, %55 : vector<256x8xf32>
    %c0_69 = arith.constant 0 : index
    %c2_70 = arith.constant 2 : index
    %c2_71 = arith.constant 2 : index
    %c0_72 = arith.constant 0 : index
    %57 = vector.load %arg1[%c0_69, %c2_70, %c2_71, %c0_72] : memref<1x18x18x8xf32, #tpu.memory_space<vmem>>, vector<1x16x16x8xf32>
    %58 = vector.shape_cast %57 : vector<1x16x16x8xf32> to vector<16x16x8xf32>
    %59 = vector.shape_cast %58 : vector<16x16x8xf32> to vector<256x8xf32>
    %c2_73 = arith.constant 2 : index
    %c2_74 = arith.constant 2 : index
    %c0_75 = arith.constant 0 : index
    %c0_76 = arith.constant 0 : index
    %60 = vector.load %arg2[%c2_73, %c2_74, %c0_75, %c0_76] : memref<3x3x8x8xf32, #tpu.memory_space<vmem>>, vector<1x1x8x8xf32>
    %61 = vector.shape_cast %60 : vector<1x1x8x8xf32> to vector<8x8xf32>
    %cst_77 = arith.constant dense<0.000000e+00> : vector<256x8xf32>
    %62 = tpu.matmul %59, %61, %cst_77 {dimension_numbers = #tpu.dot_dimension_numbers<[1], [0], [0], [1], [0, 0, 1, 1], [], []>} : vector<256x8xf32>, vector<8x8xf32>, vector<256x8xf32> -> vector<256x8xf32>
    %63 = arith.addf %56, %62 : vector<256x8xf32>
    %c0_78 = arith.constant 0 : index
    %c0_79 = arith.constant 0 : index
    %64 = vector.load %arg3[%c0_78, %c0_79] : memref<1x8xf32, #tpu.memory_space<vmem>>, vector<1x8xf32>
    %65 = vector.broadcast %64 : vector<1x8xf32> to vector<256x8xf32>
    %66 = arith.addf %63, %65 : vector<256x8xf32>
    %cst_80 = arith.constant 0.000000e+00 : f32
    %67 = vector.broadcast %cst_80 : f32 to vector<256x8xf32>
    %68 = arith.maximumf %66, %67 : vector<256x8xf32>
    %69 = vector.shape_cast %68 : vector<256x8xf32> to vector<16x8x2x8xf32>
    %70 = vector.extract_strided_slice %69 {offsets = [0, 0, 0, 0], sizes = [16, 8, 1, 8], strides = [1, 1, 1, 1]} : vector<16x8x2x8xf32> to vector<16x8x1x8xf32>
    %71 = vector.shape_cast %70 : vector<16x8x1x8xf32> to vector<16x8x8xf32>
    %72 = vector.extract_strided_slice %69 {offsets = [0, 0, 1, 0], sizes = [16, 8, 1, 8], strides = [1, 1, 1, 1]} : vector<16x8x2x8xf32> to vector<16x8x1x8xf32>
    %73 = vector.shape_cast %72 : vector<16x8x1x8xf32> to vector<16x8x8xf32>
    %74 = arith.maximumf %71, %73 : vector<16x8x8xf32>
    %75 = vector.shape_cast %74 : vector<16x8x8xf32> to vector<8x2x8x8xf32>
    %76 = vector.extract_strided_slice %75 {offsets = [0, 0, 0, 0], sizes = [8, 1, 8, 8], strides = [1, 1, 1, 1]} : vector<8x2x8x8xf32> to vector<8x1x8x8xf32>
    %77 = vector.shape_cast %76 : vector<8x1x8x8xf32> to vector<8x8x8xf32>
    %78 = vector.extract_strided_slice %75 {offsets = [0, 1, 0, 0], sizes = [8, 1, 8, 8], strides = [1, 1, 1, 1]} : vector<8x2x8x8xf32> to vector<8x1x8x8xf32>
    %79 = vector.shape_cast %78 : vector<8x1x8x8xf32> to vector<8x8x8xf32>
    %80 = arith.maximumf %77, %79 : vector<8x8x8xf32>
    %cst_81 = arith.constant 0.000000e+00 : f32
    %81 = vector.broadcast %cst_81 : f32 to vector<10x10x8xf32>
    %c0_82 = arith.constant 0 : index
    %c0_83 = arith.constant 0 : index
    %c0_84 = arith.constant 0 : index
    %82 = vector.load %arg11[%c0_82, %c0_83, %c0_84] : memref<10x10x8xf32, #tpu.memory_space<vmem>>, vector<10x10x8xf32>
    tpu.vector_store %arg11[%c0_82, %c0_83, %c0_84], %81 {strides = array<i32>} : memref<10x10x8xf32, #tpu.memory_space<vmem>>, vector<10x10x8xf32>,
    %c1_85 = arith.constant 1 : index
    %c1_86 = arith.constant 1 : index
    %c0_87 = arith.constant 0 : index
    %83 = vector.load %arg11[%c1_85, %c1_86, %c0_87] : memref<10x10x8xf32, #tpu.memory_space<vmem>>, vector<8x8x8xf32>
    tpu.vector_store %arg11[%c1_85, %c1_86, %c0_87], %80 {strides = array<i32>} : memref<10x10x8xf32, #tpu.memory_space<vmem>>, vector<8x8x8xf32>,
    %cst_88 = arith.constant 0.000000e+00 : f32
    %84 = vector.broadcast %cst_88 : f32 to vector<64x16xf32>
    %c0_89 = arith.constant 0 : index
    %c0_90 = arith.constant 0 : index
    %c0_91 = arith.constant 0 : index
    %85 = vector.load %arg11[%c0_89, %c0_90, %c0_91] : memref<10x10x8xf32, #tpu.memory_space<vmem>>, vector<8x8x8xf32>
    %86 = vector.shape_cast %85 : vector<8x8x8xf32> to vector<64x8xf32>
    %c0_92 = arith.constant 0 : index
    %c0_93 = arith.constant 0 : index
    %c0_94 = arith.constant 0 : index
    %c0_95 = arith.constant 0 : index
    %87 = vector.load %arg4[%c0_92, %c0_93, %c0_94, %c0_95] : memref<3x3x8x16xf32, #tpu.memory_space<vmem>>, vector<1x1x8x16xf32>
    %88 = vector.shape_cast %87 : vector<1x1x8x16xf32> to vector<8x16xf32>
    %cst_96 = arith.constant dense<0.000000e+00> : vector<64x16xf32>
    %89 = tpu.matmul %86, %88, %cst_96 {dimension_numbers = #tpu.dot_dimension_numbers<[1], [0], [0], [1], [0, 0, 1, 1], [], []>} : vector<64x8xf32>, vector<8x16xf32>, vector<64x16xf32> -> vector<64x16xf32>
    %90 = arith.addf %84, %89 : vector<64x16xf32>
    %c0_97 = arith.constant 0 : index
    %c1_98 = arith.constant 1 : index
    %c0_99 = arith.constant 0 : index
    %91 = vector.load %arg11[%c0_97, %c1_98, %c0_99] : memref<10x10x8xf32, #tpu.memory_space<vmem>>, vector<8x8x8xf32>
    %92 = vector.shape_cast %91 : vector<8x8x8xf32> to vector<64x8xf32>
    %c0_100 = arith.constant 0 : index
    %c1_101 = arith.constant 1 : index
    %c0_102 = arith.constant 0 : index
    %c0_103 = arith.constant 0 : index
    %93 = vector.load %arg4[%c0_100, %c1_101, %c0_102, %c0_103] : memref<3x3x8x16xf32, #tpu.memory_space<vmem>>, vector<1x1x8x16xf32>
    %94 = vector.shape_cast %93 : vector<1x1x8x16xf32> to vector<8x16xf32>
    %cst_104 = arith.constant dense<0.000000e+00> : vector<64x16xf32>
    %95 = tpu.matmul %92, %94, %cst_104 {dimension_numbers = #tpu.dot_dimension_numbers<[1], [0], [0], [1], [0, 0, 1, 1], [], []>} : vector<64x8xf32>, vector<8x16xf32>, vector<64x16xf32> -> vector<64x16xf32>
    %96 = arith.addf %90, %95 : vector<64x16xf32>
    %c0_105 = arith.constant 0 : index
    %c2_106 = arith.constant 2 : index
    %c0_107 = arith.constant 0 : index
    %97 = vector.load %arg11[%c0_105, %c2_106, %c0_107] : memref<10x10x8xf32, #tpu.memory_space<vmem>>, vector<8x8x8xf32>
    %98 = vector.shape_cast %97 : vector<8x8x8xf32> to vector<64x8xf32>
    %c0_108 = arith.constant 0 : index
    %c2_109 = arith.constant 2 : index
    %c0_110 = arith.constant 0 : index
    %c0_111 = arith.constant 0 : index
    %99 = vector.load %arg4[%c0_108, %c2_109, %c0_110, %c0_111] : memref<3x3x8x16xf32, #tpu.memory_space<vmem>>, vector<1x1x8x16xf32>
    %100 = vector.shape_cast %99 : vector<1x1x8x16xf32> to vector<8x16xf32>
    %cst_112 = arith.constant dense<0.000000e+00> : vector<64x16xf32>
    %101 = tpu.matmul %98, %100, %cst_112 {dimension_numbers = #tpu.dot_dimension_numbers<[1], [0], [0], [1], [0, 0, 1, 1], [], []>} : vector<64x8xf32>, vector<8x16xf32>, vector<64x16xf32> -> vector<64x16xf32>
    %102 = arith.addf %96, %101 : vector<64x16xf32>
    %c1_113 = arith.constant 1 : index
    %c0_114 = arith.constant 0 : index
    %c0_115 = arith.constant 0 : index
    %103 = vector.load %arg11[%c1_113, %c0_114, %c0_115] : memref<10x10x8xf32, #tpu.memory_space<vmem>>, vector<8x8x8xf32>
    %104 = vector.shape_cast %103 : vector<8x8x8xf32> to vector<64x8xf32>
    %c1_116 = arith.constant 1 : index
    %c0_117 = arith.constant 0 : index
    %c0_118 = arith.constant 0 : index
    %c0_119 = arith.constant 0 : index
    %105 = vector.load %arg4[%c1_116, %c0_117, %c0_118, %c0_119] : memref<3x3x8x16xf32, #tpu.memory_space<vmem>>, vector<1x1x8x16xf32>
    %106 = vector.shape_cast %105 : vector<1x1x8x16xf32> to vector<8x16xf32>
    %cst_120 = arith.constant dense<0.000000e+00> : vector<64x16xf32>
    %107 = tpu.matmul %104, %106, %cst_120 {dimension_numbers = #tpu.dot_dimension_numbers<[1], [0], [0], [1], [0, 0, 1, 1], [], []>} : vector<64x8xf32>, vector<8x16xf32>, vector<64x16xf32> -> vector<64x16xf32>
    %108 = arith.addf %102, %107 : vector<64x16xf32>
    %c1_121 = arith.constant 1 : index
    %c1_122 = arith.constant 1 : index
    %c0_123 = arith.constant 0 : index
    %109 = vector.load %arg11[%c1_121, %c1_122, %c0_123] : memref<10x10x8xf32, #tpu.memory_space<vmem>>, vector<8x8x8xf32>
    %110 = vector.shape_cast %109 : vector<8x8x8xf32> to vector<64x8xf32>
    %c1_124 = arith.constant 1 : index
    %c1_125 = arith.constant 1 : index
    %c0_126 = arith.constant 0 : index
    %c0_127 = arith.constant 0 : index
    %111 = vector.load %arg4[%c1_124, %c1_125, %c0_126, %c0_127] : memref<3x3x8x16xf32, #tpu.memory_space<vmem>>, vector<1x1x8x16xf32>
    %112 = vector.shape_cast %111 : vector<1x1x8x16xf32> to vector<8x16xf32>
    %cst_128 = arith.constant dense<0.000000e+00> : vector<64x16xf32>
    %113 = tpu.matmul %110, %112, %cst_128 {dimension_numbers = #tpu.dot_dimension_numbers<[1], [0], [0], [1], [0, 0, 1, 1], [], []>} : vector<64x8xf32>, vector<8x16xf32>, vector<64x16xf32> -> vector<64x16xf32>
    %114 = arith.addf %108, %113 : vector<64x16xf32>
    %c1_129 = arith.constant 1 : index
    %c2_130 = arith.constant 2 : index
    %c0_131 = arith.constant 0 : index
    %115 = vector.load %arg11[%c1_129, %c2_130, %c0_131] : memref<10x10x8xf32, #tpu.memory_space<vmem>>, vector<8x8x8xf32>
    %116 = vector.shape_cast %115 : vector<8x8x8xf32> to vector<64x8xf32>
    %c1_132 = arith.constant 1 : index
    %c2_133 = arith.constant 2 : index
    %c0_134 = arith.constant 0 : index
    %c0_135 = arith.constant 0 : index
    %117 = vector.load %arg4[%c1_132, %c2_133, %c0_134, %c0_135] : memref<3x3x8x16xf32, #tpu.memory_space<vmem>>, vector<1x1x8x16xf32>
    %118 = vector.shape_cast %117 : vector<1x1x8x16xf32> to vector<8x16xf32>
    %cst_136 = arith.constant dense<0.000000e+00> : vector<64x16xf32>
    %119 = tpu.matmul %116, %118, %cst_136 {dimension_numbers = #tpu.dot_dimension_numbers<[1], [0], [0], [1], [0, 0, 1, 1], [], []>} : vector<64x8xf32>, vector<8x16xf32>, vector<64x16xf32> -> vector<64x16xf32>
    %120 = arith.addf %114, %119 : vector<64x16xf32>
    %c2_137 = arith.constant 2 : index
    %c0_138 = arith.constant 0 : index
    %c0_139 = arith.constant 0 : index
    %121 = vector.load %arg11[%c2_137, %c0_138, %c0_139] : memref<10x10x8xf32, #tpu.memory_space<vmem>>, vector<8x8x8xf32>
    %122 = vector.shape_cast %121 : vector<8x8x8xf32> to vector<64x8xf32>
    %c2_140 = arith.constant 2 : index
    %c0_141 = arith.constant 0 : index
    %c0_142 = arith.constant 0 : index
    %c0_143 = arith.constant 0 : index
    %123 = vector.load %arg4[%c2_140, %c0_141, %c0_142, %c0_143] : memref<3x3x8x16xf32, #tpu.memory_space<vmem>>, vector<1x1x8x16xf32>
    %124 = vector.shape_cast %123 : vector<1x1x8x16xf32> to vector<8x16xf32>
    %cst_144 = arith.constant dense<0.000000e+00> : vector<64x16xf32>
    %125 = tpu.matmul %122, %124, %cst_144 {dimension_numbers = #tpu.dot_dimension_numbers<[1], [0], [0], [1], [0, 0, 1, 1], [], []>} : vector<64x8xf32>, vector<8x16xf32>, vector<64x16xf32> -> vector<64x16xf32>
    %126 = arith.addf %120, %125 : vector<64x16xf32>
    %c2_145 = arith.constant 2 : index
    %c1_146 = arith.constant 1 : index
    %c0_147 = arith.constant 0 : index
    %127 = vector.load %arg11[%c2_145, %c1_146, %c0_147] : memref<10x10x8xf32, #tpu.memory_space<vmem>>, vector<8x8x8xf32>
    %128 = vector.shape_cast %127 : vector<8x8x8xf32> to vector<64x8xf32>
    %c2_148 = arith.constant 2 : index
    %c1_149 = arith.constant 1 : index
    %c0_150 = arith.constant 0 : index
    %c0_151 = arith.constant 0 : index
    %129 = vector.load %arg4[%c2_148, %c1_149, %c0_150, %c0_151] : memref<3x3x8x16xf32, #tpu.memory_space<vmem>>, vector<1x1x8x16xf32>
    %130 = vector.shape_cast %129 : vector<1x1x8x16xf32> to vector<8x16xf32>
    %cst_152 = arith.constant dense<0.000000e+00> : vector<64x16xf32>
    %131 = tpu.matmul %128, %130, %cst_152 {dimension_numbers = #tpu.dot_dimension_numbers<[1], [0], [0], [1], [0, 0, 1, 1], [], []>} : vector<64x8xf32>, vector<8x16xf32>, vector<64x16xf32> -> vector<64x16xf32>
    %132 = arith.addf %126, %131 : vector<64x16xf32>
    %c2_153 = arith.constant 2 : index
    %c2_154 = arith.constant 2 : index
    %c0_155 = arith.constant 0 : index
    %133 = vector.load %arg11[%c2_153, %c2_154, %c0_155] : memref<10x10x8xf32, #tpu.memory_space<vmem>>, vector<8x8x8xf32>
    %134 = vector.shape_cast %133 : vector<8x8x8xf32> to vector<64x8xf32>
    %c2_156 = arith.constant 2 : index
    %c2_157 = arith.constant 2 : index
    %c0_158 = arith.constant 0 : index
    %c0_159 = arith.constant 0 : index
    %135 = vector.load %arg4[%c2_156, %c2_157, %c0_158, %c0_159] : memref<3x3x8x16xf32, #tpu.memory_space<vmem>>, vector<1x1x8x16xf32>
    %136 = vector.shape_cast %135 : vector<1x1x8x16xf32> to vector<8x16xf32>
    %cst_160 = arith.constant dense<0.000000e+00> : vector<64x16xf32>
    %137 = tpu.matmul %134, %136, %cst_160 {dimension_numbers = #tpu.dot_dimension_numbers<[1], [0], [0], [1], [0, 0, 1, 1], [], []>} : vector<64x8xf32>, vector<8x16xf32>, vector<64x16xf32> -> vector<64x16xf32>
    %138 = arith.addf %132, %137 : vector<64x16xf32>
    %c0_161 = arith.constant 0 : index
    %c0_162 = arith.constant 0 : index
    %139 = vector.load %arg5[%c0_161, %c0_162] : memref<1x16xf32, #tpu.memory_space<vmem>>, vector<1x16xf32>
    %140 = vector.broadcast %139 : vector<1x16xf32> to vector<64x16xf32>
    %141 = arith.addf %138, %140 : vector<64x16xf32>
    %cst_163 = arith.constant 0.000000e+00 : f32
    %142 = vector.broadcast %cst_163 : f32 to vector<64x16xf32>
    %143 = arith.maximumf %141, %142 : vector<64x16xf32>
    %144 = vector.shape_cast %143 : vector<64x16xf32> to vector<8x4x2x16xf32>
    %145 = vector.extract_strided_slice %144 {offsets = [0, 0, 0, 0], sizes = [8, 4, 1, 16], strides = [1, 1, 1, 1]} : vector<8x4x2x16xf32> to vector<8x4x1x16xf32>
    %146 = vector.shape_cast %145 : vector<8x4x1x16xf32> to vector<8x4x16xf32>
    %147 = vector.extract_strided_slice %144 {offsets = [0, 0, 1, 0], sizes = [8, 4, 1, 16], strides = [1, 1, 1, 1]} : vector<8x4x2x16xf32> to vector<8x4x1x16xf32>
    %148 = vector.shape_cast %147 : vector<8x4x1x16xf32> to vector<8x4x16xf32>
    %149 = arith.maximumf %146, %148 : vector<8x4x16xf32>
    %150 = vector.shape_cast %149 : vector<8x4x16xf32> to vector<4x2x4x16xf32>
    %151 = vector.extract_strided_slice %150 {offsets = [0, 0, 0, 0], sizes = [4, 1, 4, 16], strides = [1, 1, 1, 1]} : vector<4x2x4x16xf32> to vector<4x1x4x16xf32>
    %152 = vector.shape_cast %151 : vector<4x1x4x16xf32> to vector<4x4x16xf32>
    %153 = vector.extract_strided_slice %150 {offsets = [0, 1, 0, 0], sizes = [4, 1, 4, 16], strides = [1, 1, 1, 1]} : vector<4x2x4x16xf32> to vector<4x1x4x16xf32>
    %154 = vector.shape_cast %153 : vector<4x1x4x16xf32> to vector<4x4x16xf32>
    %155 = arith.maximumf %152, %154 : vector<4x4x16xf32>
    %156 = vector.shape_cast %155 : vector<4x4x16xf32> to vector<16x16xf32>
    %cst_164 = arith.constant 0.000000e+00 : f32
    %157 = vector.broadcast %cst_164 : f32 to vector<1x32xf32>
    %158 = vector.extract_strided_slice %156 {offsets = [0, 0], sizes = [1, 16], strides = [1, 1]} : vector<16x16xf32> to vector<1x16xf32>
    %c0_165 = arith.constant 0 : index
    %c0_166 = arith.constant 0 : index
    %159 = vector.load %arg6[%c0_165, %c0_166] : memref<256x32xf32, #tpu.memory_space<vmem>>, vector<16x32xf32>
    %cst_167 = arith.constant dense<0.000000e+00> : vector<1x32xf32>
    %160 = tpu.matmul %158, %159, %cst_167 {dimension_numbers = #tpu.dot_dimension_numbers<[1], [0], [0], [1], [0, 0, 1, 1], [], []>} : vector<1x16xf32>, vector<16x32xf32>, vector<1x32xf32> -> vector<1x32xf32>
    %161 = arith.addf %157, %160 : vector<1x32xf32>
    %162 = vector.extract_strided_slice %156 {offsets = [1, 0], sizes = [1, 16], strides = [1, 1]} : vector<16x16xf32> to vector<1x16xf32>
    %c16 = arith.constant 16 : index
    %c0_168 = arith.constant 0 : index
    %163 = vector.load %arg6[%c16, %c0_168] : memref<256x32xf32, #tpu.memory_space<vmem>>, vector<16x32xf32>
    %cst_169 = arith.constant dense<0.000000e+00> : vector<1x32xf32>
    %164 = tpu.matmul %162, %163, %cst_169 {dimension_numbers = #tpu.dot_dimension_numbers<[1], [0], [0], [1], [0, 0, 1, 1], [], []>} : vector<1x16xf32>, vector<16x32xf32>, vector<1x32xf32> -> vector<1x32xf32>
    %165 = arith.addf %161, %164 : vector<1x32xf32>
    %166 = vector.extract_strided_slice %156 {offsets = [2, 0], sizes = [1, 16], strides = [1, 1]} : vector<16x16xf32> to vector<1x16xf32>
    %c32 = arith.constant 32 : index
    %c0_170 = arith.constant 0 : index
    %167 = vector.load %arg6[%c32, %c0_170] : memref<256x32xf32, #tpu.memory_space<vmem>>, vector<16x32xf32>
    %cst_171 = arith.constant dense<0.000000e+00> : vector<1x32xf32>
    %168 = tpu.matmul %166, %167, %cst_171 {dimension_numbers = #tpu.dot_dimension_numbers<[1], [0], [0], [1], [0, 0, 1, 1], [], []>} : vector<1x16xf32>, vector<16x32xf32>, vector<1x32xf32> -> vector<1x32xf32>
    %169 = arith.addf %165, %168 : vector<1x32xf32>
    %170 = vector.extract_strided_slice %156 {offsets = [3, 0], sizes = [1, 16], strides = [1, 1]} : vector<16x16xf32> to vector<1x16xf32>
    %c48 = arith.constant 48 : index
    %c0_172 = arith.constant 0 : index
    %171 = vector.load %arg6[%c48, %c0_172] : memref<256x32xf32, #tpu.memory_space<vmem>>, vector<16x32xf32>
    %cst_173 = arith.constant dense<0.000000e+00> : vector<1x32xf32>
    %172 = tpu.matmul %170, %171, %cst_173 {dimension_numbers = #tpu.dot_dimension_numbers<[1], [0], [0], [1], [0, 0, 1, 1], [], []>} : vector<1x16xf32>, vector<16x32xf32>, vector<1x32xf32> -> vector<1x32xf32>
    %173 = arith.addf %169, %172 : vector<1x32xf32>
    %174 = vector.extract_strided_slice %156 {offsets = [4, 0], sizes = [1, 16], strides = [1, 1]} : vector<16x16xf32> to vector<1x16xf32>
    %c64 = arith.constant 64 : index
    %c0_174 = arith.constant 0 : index
    %175 = vector.load %arg6[%c64, %c0_174] : memref<256x32xf32, #tpu.memory_space<vmem>>, vector<16x32xf32>
    %cst_175 = arith.constant dense<0.000000e+00> : vector<1x32xf32>
    %176 = tpu.matmul %174, %175, %cst_175 {dimension_numbers = #tpu.dot_dimension_numbers<[1], [0], [0], [1], [0, 0, 1, 1], [], []>} : vector<1x16xf32>, vector<16x32xf32>, vector<1x32xf32> -> vector<1x32xf32>
    %177 = arith.addf %173, %176 : vector<1x32xf32>
    %178 = vector.extract_strided_slice %156 {offsets = [5, 0], sizes = [1, 16], strides = [1, 1]} : vector<16x16xf32> to vector<1x16xf32>
    %c80 = arith.constant 80 : index
    %c0_176 = arith.constant 0 : index
    %179 = vector.load %arg6[%c80, %c0_176] : memref<256x32xf32, #tpu.memory_space<vmem>>, vector<16x32xf32>
    %cst_177 = arith.constant dense<0.000000e+00> : vector<1x32xf32>
    %180 = tpu.matmul %178, %179, %cst_177 {dimension_numbers = #tpu.dot_dimension_numbers<[1], [0], [0], [1], [0, 0, 1, 1], [], []>} : vector<1x16xf32>, vector<16x32xf32>, vector<1x32xf32> -> vector<1x32xf32>
    %181 = arith.addf %177, %180 : vector<1x32xf32>
    %182 = vector.extract_strided_slice %156 {offsets = [6, 0], sizes = [1, 16], strides = [1, 1]} : vector<16x16xf32> to vector<1x16xf32>
    %c96 = arith.constant 96 : index
    %c0_178 = arith.constant 0 : index
    %183 = vector.load %arg6[%c96, %c0_178] : memref<256x32xf32, #tpu.memory_space<vmem>>, vector<16x32xf32>
    %cst_179 = arith.constant dense<0.000000e+00> : vector<1x32xf32>
    %184 = tpu.matmul %182, %183, %cst_179 {dimension_numbers = #tpu.dot_dimension_numbers<[1], [0], [0], [1], [0, 0, 1, 1], [], []>} : vector<1x16xf32>, vector<16x32xf32>, vector<1x32xf32> -> vector<1x32xf32>
    %185 = arith.addf %181, %184 : vector<1x32xf32>
    %186 = vector.extract_strided_slice %156 {offsets = [7, 0], sizes = [1, 16], strides = [1, 1]} : vector<16x16xf32> to vector<1x16xf32>
    %c112 = arith.constant 112 : index
    %c0_180 = arith.constant 0 : index
    %187 = vector.load %arg6[%c112, %c0_180] : memref<256x32xf32, #tpu.memory_space<vmem>>, vector<16x32xf32>
    %cst_181 = arith.constant dense<0.000000e+00> : vector<1x32xf32>
    %188 = tpu.matmul %186, %187, %cst_181 {dimension_numbers = #tpu.dot_dimension_numbers<[1], [0], [0], [1], [0, 0, 1, 1], [], []>} : vector<1x16xf32>, vector<16x32xf32>, vector<1x32xf32> -> vector<1x32xf32>
    %189 = arith.addf %185, %188 : vector<1x32xf32>
    %190 = vector.extract_strided_slice %156 {offsets = [8, 0], sizes = [1, 16], strides = [1, 1]} : vector<16x16xf32> to vector<1x16xf32>
    %c128 = arith.constant 128 : index
    %c0_182 = arith.constant 0 : index
    %191 = vector.load %arg6[%c128, %c0_182] : memref<256x32xf32, #tpu.memory_space<vmem>>, vector<16x32xf32>
    %cst_183 = arith.constant dense<0.000000e+00> : vector<1x32xf32>
    %192 = tpu.matmul %190, %191, %cst_183 {dimension_numbers = #tpu.dot_dimension_numbers<[1], [0], [0], [1], [0, 0, 1, 1], [], []>} : vector<1x16xf32>, vector<16x32xf32>, vector<1x32xf32> -> vector<1x32xf32>
    %193 = arith.addf %189, %192 : vector<1x32xf32>
    %194 = vector.extract_strided_slice %156 {offsets = [9, 0], sizes = [1, 16], strides = [1, 1]} : vector<16x16xf32> to vector<1x16xf32>
    %c144 = arith.constant 144 : index
    %c0_184 = arith.constant 0 : index
    %195 = vector.load %arg6[%c144, %c0_184] : memref<256x32xf32, #tpu.memory_space<vmem>>, vector<16x32xf32>
    %cst_185 = arith.constant dense<0.000000e+00> : vector<1x32xf32>
    %196 = tpu.matmul %194, %195, %cst_185 {dimension_numbers = #tpu.dot_dimension_numbers<[1], [0], [0], [1], [0, 0, 1, 1], [], []>} : vector<1x16xf32>, vector<16x32xf32>, vector<1x32xf32> -> vector<1x32xf32>
    %197 = arith.addf %193, %196 : vector<1x32xf32>
    %198 = vector.extract_strided_slice %156 {offsets = [10, 0], sizes = [1, 16], strides = [1, 1]} : vector<16x16xf32> to vector<1x16xf32>
    %c160 = arith.constant 160 : index
    %c0_186 = arith.constant 0 : index
    %199 = vector.load %arg6[%c160, %c0_186] : memref<256x32xf32, #tpu.memory_space<vmem>>, vector<16x32xf32>
    %cst_187 = arith.constant dense<0.000000e+00> : vector<1x32xf32>
    %200 = tpu.matmul %198, %199, %cst_187 {dimension_numbers = #tpu.dot_dimension_numbers<[1], [0], [0], [1], [0, 0, 1, 1], [], []>} : vector<1x16xf32>, vector<16x32xf32>, vector<1x32xf32> -> vector<1x32xf32>
    %201 = arith.addf %197, %200 : vector<1x32xf32>
    %202 = vector.extract_strided_slice %156 {offsets = [11, 0], sizes = [1, 16], strides = [1, 1]} : vector<16x16xf32> to vector<1x16xf32>
    %c176 = arith.constant 176 : index
    %c0_188 = arith.constant 0 : index
    %203 = vector.load %arg6[%c176, %c0_188] : memref<256x32xf32, #tpu.memory_space<vmem>>, vector<16x32xf32>
    %cst_189 = arith.constant dense<0.000000e+00> : vector<1x32xf32>
    %204 = tpu.matmul %202, %203, %cst_189 {dimension_numbers = #tpu.dot_dimension_numbers<[1], [0], [0], [1], [0, 0, 1, 1], [], []>} : vector<1x16xf32>, vector<16x32xf32>, vector<1x32xf32> -> vector<1x32xf32>
    %205 = arith.addf %201, %204 : vector<1x32xf32>
    %206 = vector.extract_strided_slice %156 {offsets = [12, 0], sizes = [1, 16], strides = [1, 1]} : vector<16x16xf32> to vector<1x16xf32>
    %c192 = arith.constant 192 : index
    %c0_190 = arith.constant 0 : index
    %207 = vector.load %arg6[%c192, %c0_190] : memref<256x32xf32, #tpu.memory_space<vmem>>, vector<16x32xf32>
    %cst_191 = arith.constant dense<0.000000e+00> : vector<1x32xf32>
    %208 = tpu.matmul %206, %207, %cst_191 {dimension_numbers = #tpu.dot_dimension_numbers<[1], [0], [0], [1], [0, 0, 1, 1], [], []>} : vector<1x16xf32>, vector<16x32xf32>, vector<1x32xf32> -> vector<1x32xf32>
    %209 = arith.addf %205, %208 : vector<1x32xf32>
    %210 = vector.extract_strided_slice %156 {offsets = [13, 0], sizes = [1, 16], strides = [1, 1]} : vector<16x16xf32> to vector<1x16xf32>
    %c208 = arith.constant 208 : index
    %c0_192 = arith.constant 0 : index
    %211 = vector.load %arg6[%c208, %c0_192] : memref<256x32xf32, #tpu.memory_space<vmem>>, vector<16x32xf32>
    %cst_193 = arith.constant dense<0.000000e+00> : vector<1x32xf32>
    %212 = tpu.matmul %210, %211, %cst_193 {dimension_numbers = #tpu.dot_dimension_numbers<[1], [0], [0], [1], [0, 0, 1, 1], [], []>} : vector<1x16xf32>, vector<16x32xf32>, vector<1x32xf32> -> vector<1x32xf32>
    %213 = arith.addf %209, %212 : vector<1x32xf32>
    %214 = vector.extract_strided_slice %156 {offsets = [14, 0], sizes = [1, 16], strides = [1, 1]} : vector<16x16xf32> to vector<1x16xf32>
    %c224 = arith.constant 224 : index
    %c0_194 = arith.constant 0 : index
    %215 = vector.load %arg6[%c224, %c0_194] : memref<256x32xf32, #tpu.memory_space<vmem>>, vector<16x32xf32>
    %cst_195 = arith.constant dense<0.000000e+00> : vector<1x32xf32>
    %216 = tpu.matmul %214, %215, %cst_195 {dimension_numbers = #tpu.dot_dimension_numbers<[1], [0], [0], [1], [0, 0, 1, 1], [], []>} : vector<1x16xf32>, vector<16x32xf32>, vector<1x32xf32> -> vector<1x32xf32>
    %217 = arith.addf %213, %216 : vector<1x32xf32>
    %218 = vector.extract_strided_slice %156 {offsets = [15, 0], sizes = [1, 16], strides = [1, 1]} : vector<16x16xf32> to vector<1x16xf32>
    %c240 = arith.constant 240 : index
    %c0_196 = arith.constant 0 : index
    %219 = vector.load %arg6[%c240, %c0_196] : memref<256x32xf32, #tpu.memory_space<vmem>>, vector<16x32xf32>
    %cst_197 = arith.constant dense<0.000000e+00> : vector<1x32xf32>
    %220 = tpu.matmul %218, %219, %cst_197 {dimension_numbers = #tpu.dot_dimension_numbers<[1], [0], [0], [1], [0, 0, 1, 1], [], []>} : vector<1x16xf32>, vector<16x32xf32>, vector<1x32xf32> -> vector<1x32xf32>
    %221 = arith.addf %217, %220 : vector<1x32xf32>
    %c0_198 = arith.constant 0 : index
    %c0_199 = arith.constant 0 : index
    %222 = vector.load %arg7[%c0_198, %c0_199] : memref<1x32xf32, #tpu.memory_space<vmem>>, vector<1x32xf32>
    %223 = arith.addf %221, %222 : vector<1x32xf32>
    %cst_200 = arith.constant 0.000000e+00 : f32
    %224 = vector.broadcast %cst_200 : f32 to vector<1x32xf32>
    %225 = arith.maximumf %223, %224 : vector<1x32xf32>
    %c0_201 = arith.constant 0 : index
    %c0_202 = arith.constant 0 : index
    %226 = vector.load %arg8[%c0_201, %c0_202] : memref<32x128xf32, #tpu.memory_space<vmem>>, vector<32x128xf32>
    %cst_203 = arith.constant dense<0.000000e+00> : vector<1x128xf32>
    %227 = tpu.matmul %225, %226, %cst_203 {dimension_numbers = #tpu.dot_dimension_numbers<[1], [0], [0], [1], [0, 0, 1, 1], [], []>} : vector<1x32xf32>, vector<32x128xf32>, vector<1x128xf32> -> vector<1x128xf32>
    %c0_204 = arith.constant 0 : index
    %c0_205 = arith.constant 0 : index
    %228 = vector.load %arg9[%c0_204, %c0_205] : memref<1x128xf32, #tpu.memory_space<vmem>>, vector<1x128xf32>
    %229 = arith.addf %227, %228 : vector<1x128xf32>
    %230 = vector.shape_cast %229 : vector<1x128xf32> to vector<1x1x128xf32>
    %c0_206 = arith.constant 0 : index
    %c0_207 = arith.constant 0 : index
    %c0_208 = arith.constant 0 : index
    %231 = vector.load %arg10[%c0_206, %c0_207, %c0_208] : memref<1x1x128xf32, #tpu.memory_space<vmem>>, vector<1x1x128xf32>
    tpu.vector_store %arg10[%c0_206, %c0_207, %c0_208], %230 {strides = array<i32>} : memref<1x1x128xf32, #tpu.memory_space<vmem>>, vector<1x1x128xf32>,
    return
  }
  func.func @transform_0(%arg0: i32) -> (i32, i32, i32, i32) {
    %c0_i32 = arith.constant 0 : i32
    %c0_i32_0 = arith.constant 0 : i32
    %c0_i32_1 = arith.constant 0 : i32
    %c0_i32_2 = arith.constant 0 : i32
    return %arg0, %c0_i32, %c0_i32_0, %c0_i32_1 : i32, i32, i32, i32
  }
  func.func @transform_1(%arg0: i32) -> (i32, i32, i32, i32) {
    %c0_i32 = arith.constant 0 : i32
    %c0_i32_0 = arith.constant 0 : i32
    %c0_i32_1 = arith.constant 0 : i32
    %c0_i32_2 = arith.constant 0 : i32
    %c0_i32_3 = arith.constant 0 : i32
    return %c0_i32, %c0_i32_0, %c0_i32_1, %c0_i32_2 : i32, i32, i32, i32
  }
  func.func @transform_2(%arg0: i32) -> (i32, i32) {
    %c0_i32 = arith.constant 0 : i32
    %c0_i32_0 = arith.constant 0 : i32
    %c0_i32_1 = arith.constant 0 : i32
    return %c0_i32, %c0_i32_0 : i32, i32
  }
  func.func @transform_3(%arg0: i32) -> (i32, i32, i32, i32) {
    %c0_i32 = arith.constant 0 : i32
    %c0_i32_0 = arith.constant 0 : i32
    %c0_i32_1 = arith.constant 0 : i32
    %c0_i32_2 = arith.constant 0 : i32
    %c0_i32_3 = arith.constant 0 : i32
    return %c0_i32, %c0_i32_0, %c0_i32_1, %c0_i32_2 : i32, i32, i32, i32
  }
  func.func @transform_4(%arg0: i32) -> (i32, i32) {
    %c0_i32 = arith.constant 0 : i32
    %c0_i32_0 = arith.constant 0 : i32
    %c0_i32_1 = arith.constant 0 : i32
    return %c0_i32, %c0_i32_0 : i32, i32
  }
  func.func @transform_5(%arg0: i32) -> (i32, i32) {
    %c0_i32 = arith.constant 0 : i32
    %c0_i32_0 = arith.constant 0 : i32
    %c0_i32_1 = arith.constant 0 : i32
    return %c0_i32, %c0_i32_0 : i32, i32
  }
  func.func @transform_6(%arg0: i32) -> (i32, i32) {
    %c0_i32 = arith.constant 0 : i32
    %c0_i32_0 = arith.constant 0 : i32
    %c0_i32_1 = arith.constant 0 : i32
    return %c0_i32, %c0_i32_0 : i32, i32
  }
  func.func @transform_7(%arg0: i32) -> (i32, i32) {
    %c0_i32 = arith.constant 0 : i32
    %c0_i32_0 = arith.constant 0 : i32
    %c0_i32_1 = arith.constant 0 : i32
    return %c0_i32, %c0_i32_0 : i32, i32
  }
  func.func @transform_8(%arg0: i32) -> (i32, i32) {
    %c0_i32 = arith.constant 0 : i32
    %c0_i32_0 = arith.constant 0 : i32
    %c0_i32_1 = arith.constant 0 : i32
    return %c0_i32, %c0_i32_0 : i32, i32
  }
  func.func @transform_9(%arg0: i32) -> (i32, i32, i32) {
    %c0_i32 = arith.constant 0 : i32
    %c0_i32_0 = arith.constant 0 : i32
    %c0_i32_1 = arith.constant 0 : i32
    return %arg0, %c0_i32, %c0_i32_0 : i32, i32, i32
  }
}

</mosaic_0001>

<bundles_post_ra>
// kernel: modified_wrapper_forward.1
= control target key start
LH: loop header
LB: loop body
LE: loop exit
PB: predicated region body
PF: predicated region fallthrough
CT: control target
= control target key end

     0   :  { %14 = vsyncpa [#allocation4], 0  ;;  %s13033_s0 = inlined_call_operand.vmem [shape: f32[2,18,18,8], index: 0, kind: input, shape index: {}]   ;;  %s13034_s1 = inlined_call_operand.vmem [shape: f32[3,3,8,8], index: 1, kind: input, shape index: {}]   ;;  %s13035_s2 = inlined_call_operand.vmem [shape: f32[1,8], index: 2, kind: input, shape index: {}]   ;;  %s13036_s3 = inlined_call_operand.vmem [shape: f32[3,3,8,16], index: 3, kind: input, shape index: {}]   ;;  %s13037_s4 = inlined_call_operand.vmem [shape: f32[1,16], index: 4, kind: input, shape index: {}]   ;;  %s13038_s5 = inlined_call_operand.vmem [shape: f32[256,32], index: 5, kind: input, shape index: {}]   ;;  %s13039_s6 = inlined_call_operand.vmem [shape: f32[1,32], index: 6, kind: input, shape index: {}]   ;;  %s13040_s7 = inlined_call_operand.vmem [shape: f32[32,128], index: 7, kind: input, shape index: {}]   ;;  %s13041_s8 = inlined_call_operand.vmem [shape: f32[1,128], index: 8, kind: input, shape index: {}]   ;;  %s13042_s9 = inlined_call_operand.hbm [shape: f32[2,1,128], index: 9, kind: output, shape index: {}]  }
   0x1   :  { %16 = vsyncpa [#allocation4 + $0x1], 0  ;;  %s10966_s30 = smov 0   ;;  %s10968_s10 = smov 0  }
   0x2   :  { %s10970_s11 = smov 0   ;;  %s10972_s12 = smov 0  }
   0x3 LB: > { %s10987_s13 = sadd.s32 4294967295, %s10909_s12   ;;  %s8539_s14 = sadd.s32 4294967294, %s10909_s12   ;;  %s10909_s12 = sphi %s10972_s12, %s13172_s12   ;;  %s10905_s11 = sphi %s10970_s11, %s13171_s11   ;;  %s10901_s10 = sphi %s10968_s10, %s13170_s10   ;;  %s10897_s30 = sphi %s10966_s30, %s13169_s30  }
   0x4   : > { %s10991_s15 = sadd.s32 1, %s10909_s12   ;;  %s223_s16 = sadd.s32 1, %s10905_s11 }
   0x5   : > { %s220_s17 = ssub.s32 %s10909_s12, %s10991_s15  ;;  %p233_p0 = scmp.ne.s32.totalorder %s10905_s11, %s10901_s10 }
   0x6   : > { %p221_p1 = scmp.eq.s32.totalorder %s220_s17, 0  ;;  %p234_p2 = scmp.eq.s32.totalorder %s10987_s13, 1 }
   0x7   : > { %p239_p3 = scmp.ne.s32.totalorder %s10901_s10, %s10897_s30  ;;  %p240_p4 = scmp.eq.s32.totalorder %s8539_s14, 1 }
   0x8   : > { %s11002_s18 = scalar_select %p221_p1, %s10905_s11, %s223_s16  }
   0x9   : > { %p11004_p5 = por %p234_p2, %p233_p0  ;;  %p11008_p6 = por %p240_p4, %p239_p3 }
   0xa   : > { %p8542_p7 = scmp.ge.s32.totalorder %s10909_s12, 1  ;;  %p290_p8 = scmp.lt.s32.totalorder %s10909_s12, 3 }
   0xc   : > { %p291_p9 = pnand %p8542_p7, %p290_p8 }
   0xe   : > { %294 = sbr.rel (%p291_p9) target bundleno = 1596 (0x63c), region = 56 }
  0x15   : > { %v11017_v0 = vld [vmem:[%s13034_s1 + $0x10] sm:$0xff]  ;;  %p325_p10 = scmp.lt.s32.totalorder %s10987_s13, 1  ;;  %v8674_v1 = vld [vmem:[%s13034_s1 + $0x18] sm:$0xff]  ;;  %v8544_v2 = vld [vmem:[%s13034_s1 + $0x8] sm:$0xff]  ;;  %vm397_vm0 = vcmask 64512   ;;  %vm5103_vm1 = vcmask 58368  }
  0x16   : > { %9825 = vmatprep.subr.mxu0 %v11017_v0  ;;  %9725 = vmatprep.subr.mxu1 %v8544_v2  ;;  %v8739_v6 = vld [vmem:[%s13034_s1 + $0x20] sm:$0xff]  ;;  %v11075_v13 = vld [vmem:[%s13034_s1 + $0x28] sm:$0xff]  ;;  %vm5443_vm2 = vcmask 1041409   ;;  %vm5445_vm3 = vcmask 1042434   ;;  %vm5447_vm4 = vcmask 1043459   ;;  %vm5449_vm5 = vcmask 1044484  }
  0x17   : > { %9826 = vmatpush3.msra.mxu0 %v11017_v0  ;;  %s326_s27 = scalar_select %p325_p10, %s10987_s13, 1  ;;  %9726 = vmatpush3.msra.mxu1 %v8544_v2  ;;  %v362_v35 = vld [vmem:[%s13034_s1] sm:$0xff]  ;;  %vm5451_vm6 = vcmask 1045509   ;;  %vm5453_vm7 = vcmask 1046534   ;;  %vm5455_vm8 = vcmask 1047559   ;;  %vm10914_vm9 = vmmov 0  }
  0x18   : > { %9875 = vmatprep.subr.mxu0 %v8674_v1  ;;  %9775 = vmatprep.subr.mxu1 %v362_v35  ;;  %vm7177_vm10 = vcmask 130048   ;;  %vm8396_vm11 = vcmask 261120   ;;  %s323_s22 = sand.u32 1, %s10901_s10   ;;  %s9291_s25 = sshll.u32 %s10987_s13, 4 }
  0x19   : > { %s10800_s28 = smul.u32 432, %s326_s27  ;;  %s324_s26 = scalar_lea.vmem [#allocation3], %s323_s22 }
  0x1a   : > { %s8484_s27 = sshll.u32 %s324_s26, 4  ;;  %s12991_s14 = scalar_lea.hbm %s13042_s9, %s9291_s25  ;;  %s12993_s27 = int_to_ptr.vmem [resolvable:$true] %s8484_s27 }
  0x1b   : > { %s11032_s16 = scalar_lea.vmem %s13033_s0, %s10800_s28  ;;  %s8472_s17 = scalar_lea.sflag [#allocation4], %s323_s22 }
  0x1c   : > { %v1040_v3 = vld [vmem:[%s11032_s16 + $0x2] sm:$0xff]  ;;  %v1041_v4 = vld [vmem:[%s11032_s16 + $0xa] sm:$0xff]  ;;  %v11037_v5 = vld [vmem:[%s11032_s16 + $0x1a] sm:$0xff]  ;;  %s10915_s13 = smov [#allocation3]  }
  0x1d   : > { %9827 = vmatprep.mubr.msk.f32.mxu0 %vm397_vm0, %v1040_v3  ;;  %v11047_v7 = vld [vmem:[%s11032_s16 + $0x22] sm:$0xff]  ;;  %v11050_v8 = vld [vmem:[%s11032_s16 + $0x32] sm:$0xff]  ;;  %v11057_v9 = vld [vmem:[%s11032_s16 + $0x3a] sm:$0xff]  ;;  %s10851_s21 = sshll.u32 %s10915_s13, 4  ;;  %s10852_s21 = int_to_ptr.vmem [resolvable:$false] %s10851_s21 }
  0x1e   : > { %9828 = vmatmul.mubr.msk.f32.vlgmr.msra.gmra.mrb[0].mxu0 %vm397_vm0, %v1041_v4  ;;  %13080 = vst [vmem:[#allocation6_spill] sm:$0xff] %v11047_v7  ;;  %13081 = vst [vmem:[#allocation7_spill] sm:$0xff] %v11050_v8  ;;  %v11060_v10 = vld [vmem:[%s11032_s16 + $0x18] sm:$0xff]  ;;  %v11067_v11 = vld [vmem:[%s11032_s16 + $0x20] sm:$0xff]  ;;  %s10853_s23 = scalar_lea.vmem %s10852_s21, 32  ;;  %p10854_p0 = scmp.lt.s32.totalorder %s12993_s27, %s10852_s21 }
  0x1f   : > { %9876 = vmatpush3.msra.mxu0 %v8674_v1  ;;  %9830 = vmatprep.mubr.msk.f32.mxu0 %vm397_vm0, %v11037_v5  ;;  %13082 = vst [vmem:[#allocation8_spill] sm:$0xff] %v11057_v9  ;;  %v11070_v12 = vld [vmem:[%s11032_s16 + $0x30] sm:$0xff]  ;;  %v11082_v14 = vld [vmem:[%s11032_s16 + $0x38] sm:$0xff]  ;;  %v11085_v15 = vld [vmem:[%s11032_s16 + $0x48] sm:$0xff] }
  0x20   : > { %9925 = vmatprep.subr.mxu0 %v8739_v6  ;;  %v363_v16 = vld [vmem:[%s11032_s16 + $0x1] sm:$0xff]  ;;  %v364_v17 = vld [vmem:[%s11032_s16 + $0x9] sm:$0xff]  ;;  %v11094_v18 = vld [vmem:[%s11032_s16 + $0x19] sm:$0xff] }
  0x21   : > { %9727 = vmatprep.mubr.msk.f32.mxu1 %vm397_vm0, %v363_v16  ;;  %v11100_v19 = vld [vmem:[%s11032_s16 + $0x50] sm:$0xff]  ;;  %v11105_v20 = vld [vmem:[%s11032_s16 + $0x60] sm:$0xff]  ;;  %v11120_v23 = vld [vmem:[%s11032_s16 + $0x68] sm:$0xff] }
  0x22   : > { %9831 = vmatmul.mubr.msk.f32.gmra.mrb[2].mxu0 %vm397_vm0, %v11047_v7  ;;  %9728 = vmatmul.mubr.msk.f32.vlgmr.msra.gmra.mrb[0].mxu1 %vm397_vm0, %v364_v17  ;;  %v11108_v21 = vld [vmem:[%s11032_s16 + $0x21] sm:$0xff]  ;;  %v11113_v22 = vld [vmem:[%s11032_s16 + $0x31] sm:$0xff]  ;;  %v11128_v25 = vld [vmem:[%s11032_s16 + $0x39] sm:$0xff] }
  0x23   : > { %9833 = vmatprep.mubr.msk.f32.mxu0 %vm397_vm0, %v11050_v8  ;;  %9730 = vmatprep.mubr.msk.f32.mxu1 %vm397_vm0, %v11094_v18  ;;  %v11125_v24 = vld [vmem:[%s11032_s16 + $0x78] sm:$0xff]  ;;  %v11133_v26 = vld [vmem:[%s11032_s16 + $0x49] sm:$0xff]  ;;  %v11140_v27 = vld [vmem:[%s11032_s16 + $0x80] sm:$0xff] }
  0x24   : > { %v11145_v28 = vld [vmem:[%s11032_s16 + $0x90] sm:$0xff]  ;;  %v11153_v30 = vld [vmem:[%s11032_s16 + $0x61] sm:$0xff]  ;;  %v11160_v31 = vld [vmem:[%s11032_s16 + $0x98] sm:$0xff]  ;;  %9776 = vmatpush3.msra.mxu1 %v362_v35 }
  0x25   : > { %v11148_v29 = vld [vmem:[%s11032_s16 + $0x51] sm:$0xff]  ;;  %v11165_v32 = vld [vmem:[%s11032_s16 + $0xa8] sm:$0xff]  ;;  %v11173_v34 = vld [vmem:[%s11032_s16 + $0x79] sm:$0xff]  ;;  %10478 = vmatprep.subr.mxu1 %v11017_v0 }
  0x26   : > { %9834 = vmatmul.mubr.msk.f32.gmra.mrb[4].mxu0 %vm397_vm0, %v11057_v9  ;;  %9731 = vmatmul.mubr.msk.f32.gmra.mrb[2].mxu1 %vm397_vm0, %v11108_v21  ;;  %v11168_v33 = vld [vmem:[%s11032_s16 + $0x69] sm:$0xff]  ;;  %v11188_v37 = vld [vmem:[%s11032_s16 + $0xc0] sm:$0xff]  ;;  %v11196_v39 = vld [vmem:[%s11032_s16 + $0x91] sm:$0xff] }
  0x27   : > { %9877 = vmatprep.mubr.msk.f32.mxu0 %vm397_vm0, %v11060_v10  ;;  %9733 = vmatprep.mubr.msk.f32.mxu1 %vm397_vm0, %v11113_v22  ;;  %v11183_v36 = vld [vmem:[%s11032_s16 + $0xb0] sm:$0xff]  ;;  %v11191_v38 = vld [vmem:[%s11032_s16 + $0x81] sm:$0xff]  ;;  %v11208_v41 = vld [vmem:[%s11032_s16 + $0xd8] sm:$0xff] }
  0x28   : > { %v11203_v40 = vld [vmem:[%s11032_s16 + $0xc8] sm:$0xff]  ;;  %v11212_v42 = vld [vmem:[%s11032_s16 + $0x99] sm:$0xff]  ;;  %v11229_v45 = vld [vmem:[%s11032_s16 + $0xf0] sm:$0xff] }
  0x29   : > { %v11217_v43 = vld [vmem:[%s11032_s16 + $0xa9] sm:$0xff]  ;;  %v11224_v44 = vld [vmem:[%s11032_s16 + $0xe0] sm:$0xff]  ;;  %v11232_v46 = vld [vmem:[%s11032_s16 + $0xb1] sm:$0xff] }
  0x2a   : > { %9878 = vmatmul.mubr.msk.f32.vlgmr.msra.gmra.mrb[0].mxu0 %vm397_vm0, %v11067_v11  ;;  %9734 = vmatmul.mubr.msk.f32.gmra.mrb[4].mxu1 %vm397_vm0, %v11128_v25  ;;  %v11237_v47 = vld [vmem:[%s11032_s16 + $0xc1] sm:$0xff]  ;;  %v11244_v48 = vld [vmem:[%s11032_s16 + $0xf8] sm:$0xff]  ;;  %v11252_v50 = vld [vmem:[%s11032_s16 + $0xc9] sm:$0xff] }
  0x2b   : > { %9926 = vmatpush3.msra.mxu0 %v8739_v6  ;;  %9880 = vmatprep.mubr.msk.f32.mxu0 %vm397_vm0, %v11070_v12  ;;  %v11249_v49 = vld [vmem:[%s11032_s16 + $0x108] sm:$0xff]  ;;  %v11257_v51 = vld [vmem:[%s11032_s16 + $0xd9] sm:$0xff]  ;;  %v11264_v52 = vld [vmem:[%s11032_s16 + $0x110] sm:$0xff] }
  0x2c   : > { %9975 = vmatprep.subr.mxu0 %v11075_v13  ;;  %9736 = vmatprep.mubr.msk.f32.mxu1 %vm397_vm0, %v11133_v26  ;;  %v11269_v53 = vld [vmem:[%s11032_s16 + $0x120] sm:$0xff]  ;;  %v11277_v55 = vld [vmem:[%s11032_s16 + $0xf1] sm:$0xff]  ;;  %v11284_v56 = vld [vmem:[%s11032_s16 + $0x128] sm:$0xff] }
  0x2d   : > { %v11272_v54 = vld [vmem:[%s11032_s16 + $0xe1] sm:$0xff]  ;;  %v11289_v57 = vld [vmem:[%s11032_s16 + $0x138] sm:$0xff]  ;;  %v11297_v59 = vld [vmem:[%s11032_s16 + $0x109] sm:$0xff] }
  0x2e   : > { %9881 = vmatmul.mubr.msk.f32.gmra.mrb[2].mxu0 %vm397_vm0, %v11082_v14  ;;  %9737 = vmatmul.mubr.msk.f32.gmra.mrb[6].mxu1 %vm397_vm0, %v11148_v29  ;;  %v11292_v58 = vld [vmem:[%s11032_s16 + $0xf9] sm:$0xff]  ;;  %v11309_v61 = vld [vmem:[%s11032_s16 + $0x150] sm:$0xff]  ;;  %v11317_v63 = vld [vmem:[%s11032_s16 + $0x121] sm:$0xff] }
  0x2f   : > { %9883 = vmatprep.mubr.msk.f32.mxu0 %vm397_vm0, %v11085_v15  ;;  %9739 = vmatprep.mubr.msk.f32.mxu1 %vm397_vm0, %v11153_v30  ;;  %v11304_v60 = vld [vmem:[%s11032_s16 + $0x140] sm:$0xff]  ;;  %v11312_v62 = vld [vmem:[%s11032_s16 + $0x111] sm:$0xff]  ;;  %v11329_v2 = vld [vmem:[%s11032_s16 + $0x168] sm:$0xff] }
  0x30   : > { %v11324_v1 = vld [vmem:[%s11032_s16 + $0x158] sm:$0xff]  ;;  %13083 = vst [vmem:[#allocation9_spill] sm:$0xff] %v11329_v2  ;;  %v11332_v3 = vld [vmem:[%s11032_s16 + $0x129] sm:$0xff]  ;;  %v11349_v16 = vld [vmem:[%s11032_s16 + $0x180] sm:$0xff] }
  0x31   : > { %v11337_v4 = vld [vmem:[%s11032_s16 + $0x139] sm:$0xff]  ;;  %v11344_v6 = vld [vmem:[%s11032_s16 + $0x170] sm:$0xff]  ;;  %13085 = vst [vmem:[#allocation11_spill] sm:$0xff] %v11349_v16  ;;  %v11352_v17 = vld [vmem:[%s11032_s16 + $0x141] sm:$0xff] }
  0x32   : > { %9884 = vmatmul.mubr.msk.f32.gmra.mrb[4].mxu0 %vm397_vm0, %v11100_v19  ;;  %9740 = vmatmul.mubr.msk.f32.gmra.mrb[8].mxu1 %vm397_vm0, %v11168_v33  ;;  %13084 = vst [vmem:[#allocation10_spill] sm:$0xff] %v11344_v6  ;;  %v11357_v35 = vld [vmem:[%s11032_s16 + $0x151] sm:$0xff]  ;;  %v11364_v9 = vld [vmem:[%s11032_s16 + $0x188] sm:$0xff]  ;;  %v11369_v8 = vld [vmem:[%s11032_s16 + $0x159] sm:$0xff] }
  0x33   : > { %9886 = vmatprep.mubr.msk.f32.mxu0 %vm397_vm0, %v11105_v20  ;;  %9742 = vmatprep.mubr.msk.f32.mxu1 %vm397_vm0, %v11173_v34  ;;  %v11388_v7 = vld [vmem:[%s13034_s1 + $0x30] sm:$0xff] }
  0x36   : > { %9887 = vmatmul.mubr.msk.f32.gmra.mrb[6].mxu0 %vm397_vm0, %v11120_v23  ;;  %9743 = vmatmul.mubr.msk.f32.gmra.mrb[10].mxu1 %vm397_vm0, %v11191_v38 }
  0x37   : > { %9889 = vmatprep.mubr.msk.f32.mxu0 %vm397_vm0, %v11125_v24  ;;  %9745 = vmatprep.mubr.msk.f32.mxu1 %vm397_vm0, %v11196_v39 }
  0x3a   : > { %9890 = vmatmul.mubr.msk.f32.gmra.mrb[8].mxu0 %vm397_vm0, %v11140_v27  ;;  %9746 = vmatmul.mubr.msk.f32.gmra.mrb[12].mxu1 %vm397_vm0, %v11212_v42 }
  0x3b   : > { %9892 = vmatprep.mubr.msk.f32.mxu0 %vm397_vm0, %v11145_v28  ;;  %9748 = vmatprep.mubr.msk.f32.mxu1 %vm397_vm0, %v11217_v43 }
  0x3e   : > { %9893 = vmatmul.mubr.msk.f32.gmra.mrb[10].mxu0 %vm397_vm0, %v11160_v31  ;;  %9749 = vmatmul.mubr.msk.f32.gmra.mrb[14].mxu1 %vm397_vm0, %v11232_v46 }
  0x3f   : > { %9895 = vmatprep.mubr.msk.f32.mxu0 %vm397_vm0, %v11165_v32  ;;  %9751 = vmatprep.mubr.msk.f32.mxu1 %vm397_vm0, %v11237_v47 }
  0x42   : > { %9896 = vmatmul.mubr.msk.f32.gmra.mrb[12].mxu0 %vm397_vm0, %v11183_v36  ;;  %9752 = vmatmul.mubr.msk.f32.gmra.mrb[16].mxu1 %vm397_vm0, %v11252_v50 }
  0x43   : > { %9898 = vmatprep.mubr.msk.f32.mxu0 %vm397_vm0, %v11188_v37  ;;  %9754 = vmatprep.mubr.msk.f32.mxu1 %vm397_vm0, %v11257_v51 }
  0x46   : > { %9899 = vmatmul.mubr.msk.f32.gmra.mrb[14].mxu0 %vm397_vm0, %v11203_v40  ;;  %9755 = vmatmul.mubr.msk.f32.gmra.mrb[18].mxu1 %vm397_vm0, %v11272_v54 }
  0x47   : > { %9901 = vmatprep.mubr.msk.f32.mxu0 %vm397_vm0, %v11208_v41  ;;  %9757 = vmatprep.mubr.msk.f32.mxu1 %vm397_vm0, %v11277_v55 }
  0x4a   : > { %9902 = vmatmul.mubr.msk.f32.gmra.mrb[16].mxu0 %vm397_vm0, %v11224_v44  ;;  %9758 = vmatmul.mubr.msk.f32.gmra.mrb[20].mxu1 %vm397_vm0, %v11292_v58 }
  0x4b   : > { %9904 = vmatprep.mubr.msk.f32.mxu0 %vm397_vm0, %v11229_v45  ;;  %9760 = vmatprep.mubr.msk.f32.mxu1 %vm397_vm0, %v11297_v59 }
  0x4e   : > { %9905 = vmatmul.mubr.msk.f32.gmra.mrb[18].mxu0 %vm397_vm0, %v11244_v48  ;;  %9761 = vmatmul.mubr.msk.f32.gmra.mrb[22].mxu1 %vm397_vm0, %v11312_v62 }
  0x4f   : > { %9907 = vmatprep.mubr.msk.f32.mxu0 %vm397_vm0, %v11249_v49  ;;  %9763 = vmatprep.mubr.msk.f32.mxu1 %vm397_vm0, %v11317_v63 }
  0x52   : > { %9908 = vmatmul.mubr.msk.f32.gmra.mrb[20].mxu0 %vm397_vm0, %v11264_v52  ;;  %9764 = vmatmul.mubr.msk.f32.gmra.mrb[24].mxu1 %vm397_vm0, %v11332_v3 }
  0x53   : > { %9910 = vmatprep.mubr.msk.f32.mxu0 %vm397_vm0, %v11269_v53  ;;  %9766 = vmatprep.mubr.msk.f32.mxu1 %vm397_vm0, %v11337_v4 }
  0x56   : > { %9911 = vmatmul.mubr.msk.f32.gmra.mrb[22].mxu0 %vm397_vm0, %v11284_v56  ;;  %9767 = vmatmul.mubr.msk.f32.gmra.mrb[26].mxu1 %vm397_vm0, %v11352_v17 }
  0x57   : > { %9913 = vmatprep.mubr.msk.f32.mxu0 %vm397_vm0, %v11289_v57  ;;  %9769 = vmatprep.mubr.msk.f32.mxu1 %vm397_vm0, %v11357_v35 }
  0x5a   : > { %9914 = vmatmul.mubr.msk.f32.gmra.mrb[24].mxu0 %vm397_vm0, %v11304_v60  ;;  %9770 = vmatmul.mubr.msk.f32.gmra.mrb[28].mxu1 %vm397_vm0, %v11369_v8 }
  0x5b   : > { %9916 = vmatprep.mubr.msk.f32.mxu0 %vm397_vm0, %v11309_v61 }
  0x5e   : > { %9917 = vmatmul.mubr.msk.f32.gmra.mrb[26].mxu0 %vm397_vm0, %v11324_v1 }
  0x5f   : > { %9919 = vmatprep.mubr.msk.f32.mxu0 %vm397_vm0, %v11329_v2  ;;  %v330_v2 = vld [vmem:[%s11032_s16] sm:$0xff] }
  0x62   : > { %9920 = vmatmul.mubr.msk.f32.gmra.mrb[28].mxu0 %vm397_vm0, %v11344_v6  ;;  %v11374_v6 = vld [vmem:[%s11032_s16 + $0x169] sm:$0xff] }
  0x63   : > { %9922 = vmatprep.mubr.msk.f32.mxu0 %vm397_vm0, %v11349_v16  ;;  %9772 = vmatprep.mubr.msk.f32.mxu1 %vm397_vm0, %v11374_v6  ;;  %v11383_v16 = vld [vmem:[%s11032_s16 + $0x171] sm:$0xff] }
  0x64   : > { %9773 = vmatmul.mubr.msk.f32.gmra.mrb[30].mxu1 %vm397_vm0, %v11383_v16 }
  0x65   : > { %9777 = vmatprep.mubr.msk.f32.mxu1 %vm397_vm0, %v330_v2  ;;  %v13090_v2 = vld [vmem:[#allocation10_spill] sm:$0xff] }
  0x66   : > { %9923 = vmatmul.mubr.msk.f32.gmra.mrb[30].mxu0 %vm397_vm0, %v11364_v9 }
  0x67   : > { %9927 = vmatprep.mubr.msk.f32.mxu0 %vm397_vm0, %v11094_v18  ;;  %v331_v18 = vld [vmem:[%s11032_s16 + $0x8] sm:$0xff] }
  0x68   : > { %9778 = vmatmul.mubr.msk.f32.vlgmr.msra.gmra.mrb[0].mxu1 %vm397_vm0, %v331_v18  ;;  %v13091_v18 = vld [vmem:[#allocation7_spill] sm:$0xff] }
  0x69   : > { %9780 = vmatprep.mubr.msk.f32.mxu1 %vm397_vm0, %v11060_v10  ;;  %10479 = vmatpush3.msra.mxu1 %v11017_v0  ;;  %v11506_v0 = vld [vmem:[%s11032_s16 + $0x181] sm:$0xff]  ;;  %v11515_v10 = vld [vmem:[%s11032_s16 + $0x189] sm:$0xff] }
  0x6a   : > { %9928 = vmatmul.mubr.msk.f32.vlgmr.msra.gmra.mrb[0].mxu0 %vm397_vm0, %v11108_v21  ;;  %13086 = vst [vmem:[#allocation12_spill] sm:$0xff] %v11506_v0  ;;  %13087 = vst [vmem:[#allocation13_spill] sm:$0xff] %v11515_v10  ;;  %v13089_v21 = vld [vmem:[#allocation6_spill] sm:$0xff] }
  0x6b   : > { %9976 = vmatpush3.msra.mxu0 %v11075_v13  ;;  %9930 = vmatprep.mubr.msk.f32.mxu0 %vm397_vm0, %v11113_v22  ;;  %v11530_v13 = vld [vmem:[%s13034_s1 + $0x38] sm:$0xff] }
  0x6c   : > { %10025 = vmatprep.subr.mxu0 %v11388_v7  ;;  %9781 = vmatmul.mubr.msk.f32.gmra.mrb[2].mxu1 %vm397_vm0, %v11067_v11  ;;  %v13088_v11 = vld [vmem:[#allocation9_spill] sm:$0xff] }
  0x6d   : > { %9783 = vmatprep.mubr.msk.f32.mxu1 %vm397_vm0, %v11070_v12 }
  0x6e   : > { %9931 = vmatmul.mubr.msk.f32.gmra.mrb[2].mxu0 %vm397_vm0, %v11128_v25 }
  0x6f   : > { %9933 = vmatprep.mubr.msk.f32.mxu0 %vm397_vm0, %v11133_v26 }
  0x70   : > { %9784 = vmatmul.mubr.msk.f32.gmra.mrb[4].mxu1 %vm397_vm0, %v11082_v14 }
  0x71   : > { %9786 = vmatprep.mubr.msk.f32.mxu1 %vm397_vm0, %v11085_v15 }
  0x72   : > { %9934 = vmatmul.mubr.msk.f32.gmra.mrb[4].mxu0 %vm397_vm0, %v11148_v29 }
  0x73   : > { %9936 = vmatprep.mubr.msk.f32.mxu0 %vm397_vm0, %v11153_v30 }
  0x74   : > { %9787 = vmatmul.mubr.msk.f32.gmra.mrb[6].mxu1 %vm397_vm0, %v11100_v19 }
  0x75   : > { %9789 = vmatprep.mubr.msk.f32.mxu1 %vm397_vm0, %v11105_v20 }
  0x76   : > { %9937 = vmatmul.mubr.msk.f32.gmra.mrb[6].mxu0 %vm397_vm0, %v11168_v33 }
  0x77   : > { %9939 = vmatprep.mubr.msk.f32.mxu0 %vm397_vm0, %v11173_v34 }
  0x78   : > { %9790 = vmatmul.mubr.msk.f32.gmra.mrb[8].mxu1 %vm397_vm0, %v11120_v23 }
  0x79   : > { %9792 = vmatprep.mubr.msk.f32.mxu1 %vm397_vm0, %v11125_v24 }
  0x7a   : > { %9940 = vmatmul.mubr.msk.f32.gmra.mrb[8].mxu0 %vm397_vm0, %v11191_v38 }
  0x7b   : > { %9942 = vmatprep.mubr.msk.f32.mxu0 %vm397_vm0, %v11196_v39 }
  0x7c   : > { %9793 = vmatmul.mubr.msk.f32.gmra.mrb[10].mxu1 %vm397_vm0, %v11140_v27 }
  0x7d   : > { %9795 = vmatprep.mubr.msk.f32.mxu1 %vm397_vm0, %v11145_v28 }
  0x7e   : > { %9943 = vmatmul.mubr.msk.f32.gmra.mrb[10].mxu0 %vm397_vm0, %v11212_v42 }
  0x7f   : > { %9945 = vmatprep.mubr.msk.f32.mxu0 %vm397_vm0, %v11217_v43 }
  0x80   : > { %9796 = vmatmul.mubr.msk.f32.gmra.mrb[12].mxu1 %vm397_vm0, %v11160_v31 }
  0x81   : > { %9798 = vmatprep.mubr.msk.f32.mxu1 %vm397_vm0, %v11165_v32 }
  0x82   : > { %9946 = vmatmul.mubr.msk.f32.gmra.mrb[12].mxu0 %vm397_vm0, %v11232_v46 }
  0x83   : > { %9948 = vmatprep.mubr.msk.f32.mxu0 %vm397_vm0, %v11237_v47 }
  0x84   : > { %9799 = vmatmul.mubr.msk.f32.gmra.mrb[14].mxu1 %vm397_vm0, %v11183_v36 }
  0x85   : > { %9801 = vmatprep.mubr.msk.f32.mxu1 %vm397_vm0, %v11188_v37 }
  0x86   : > { %9949 = vmatmul.mubr.msk.f32.gmra.mrb[14].mxu0 %vm397_vm0, %v11252_v50 }
  0x87   : > { %9951 = vmatprep.mubr.msk.f32.mxu0 %vm397_vm0, %v11257_v51 }
  0x88   : > { %9802 = vmatmul.mubr.msk.f32.gmra.mrb[16].mxu1 %vm397_vm0, %v11203_v40 }
  0x89   : > { %9804 = vmatprep.mubr.msk.f32.mxu1 %vm397_vm0, %v11208_v41 }
  0x8a   : > { %9952 = vmatmul.mubr.msk.f32.gmra.mrb[16].mxu0 %vm397_vm0, %v11272_v54 }
  0x8b   : > { %9954 = vmatprep.mubr.msk.f32.mxu0 %vm397_vm0, %v11277_v55 }
  0x8c   : > { %9805 = vmatmul.mubr.msk.f32.gmra.mrb[18].mxu1 %vm397_vm0, %v11224_v44 }
  0x8d   : > { %9807 = vmatprep.mubr.msk.f32.mxu1 %vm397_vm0, %v11229_v45 }
  0x8e   : > { %9955 = vmatmul.mubr.msk.f32.gmra.mrb[18].mxu0 %vm397_vm0, %v11292_v58 }
  0x8f   : > { %9957 = vmatprep.mubr.msk.f32.mxu0 %vm397_vm0, %v11297_v59 }
  0x90   : > { %9808 = vmatmul.mubr.msk.f32.gmra.mrb[20].mxu1 %vm397_vm0, %v11244_v48 }
  0x91   : > { %9810 = vmatprep.mubr.msk.f32.mxu1 %vm397_vm0, %v11249_v49 }
  0x92   : > { %9958 = vmatmul.mubr.msk.f32.gmra.mrb[20].mxu0 %vm397_vm0, %v11312_v62 }
  0x93   : > { %9960 = vmatprep.mubr.msk.f32.mxu0 %vm397_vm0, %v11317_v63 }
  0x94   : > { %9811 = vmatmul.mubr.msk.f32.gmra.mrb[22].mxu1 %vm397_vm0, %v11264_v52 }
  0x95   : > { %9813 = vmatprep.mubr.msk.f32.mxu1 %vm397_vm0, %v11269_v53 }
  0x96   : > { %9961 = vmatmul.mubr.msk.f32.gmra.mrb[22].mxu0 %vm397_vm0, %v11332_v3 }
  0x97   : > { %9963 = vmatprep.mubr.msk.f32.mxu0 %vm397_vm0, %v11337_v4 }
  0x98   : > { %9814 = vmatmul.mubr.msk.f32.gmra.mrb[24].mxu1 %vm397_vm0, %v11284_v56 }
  0x99   : > { %9816 = vmatprep.mubr.msk.f32.mxu1 %vm397_vm0, %v11289_v57 }
  0x9a   : > { %9964 = vmatmul.mubr.msk.f32.gmra.mrb[24].mxu0 %vm397_vm0, %v11352_v17 }
  0x9b   : > { %9966 = vmatprep.mubr.msk.f32.mxu0 %vm397_vm0, %v11357_v35 }
  0x9c   : > { %9817 = vmatmul.mubr.msk.f32.gmra.mrb[26].mxu1 %vm397_vm0, %v11304_v60 }
  0x9d   : > { %9819 = vmatprep.mubr.msk.f32.mxu1 %vm397_vm0, %v11309_v61 }
  0x9e   : > { %9967 = vmatmul.mubr.msk.f32.gmra.mrb[26].mxu0 %vm397_vm0, %v11369_v8 }
  0x9f   : > { %9969 = vmatprep.mubr.msk.f32.mxu0 %vm397_vm0, %v11374_v6 }
  0xa0   : > { %9820 = vmatmul.mubr.msk.f32.gmra.mrb[28].mxu1 %vm397_vm0, %v11324_v1 }
  0xa1   : > { %9822 = vmatprep.mubr.msk.f32.mxu1 %vm397_vm0, %v13088_v11 }
  0xa2   : > { %9970 = vmatmul.mubr.msk.f32.gmra.mrb[28].mxu0 %vm397_vm0, %v11383_v16 }
  0xa3   : > { %9972 = vmatprep.mubr.msk.f32.mxu0 %vm397_vm0, %v11506_v0  ;;  %v11551_v0 = vld [vmem:[%s11032_s16 + $0x62] sm:$0xff] }
  0xa4   : > { %9823 = vmatmul.mubr.msk.f32.gmra.mrb[30].mxu1 %vm397_vm0, %v13090_v2  ;;  %13095 = vst [vmem:[#allocation10_spill] sm:$0xff] %v11551_v0 }
  0xa6   : > { %9973 = vmatmul.mubr.msk.f32.gmra.mrb[30].mxu0 %vm397_vm0, %v11515_v10  ;;  %v11546_v10 = vld [vmem:[%s11032_s16 + $0x52] sm:$0xff] }
  0xa7   : > { %9977 = vmatprep.mubr.msk.f32.mxu0 %vm397_vm0, %v11037_v5  ;;  %v11540_v5 = vld [vmem:[%s11032_s16 + $0x4a] sm:$0xff]  ;;  %13093 = vst [vmem:[#allocation6_spill] sm:$0xff] %v11546_v10 }
  0xa8   : > { %13092 = vst [vmem:[#allocation9_spill] sm:$0xff] %v11540_v5  ;;  %9836 = vmatprep.mubr.msk.f32.mxu1 %vm397_vm0, %v11540_v5 }
  0xa9   : > { %9837 = vmatmul.mubr.msk.f32.vlgmr.msra.gmra.mrb[6].mxu1 %vm397_vm0, %v11546_v10 }
  0xaa   : > { %9978 = vmatmul.mubr.msk.f32.vlgmr.msra.gmra.mrb[0].mxu0 %vm397_vm0, %v13089_v21  ;;  %v13094_v21 = vld [vmem:[#allocation8_spill] sm:$0xff]  ;;  %9839 = vmatprep.mubr.msk.f32.mxu1 %vm397_vm0, %v11551_v0 }
  0xab   : > { %10026 = vmatpush3.msra.mxu0 %v11388_v7  ;;  %9980 = vmatprep.mubr.msk.f32.mxu0 %vm397_vm0, %v13091_v18  ;;  %v11560_v7 = vld [vmem:[%s11032_s16 + $0x6a] sm:$0xff]  ;;  %v11565_v18 = vld [vmem:[%s11032_s16 + $0x7a] sm:$0xff] }
  0xac   : > { %10075 = vmatprep.subr.mxu0 %v11530_v13  ;;  %13096 = vst [vmem:[#allocation7_spill] sm:$0xff] %v11560_v7  ;;  %13097 = vst [vmem:[#allocation8_spill] sm:$0xff] %v11565_v18 }
  0xad   : > { %9840 = vmatmul.mubr.msk.f32.gmra.mrb[8].mxu1 %vm397_vm0, %v11560_v7 }
  0xae   : > { %9981 = vmatmul.mubr.msk.f32.gmra.mrb[2].mxu0 %vm397_vm0, %v13094_v21  ;;  %9842 = vmatprep.mubr.msk.f32.mxu1 %vm397_vm0, %v11565_v18  ;;  %v11574_v21 = vld [vmem:[%s11032_s16 + $0x82] sm:$0xff] }
  0xaf   : > { %9983 = vmatprep.mubr.msk.f32.mxu0 %vm397_vm0, %v11540_v5  ;;  %13098 = vst [vmem:[#allocation14_spill] sm:$0xff] %v11574_v21  ;;  %v11579_v5 = vld [vmem:[%s11032_s16 + $0x92] sm:$0xff] }
  0xb0   : > { %13099 = vst [vmem:[#allocation15_spill] sm:$0xff] %v11579_v5 }
  0xb1   : > { %9843 = vmatmul.mubr.msk.f32.gmra.mrb[10].mxu1 %vm397_vm0, %v11574_v21 }
  0xb2   : > { %9984 = vmatmul.mubr.msk.f32.gmra.mrb[4].mxu0 %vm397_vm0, %v11546_v10  ;;  %9845 = vmatprep.mubr.msk.f32.mxu1 %vm397_vm0, %v11579_v5  ;;  %v11593_v10 = vld [vmem:[%s11032_s16 + $0xaa] sm:$0xff] }
  0xb3   : > { %9986 = vmatprep.mubr.msk.f32.mxu0 %vm397_vm0, %v11551_v0  ;;  %v11588_v0 = vld [vmem:[%s11032_s16 + $0x9a] sm:$0xff]  ;;  %13101 = vst [vmem:[#allocation17_spill] sm:$0xff] %v11593_v10 }
  0xb4   : > { %13100 = vst [vmem:[#allocation16_spill] sm:$0xff] %v11588_v0 }
  0xb5   : > { %9846 = vmatmul.mubr.msk.f32.gmra.mrb[12].mxu1 %vm397_vm0, %v11588_v0 }
  0xb6   : > { %9987 = vmatmul.mubr.msk.f32.gmra.mrb[6].mxu0 %vm397_vm0, %v11560_v7  ;;  %9848 = vmatprep.mubr.msk.f32.mxu1 %vm397_vm0, %v11593_v10  ;;  %v11607_v7 = vld [vmem:[%s11032_s16 + $0xc2] sm:$0xff] }
  0xb7   : > { %9989 = vmatprep.mubr.msk.f32.mxu0 %vm397_vm0, %v11565_v18  ;;  %v11602_v18 = vld [vmem:[%s11032_s16 + $0xb2] sm:$0xff]  ;;  %13103 = vst [vmem:[#allocation19_spill] sm:$0xff] %v11607_v7 }
  0xb8   : > { %13102 = vst [vmem:[#allocation18_spill] sm:$0xff] %v11602_v18 }
  0xb9   : > { %9849 = vmatmul.mubr.msk.f32.gmra.mrb[14].mxu1 %vm397_vm0, %v11602_v18 }
  0xba   : > { %9990 = vmatmul.mubr.msk.f32.gmra.mrb[8].mxu0 %vm397_vm0, %v11574_v21  ;;  %9851 = vmatprep.mubr.msk.f32.mxu1 %vm397_vm0, %v11607_v7  ;;  %v11621_v21 = vld [vmem:[%s11032_s16 + $0xda] sm:$0xff] }
  0xbb   : > { %9992 = vmatprep.mubr.msk.f32.mxu0 %vm397_vm0, %v11579_v5  ;;  %v11616_v5 = vld [vmem:[%s11032_s16 + $0xca] sm:$0xff]  ;;  %13105 = vst [vmem:[#allocation21_spill] sm:$0xff] %v11621_v21 }
  0xbc   : > { %13104 = vst [vmem:[#allocation20_spill] sm:$0xff] %v11616_v5 }
  0xbd   : > { %9852 = vmatmul.mubr.msk.f32.gmra.mrb[16].mxu1 %vm397_vm0, %v11616_v5 }
  0xbe   : > { %9993 = vmatmul.mubr.msk.f32.gmra.mrb[10].mxu0 %vm397_vm0, %v11588_v0  ;;  %9854 = vmatprep.mubr.msk.f32.mxu1 %vm397_vm0, %v11621_v21  ;;  %v11635_v0 = vld [vmem:[%s11032_s16 + $0xf2] sm:$0xff] }
  0xbf   : > { %9995 = vmatprep.mubr.msk.f32.mxu0 %vm397_vm0, %v11593_v10  ;;  %v11630_v10 = vld [vmem:[%s11032_s16 + $0xe2] sm:$0xff]  ;;  %13107 = vst [vmem:[#allocation23_spill] sm:$0xff] %v11635_v0 }
  0xc0   : > { %13106 = vst [vmem:[#allocation22_spill] sm:$0xff] %v11630_v10 }
  0xc1   : > { %9855 = vmatmul.mubr.msk.f32.gmra.mrb[18].mxu1 %vm397_vm0, %v11630_v10 }
  0xc2   : > { %9996 = vmatmul.mubr.msk.f32.gmra.mrb[12].mxu0 %vm397_vm0, %v11602_v18  ;;  %9857 = vmatprep.mubr.msk.f32.mxu1 %vm397_vm0, %v11635_v0  ;;  %v11649_v18 = vld [vmem:[%s11032_s16 + $0x10a] sm:$0xff] }
  0xc3   : > { %9998 = vmatprep.mubr.msk.f32.mxu0 %vm397_vm0, %v11607_v7  ;;  %v11644_v7 = vld [vmem:[%s11032_s16 + $0xfa] sm:$0xff]  ;;  %13109 = vst [vmem:[#allocation25_spill] sm:$0xff] %v11649_v18 }
  0xc4   : > { %13108 = vst [vmem:[#allocation24_spill] sm:$0xff] %v11644_v7 }
  0xc5   : > { %9858 = vmatmul.mubr.msk.f32.gmra.mrb[20].mxu1 %vm397_vm0, %v11644_v7 }
  0xc6   : > { %9999 = vmatmul.mubr.msk.f32.gmra.mrb[14].mxu0 %vm397_vm0, %v11616_v5  ;;  %9860 = vmatprep.mubr.msk.f32.mxu1 %vm397_vm0, %v11649_v18  ;;  %v11663_v5 = vld [vmem:[%s11032_s16 + $0x122] sm:$0xff] }
  0xc7   : > { %10001 = vmatprep.mubr.msk.f32.mxu0 %vm397_vm0, %v11621_v21  ;;  %v11658_v21 = vld [vmem:[%s11032_s16 + $0x112] sm:$0xff]  ;;  %13111 = vst [vmem:[#allocation27_spill] sm:$0xff] %v11663_v5 }
  0xc8   : > { %13110 = vst [vmem:[#allocation26_spill] sm:$0xff] %v11658_v21 }
  0xc9   : > { %9861 = vmatmul.mubr.msk.f32.gmra.mrb[22].mxu1 %vm397_vm0, %v11658_v21 }
  0xca   : > { %10002 = vmatmul.mubr.msk.f32.gmra.mrb[16].mxu0 %vm397_vm0, %v11630_v10  ;;  %9863 = vmatprep.mubr.msk.f32.mxu1 %vm397_vm0, %v11663_v5  ;;  %v11677_v10 = vld [vmem:[%s11032_s16 + $0x13a] sm:$0xff] }
  0xcb   : > { %10004 = vmatprep.mubr.msk.f32.mxu0 %vm397_vm0, %v11635_v0  ;;  %v11672_v0 = vld [vmem:[%s11032_s16 + $0x12a] sm:$0xff]  ;;  %13112 = vst [vmem:[#allocation28_spill] sm:$0xff] %v11677_v10 }
  0xcd   : > { %9864 = vmatmul.mubr.msk.f32.gmra.mrb[24].mxu1 %vm397_vm0, %v11672_v0 }
  0xce   : > { %10005 = vmatmul.mubr.msk.f32.gmra.mrb[18].mxu0 %vm397_vm0, %v11644_v7  ;;  %9866 = vmatprep.mubr.msk.f32.mxu1 %vm397_vm0, %v11677_v10  ;;  %v11691_v7 = vld [vmem:[%s11032_s16 + $0x152] sm:$0xff] }
  0xcf   : > { %10007 = vmatprep.mubr.msk.f32.mxu0 %vm397_vm0, %v11649_v18  ;;  %v11686_v18 = vld [vmem:[%s11032_s16 + $0x142] sm:$0xff]  ;;  %13114 = vst [vmem:[#allocation30_spill] sm:$0xff] %v11691_v7 }
  0xd0   : > { %13113 = vst [vmem:[#allocation29_spill] sm:$0xff] %v11686_v18 }
  0xd1   : > { %9867 = vmatmul.mubr.msk.f32.gmra.mrb[26].mxu1 %vm397_vm0, %v11686_v18 }
  0xd2   : > { %10008 = vmatmul.mubr.msk.f32.gmra.mrb[20].mxu0 %vm397_vm0, %v11658_v21  ;;  %9869 = vmatprep.mubr.msk.f32.mxu1 %vm397_vm0, %v11691_v7  ;;  %v11705_v21 = vld [vmem:[%s11032_s16 + $0x16a] sm:$0xff] }
  0xd3   : > { %10010 = vmatprep.mubr.msk.f32.mxu0 %vm397_vm0, %v11663_v5  ;;  %v11700_v5 = vld [vmem:[%s11032_s16 + $0x15a] sm:$0xff]  ;;  %13115 = vst [vmem:[#allocation31_spill] sm:$0xff] %v11705_v21 }
  0xd5   : > { %9870 = vmatmul.mubr.msk.f32.gmra.mrb[28].mxu1 %vm397_vm0, %v11700_v5 }
  0xd6   : > { %10011 = vmatmul.mubr.msk.f32.gmra.mrb[22].mxu0 %vm397_vm0, %v11672_v0  ;;  %9872 = vmatprep.mubr.msk.f32.mxu1 %vm397_vm0, %v11705_v21 }
  0xd7   : > { %10013 = vmatprep.mubr.msk.f32.mxu0 %vm397_vm0, %v11677_v10  ;;  %v11714_v10 = vld [vmem:[%s11032_s16 + $0x172] sm:$0xff] }
  0xd9   : > { %9873 = vmatmul.mubr.msk.f32.gmra.mrb[30].mxu1 %vm397_vm0, %v11714_v10 }
  0xda   : > { %10014 = vmatmul.mubr.msk.f32.gmra.mrb[24].mxu0 %vm397_vm0, %v11686_v18  ;;  %v11723_v18 = vld [vmem:[%s11032_s16 + $0x182] sm:$0xff] }
  0xdb   : > { %10016 = vmatprep.mubr.msk.f32.mxu0 %vm397_vm0, %v11691_v7  ;;  %v11730_v7 = vld [vmem:[%s11032_s16 + $0x18a] sm:$0xff] }
  0xde   : > { %10017 = vmatmul.mubr.msk.f32.gmra.mrb[26].mxu0 %vm397_vm0, %v11700_v5 }
  0xdf   : > { %10019 = vmatprep.mubr.msk.f32.mxu0 %vm397_vm0, %v11705_v21  ;;  %v8999_v21 = vld [vmem:[%s13034_s1 + $0x40] sm:$0xff] }
  0xe2   : > { %10020 = vmatmul.mubr.msk.f32.gmra.mrb[28].mxu0 %vm397_vm0, %v11714_v10 }
  0xe3   : > { %10022 = vmatprep.mubr.msk.f32.mxu0 %vm397_vm0, %v11723_v18 }
  0xe6   : > { %10023 = vmatmul.mubr.msk.f32.gmra.mrb[30].mxu0 %vm397_vm0, %v11730_v7 }
  0xe7   : > { %10027 = vmatprep.mubr.msk.f32.mxu0 %vm397_vm0, %v11070_v12  ;;  %v13116_v12 = vld [vmem:[#allocation11_spill] sm:$0xff] }
  0xea   : > { %10028 = vmatmul.mubr.msk.f32.vlgmr.msra.gmra.mrb[0].mxu0 %vm397_vm0, %v11082_v14  ;;  %v8867_v14 = vld [vmem:[%s11032_s16 + $0x198] sm:$0xff] }
  0xeb   : > { %10076 = vmatpush3.msra.mxu0 %v11530_v13  ;;  %10030 = vmatprep.mubr.msk.f32.mxu0 %vm397_vm0, %v11085_v15  ;;  %v8868_v15 = vld [vmem:[%s11032_s16 + $0x1a0] sm:$0xff] }
  0xec   : > { %10125 = vmatprep.subr.mxu0 %v8999_v21  ;;  %v8998_v13 = vld [vmem:[%s11032_s16 + $0x1a2] sm:$0xff] }
  0xee   : > { %10031 = vmatmul.mubr.msk.f32.gmra.mrb[2].mxu0 %vm397_vm0, %v11100_v19 }
  0xef   : > { %10033 = vmatprep.mubr.msk.f32.mxu0 %vm397_vm0, %v11105_v20 }
  0xf2   : > { %10034 = vmatmul.mubr.msk.f32.gmra.mrb[4].mxu0 %vm397_vm0, %v11120_v23 }
  0xf3   : > { %10036 = vmatprep.mubr.msk.f32.mxu0 %vm397_vm0, %v11125_v24 }
  0xf6   : > { %10037 = vmatmul.mubr.msk.f32.gmra.mrb[6].mxu0 %vm397_vm0, %v11140_v27  ;;  %v13118_v27 = vld [vmem:[#allocation13_spill] sm:$0xff] }
  0xf7   : > { %10039 = vmatprep.mubr.msk.f32.mxu0 %vm397_vm0, %v11145_v28  ;;  %v8933_v28 = vld [vmem:[%s11032_s16 + $0x1a1] sm:$0xff] }
  0xfa   : > { %10040 = vmatmul.mubr.msk.f32.gmra.mrb[8].mxu0 %vm397_vm0, %v11160_v31  ;;  %v13120_v31 = vld [vmem:[#allocation6_spill] sm:$0xff] }
  0xfb   : > { %10042 = vmatprep.mubr.msk.f32.mxu0 %vm397_vm0, %v11165_v32  ;;  %v13121_v32 = vld [vmem:[#allocation10_spill] sm:$0xff] }
  0xfe   : > { %10043 = vmatmul.mubr.msk.f32.gmra.mrb[10].mxu0 %vm397_vm0, %v11183_v36  ;;  %v13124_v36 = vld [vmem:[#allocation14_spill] sm:$0xff] }
  0xff   : > { %10045 = vmatprep.mubr.msk.f32.mxu0 %vm397_vm0, %v11188_v37  ;;  %v13125_v37 = vld [vmem:[#allocation15_spill] sm:$0xff] }
 0x102   : > { %10046 = vmatmul.mubr.msk.f32.gmra.mrb[12].mxu0 %vm397_vm0, %v11203_v40  ;;  %v13128_v40 = vld [vmem:[#allocation18_spill] sm:$0xff] }
 0x103   : > { %10048 = vmatprep.mubr.msk.f32.mxu0 %vm397_vm0, %v11208_v41  ;;  %v13129_v41 = vld [vmem:[#allocation19_spill] sm:$0xff] }
 0x106   : > { %10049 = vmatmul.mubr.msk.f32.gmra.mrb[14].mxu0 %vm397_vm0, %v11224_v44 }
 0x107   : > { %10051 = vmatprep.mubr.msk.f32.mxu0 %vm397_vm0, %v11229_v45  ;;  %v13131_v45 = vld [vmem:[#allocation21_spill] sm:$0xff] }
 0x10a   : > { %10052 = vmatmul.mubr.msk.f32.gmra.mrb[16].mxu0 %vm397_vm0, %v11244_v48 }
 0x10b   : > { %10054 = vmatprep.mubr.msk.f32.mxu0 %vm397_vm0, %v11249_v49  ;;  %v13133_v49 = vld [vmem:[#allocation23_spill] sm:$0xff] }
 0x10e   : > { %10055 = vmatmul.mubr.msk.f32.gmra.mrb[18].mxu0 %vm397_vm0, %v11264_v52 }
 0x10f   : > { %10057 = vmatprep.mubr.msk.f32.mxu0 %vm397_vm0, %v11269_v53  ;;  %v13135_v53 = vld [vmem:[#allocation25_spill] sm:$0xff] }
 0x112   : > { %10058 = vmatmul.mubr.msk.f32.gmra.mrb[20].mxu0 %vm397_vm0, %v11284_v56 }
 0x113   : > { %10060 = vmatprep.mubr.msk.f32.mxu0 %vm397_vm0, %v11289_v57  ;;  %v13137_v57 = vld [vmem:[#allocation27_spill] sm:$0xff] }
 0x116   : > { %10061 = vmatmul.mubr.msk.f32.gmra.mrb[22].mxu0 %vm397_vm0, %v11304_v60  ;;  %v13138_v60 = vld [vmem:[#allocation28_spill] sm:$0xff] }
 0x117   : > { %10063 = vmatprep.mubr.msk.f32.mxu0 %vm397_vm0, %v11309_v61 }
 0x11a   : > { %10064 = vmatmul.mubr.msk.f32.gmra.mrb[24].mxu0 %vm397_vm0, %v11324_v1  ;;  %v13140_v1 = vld [vmem:[#allocation30_spill] sm:$0xff] }
 0x11b   : > { %10066 = vmatprep.mubr.msk.f32.mxu0 %vm397_vm0, %v13088_v11 }
 0x11e   : > { %10067 = vmatmul.mubr.msk.f32.gmra.mrb[26].mxu0 %vm397_vm0, %v13090_v2 }
 0x11f   : > { %10069 = vmatprep.mubr.msk.f32.mxu0 %vm397_vm0, %v13116_v12 }
 0x122   : > { %10070 = vmatmul.mubr.msk.f32.gmra.mrb[28].mxu0 %vm397_vm0, %v11364_v9 }
 0x123   : > { %10072 = vmatprep.mubr.msk.f32.mxu0 %vm397_vm0, %v8867_v14 }
 0x126   : > { %10073 = vmatmul.mubr.msk.f32.gmra.mrb[30].mxu0 %vm397_vm0, %v8868_v15  ;;  %v13076_v15 = vmov 0.0  }
 0x127   : > { %10077 = vmatprep.mubr.msk.f32.mxu0 %vm397_vm0, %v11113_v22  ;;  %5105 = vst.msk [vmem:[#allocation2 + $0x10] sm:$0xff] %vm397_vm0, %v13076_v15  ;;  %5102 = vst.msk [vmem:[#allocation2] sm:$0xff] %vm397_vm0, %v13076_v15 }
 0x128   : > { %5106 = vst.msk [vmem:[#allocation2 + $0x18] sm:$0x3] %vm5103_vm1, %v13076_v15  ;;  %5104 = vst.msk [vmem:[#allocation2 + $0x8] sm:$0x3] %vm5103_vm1, %v13076_v15 }
 0x129   : > { %5107 = vst.msk [vmem:[#allocation2 + $0x20] sm:$0xff] %vm397_vm0, %v13076_v15  ;;  %5109 = vst.msk [vmem:[#allocation2 + $0x30] sm:$0xff] %vm397_vm0, %v13076_v15 }
 0x12a   : > { %10078 = vmatmul.mubr.msk.f32.vlgmr.msra.gmra.mrb[0].mxu0 %vm397_vm0, %v11128_v25  ;;  %v13117_v25 = vld [vmem:[#allocation12_spill] sm:$0xff]  ;;  %5108 = vst.msk [vmem:[#allocation2 + $0x28] sm:$0x3] %vm5103_vm1, %v13076_v15  ;;  %5110 = vst.msk [vmem:[#allocation2 + $0x38] sm:$0x3] %vm5103_vm1, %v13076_v15 }
 0x12b   : > { %10126 = vmatpush3.msra.mxu0 %v8999_v21  ;;  %10080 = vmatprep.mubr.msk.f32.mxu0 %vm397_vm0, %v11133_v26  ;;  %v8932_v26 = vld [vmem:[%s11032_s16 + $0x199] sm:$0xff]  ;;  %5111 = vst.msk [vmem:[#allocation2 + $0x40] sm:$0xff] %vm397_vm0, %v13076_v15  ;;  %5113 = vst.msk [vmem:[#allocation2 + $0x50] sm:$0xff] %vm397_vm0, %v13076_v15 }
 0x12c   : > { %5112 = vst.msk [vmem:[#allocation2 + $0x48] sm:$0x3] %vm5103_vm1, %v13076_v15  ;;  %5114 = vst.msk [vmem:[#allocation2 + $0x58] sm:$0x3] %vm5103_vm1, %v13076_v15 }
 0x12d   : > { %5115 = vst.msk [vmem:[#allocation2 + $0x60] sm:$0xff] %vm397_vm0, %v13076_v15  ;;  %5117 = vst.msk [vmem:[#allocation2 + $0x70] sm:$0xff] %vm397_vm0, %v13076_v15 }
 0x12e   : > { %10081 = vmatmul.mubr.msk.f32.gmra.mrb[2].mxu0 %vm397_vm0, %v11148_v29  ;;  %v8967_v29 = vld [vmem:[%s11032_s16 + $0x32] sm:$0xff]  ;;  %5116 = vst.msk [vmem:[#allocation2 + $0x68] sm:$0x3] %vm5103_vm1, %v13076_v15  ;;  %5118 = vst.msk [vmem:[#allocation2 + $0x78] sm:$0x3] %vm5103_vm1, %v13076_v15 }
 0x12f   : > { %10083 = vmatprep.mubr.msk.f32.mxu0 %vm397_vm0, %v11153_v30  ;;  %v13119_v30 = vld [vmem:[#allocation9_spill] sm:$0xff]  ;;  %5119 = vst.msk [vmem:[#allocation2 + $0x80] sm:$0xff] %vm397_vm0, %v13076_v15  ;;  %5121 = vst.msk [vmem:[#allocation2 + $0x90] sm:$0xff] %vm397_vm0, %v13076_v15 }
 0x130   : > { %5120 = vst.msk [vmem:[#allocation2 + $0x88] sm:$0x3] %vm5103_vm1, %v13076_v15  ;;  %5122 = vst.msk [vmem:[#allocation2 + $0x98] sm:$0x3] %vm5103_vm1, %v13076_v15 }
 0x132   : > { %10084 = vmatmul.mubr.msk.f32.gmra.mrb[4].mxu0 %vm397_vm0, %v11168_v33  ;;  %v13122_v33 = vld [vmem:[#allocation7_spill] sm:$0xff] }
 0x133   : > { %10086 = vmatprep.mubr.msk.f32.mxu0 %vm397_vm0, %v11173_v34  ;;  %v13123_v34 = vld [vmem:[#allocation8_spill] sm:$0xff] }
 0x136   : > { %10087 = vmatmul.mubr.msk.f32.gmra.mrb[6].mxu0 %vm397_vm0, %v11191_v38  ;;  %v13126_v38 = vld [vmem:[#allocation16_spill] sm:$0xff] }
 0x137   : > { %10089 = vmatprep.mubr.msk.f32.mxu0 %vm397_vm0, %v11196_v39  ;;  %v13127_v39 = vld [vmem:[#allocation17_spill] sm:$0xff] }
 0x13a   : > { %10090 = vmatmul.mubr.msk.f32.gmra.mrb[8].mxu0 %vm397_vm0, %v11212_v42 }
 0x13b   : > { %10092 = vmatprep.mubr.msk.f32.mxu0 %vm397_vm0, %v11217_v43  ;;  %v11828_v9 = vpop.f32.mrb[0].mxu1  ;;  %v13130_v43 = vld [vmem:[#allocation20_spill] sm:$0xff] }
 0x13c   : > { %v11832_v19 = vpop.f32.mrb[1].mxu1 }
 0x13e   : > { %10093 = vmatmul.mubr.msk.f32.gmra.mrb[10].mxu0 %vm397_vm0, %v11232_v46 }
 0x13f   : > { %10095 = vmatprep.mubr.msk.f32.mxu0 %vm397_vm0, %v11237_v47  ;;  %v11836_v20 = vpop.f32.mrb[2].mxu1  ;;  %v13132_v47 = vld [vmem:[#allocation22_spill] sm:$0xff] }
 0x140   : > { %v11840_v22 = vpop.f32.mrb[3].mxu1 }
 0x142   : > { %10096 = vmatmul.mubr.msk.f32.gmra.mrb[12].mxu0 %vm397_vm0, %v11252_v50 }
 0x143   : > { %10098 = vmatprep.mubr.msk.f32.mxu0 %vm397_vm0, %v11257_v51  ;;  %v11844_v23 = vpop.f32.mrb[4].mxu1  ;;  %v13134_v51 = vld [vmem:[#allocation24_spill] sm:$0xff] }
 0x144   : > { %v11848_v24 = vpop.f32.mrb[5].mxu1 }
 0x146   : > { %10099 = vmatmul.mubr.msk.f32.gmra.mrb[14].mxu0 %vm397_vm0, %v11272_v54 }
 0x147   : > { %10101 = vmatprep.mubr.msk.f32.mxu0 %vm397_vm0, %v11277_v55  ;;  %v13136_v55 = vld [vmem:[#allocation26_spill] sm:$0xff] }
 0x14a   : > { %10102 = vmatmul.mubr.msk.f32.gmra.mrb[16].mxu0 %vm397_vm0, %v11292_v58 }
 0x14b   : > { %10104 = vmatprep.mubr.msk.f32.mxu0 %vm397_vm0, %v11297_v59 }
 0x14e   : > { %10105 = vmatmul.mubr.msk.f32.gmra.mrb[18].mxu0 %vm397_vm0, %v11312_v62  ;;  %v13139_v62 = vld [vmem:[#allocation29_spill] sm:$0xff] }
 0x14f   : > { %10107 = vmatprep.mubr.msk.f32.mxu0 %vm397_vm0, %v11317_v63 }
 0x152   : > { %10108 = vmatmul.mubr.msk.f32.gmra.mrb[20].mxu0 %vm397_vm0, %v11332_v3 }
 0x153   : > { %10110 = vmatprep.mubr.msk.f32.mxu0 %vm397_vm0, %v11337_v4 }
 0x156   : > { %10111 = vmatmul.mubr.msk.f32.gmra.mrb[22].mxu0 %vm397_vm0, %v11352_v17 }
 0x157   : > { %10113 = vmatprep.mubr.msk.f32.mxu0 %vm397_vm0, %v11357_v35  ;;  %v8997_v35 = vld [vmem:[%s11032_s16 + $0x19a] sm:$0xff] }
 0x15a   : > { %10114 = vmatmul.mubr.msk.f32.gmra.mrb[24].mxu0 %vm397_vm0, %v11369_v8  ;;  %v8968_v8 = vld [vmem:[%s11032_s16 + $0x3a] sm:$0xff]  ;;  %s10847_s16 = scalar_lea.vmem %s12993_s27, 16 }
 0x15b   : > { %10116 = vmatprep.mubr.msk.f32.mxu0 %vm397_vm0, %v11374_v6  ;;  %v13141_v6 = vld [vmem:[#allocation31_spill] sm:$0xff]  ;;  %p10848_p11 = scmp.ne.s32.totalorder %s12993_s27, %s10847_s16  ;;  %p10855_p1 = scmp.lt.s32.totalorder %s10853_s23, %s10847_s16 }
 0x15d   : > { %p10849_p12 = pnand %p10848_p11, %p11004_p5  ;;  %p10856_p2 = por %p10855_p1, %p10854_p0 }
 0x15e   : > { %10117 = vmatmul.mubr.msk.f32.gmra.mrb[26].mxu0 %vm397_vm0, %v11383_v16 }
 0x15f   : > { %10119 = vmatprep.mubr.msk.f32.mxu0 %vm397_vm0, %v13117_v25  ;;  %v9161_v25 = vld [vmem:[%s13036_s3 + $0x8] sm:$0xff]  ;;  %p10850_p13 = pneg %p10849_p12 }
 0x160   : > { %10175 = vmatprep.subr.mxu1 %v9161_v25 }
 0x161   : > { %10176 = vmatpush3.msra.mxu1 %v9161_v25  ;;  %p10857_p3 = pnand %p10856_p2, %p10850_p13 }
 0x162   : > { %10120 = vmatmul.mubr.msk.f32.gmra.mrb[28].mxu0 %vm397_vm0, %v13118_v27  ;;  %v10912_v27 = vmov 1983009808  }
 0x163   : > { %10122 = vmatprep.mubr.msk.f32.mxu0 %vm397_vm0, %v8932_v26  ;;  %v5532_v26 = vld [vmem:[#allocation2 + $0x1] sm:$0xff] }
 0x164   : > { %10177 = vmatprep.mubr.msk.f32.mxu1 %vm397_vm0, %v5532_v26 }
 0x166   : > { %10123 = vmatmul.mubr.msk.f32.gmra.mrb[30].mxu0 %vm397_vm0, %v8933_v28  ;;  %v3856_v28 = vunpack.c.l.s4 %v10912_v27 }
 0x167   : > { %10127 = vmatprep.mubr.msk.f32.mxu0 %vm397_vm0, %v8967_v29  ;;  %v3858_v29 = vlaneseq }
 0x16a   : > { %10128 = vmatmul.mubr.msk.f32.vlgmr.msra.gmra.mrb[0].mxu0 %vm397_vm0, %v8968_v8  ;;  %v3857_v8 = vunpack.c.0.s8 %v3856_v28 }
 0x16b   : > { %10130 = vmatprep.mubr.msk.f32.mxu0 %vm397_vm0, %v13119_v30  ;;  %v3859_v30 = vshrl.u32 %v3858_v29, 7 }
 0x16d   : > { %v12059_v26 = vsub.s32 0, %v3859_v30 }
 0x16e   : > { %10131 = vmatmul.mubr.msk.f32.gmra.mrb[2].mxu0 %vm397_vm0, %v13120_v31 }
 0x16f   : > { %10133 = vmatprep.mubr.msk.f32.mxu0 %vm397_vm0, %v13121_v32  ;;  %v12041_v32 = vld [vmem:[%s13035_s2] ss:$0 sm:$0xff] }
 0x172   : > { %10134 = vmatmul.mubr.msk.f32.gmra.mrb[4].mxu0 %vm397_vm0, %v13122_v33 }
 0x173   : > { %10136 = vmatprep.mubr.msk.f32.mxu0 %vm397_vm0, %v13123_v34 }
 0x176   : > { %10137 = vmatmul.mubr.msk.f32.gmra.mrb[6].mxu0 %vm397_vm0, %v13124_v36 }
 0x177   : > { %10139 = vmatprep.mubr.msk.f32.mxu0 %vm397_vm0, %v13125_v37 }
 0x17a   : > { %10140 = vmatmul.mubr.msk.f32.gmra.mrb[8].mxu0 %vm397_vm0, %v13126_v38  ;;  %v12046_v38 = vsub.s32 %v3857_v8, %v3859_v30 }
 0x17b   : > { %10142 = vmatprep.mubr.msk.f32.mxu0 %vm397_vm0, %v13127_v39 }
 0x17c   : > { %v11904_v42 = vpop.f32.mrb[6].mxu1 }
 0x17d   : > { %v11908_v44 = vpop.f32.mrb[7].mxu1 }
 0x17e   : > { %10143 = vmatmul.mubr.msk.f32.gmra.mrb[10].mxu0 %vm397_vm0, %v13128_v40 }
 0x17f   : > { %10145 = vmatprep.mubr.msk.f32.mxu0 %vm397_vm0, %v13129_v41 }
 0x180   : > { %v11912_v46 = vpop.f32.mrb[8].mxu1 }
 0x181   : > { %v11916_v48 = vpop.f32.mrb[9].mxu1 }
 0x182   : > { %10146 = vmatmul.mubr.msk.f32.gmra.mrb[12].mxu0 %vm397_vm0, %v13130_v43 }
 0x183   : > { %10148 = vmatprep.mubr.msk.f32.mxu0 %vm397_vm0, %v13131_v45 }
 0x184   : > { %v11920_v50 = vpop.f32.mrb[10].mxu1 }
 0x185   : > { %v11924_v52 = vpop.f32.mrb[11].mxu1 }
 0x186   : > { %10149 = vmatmul.mubr.msk.f32.gmra.mrb[14].mxu0 %vm397_vm0, %v13132_v47 }
 0x187   : > { %10151 = vmatprep.mubr.msk.f32.mxu0 %vm397_vm0, %v13133_v49 }
 0x188   : > { %v11928_v54 = vpop.f32.mrb[12].mxu1 }
 0x189   : > { %v11932_v56 = vpop.f32.mrb[13].mxu1 }
 0x18a   : > { %10152 = vmatmul.mubr.msk.f32.gmra.mrb[16].mxu0 %vm397_vm0, %v13134_v51 }
 0x18b   : > { %10154 = vmatprep.mubr.msk.f32.mxu0 %vm397_vm0, %v13135_v53 }
 0x18c   : > { %v11936_v58 = vpop.f32.mrb[14].mxu1 }
 0x18d   : > { %v11940_v59 = vpop.f32.mrb[15].mxu1 }
 0x18e   : > { %10155 = vmatmul.mubr.msk.f32.gmra.mrb[18].mxu0 %vm397_vm0, %v13136_v55 }
 0x18f   : > { %10157 = vmatprep.mubr.msk.f32.mxu0 %vm397_vm0, %v13137_v57 }
 0x190   : > { %v11944_v61 = vpop.f32.mrb[16].mxu1 }
 0x191   : > { %v11948_v63 = vpop.f32.mrb[17].mxu1 }
 0x192   : > { %10158 = vmatmul.mubr.msk.f32.gmra.mrb[20].mxu0 %vm397_vm0, %v11672_v0 }
 0x193   : > { %10160 = vmatprep.mubr.msk.f32.mxu0 %vm397_vm0, %v13138_v60 }
 0x194   : > { %v11952_v3 = vpop.f32.mrb[18].mxu1 }
 0x195   : > { %v11956_v4 = vpop.f32.mrb[19].mxu1 }
 0x196   : > { %10161 = vmatmul.mubr.msk.f32.gmra.mrb[22].mxu0 %vm397_vm0, %v13139_v62 }
 0x197   : > { %10163 = vmatprep.mubr.msk.f32.mxu0 %vm397_vm0, %v13140_v1 }
 0x198   : > { %v11960_v16 = vpop.f32.mrb[20].mxu1 }
 0x199   : > { %v11964_v17 = vpop.f32.mrb[21].mxu1 }
 0x19a   : > { %10164 = vmatmul.mubr.msk.f32.gmra.mrb[24].mxu0 %vm397_vm0, %v11700_v5  ;;  %13142 = vst [vmem:[#allocation11_spill] sm:$0xff] %v11964_v17 }
 0x19b   : > { %10166 = vmatprep.mubr.msk.f32.mxu0 %vm397_vm0, %v13141_v6 }
 0x19c   : > { %v11969_v0 = vpop.f32.mrb[22].mxu1 }
 0x19d   : > { %13143 = vst [vmem:[#allocation12_spill] sm:$0xff] %v11969_v0  ;;  %v11973_v11 = vpop.f32.mrb[23].mxu1 }
 0x19e   : > { %10167 = vmatmul.mubr.msk.f32.gmra.mrb[26].mxu0 %vm397_vm0, %v11714_v10  ;;  %13144 = vst [vmem:[#allocation13_spill] sm:$0xff] %v11973_v11 }
 0x19f   : > { %10169 = vmatprep.mubr.msk.f32.mxu0 %vm397_vm0, %v11723_v18 }
 0x1a0   : > { %v11977_v2 = vpop.f32.mrb[24].mxu1 }
 0x1a1   : > { %13145 = vst [vmem:[#allocation9_spill] sm:$0xff] %v11977_v2  ;;  %v11980_v10 = vpop.f32.mrb[25].mxu1 }
 0x1a2   : > { %10170 = vmatmul.mubr.msk.f32.gmra.mrb[28].mxu0 %vm397_vm0, %v11730_v7  ;;  %13146 = vst [vmem:[#allocation6_spill] sm:$0xff] %v11980_v10 }
 0x1a3   : > { %10172 = vmatprep.mubr.msk.f32.mxu0 %vm397_vm0, %v8997_v35 }
 0x1a4   : > { %v11982_v5 = vpop.f32.mrb[26].mxu1 }
 0x1a5   : > { %13147 = vst [vmem:[#allocation10_spill] sm:$0xff] %v11982_v5  ;;  %v11984_v18 = vpop.f32.mrb[27].mxu1 }
 0x1a6   : > { %10173 = vmatmul.mubr.msk.f32.gmra.mrb[30].mxu0 %vm397_vm0, %v8998_v13  ;;  %13148 = vst [vmem:[#allocation7_spill] sm:$0xff] %v11984_v18 }
 0x1a8   : > { %v11986_v21 = vpop.f32.mrb[28].mxu1 }
 0x1a9   : > { %13149 = vst [vmem:[#allocation8_spill] sm:$0xff] %v11986_v21  ;;  %v11988_v12 = vpop.f32.mrb[29].mxu1 }
 0x1aa   : > { %13150 = vst [vmem:[#allocation14_spill] sm:$0xff] %v11988_v12 }
 0x1ac   : > { %v11990_v7 = vpop.f32.mrb[30].mxu1 }
 0x1ad   : > { %13151 = vst [vmem:[#allocation15_spill] sm:$0xff] %v11990_v7  ;;  %v11992_v14 = vpop.f32.mrb[31].mxu1 }
 0x1ae   : > { %13152 = vst [vmem:[#allocation16_spill] sm:$0xff] %v11992_v14 }
 0x23d   : > { %v10129_v31 = vpop.f32.mrb[0].mxu0 }
 0x23e   : > { %v10480_v33 = vadd.f32 %v10129_v31, %v11828_v9  ;;  %v3560_v34 = vpop.f32.mrb[1].mxu0 }
 0x23f   : > { %v10481_v36 = vadd.f32 %v3560_v34, %v11832_v19 }
 0x240   : > { %v3759_v37 = vadd.f32 %v10480_v33, %v12041_v32 }
 0x241   : > { %v3758_v39 = vadd.f32 %v10481_v36, %v12041_v32  ;;  %v10132_v40 = vpop.f32.mrb[2].mxu0 }
 0x242   : > { %v3791_v41 = vmax.f32 %v3759_v37, 0.0  ;;  %v10482_v43 = vadd.f32 %v10132_v40, %v11836_v20  ;;  %v3570_v45 = vpop.f32.mrb[3].mxu0 }
 0x243   : > { %v3790_v47 = vmax.f32 %v3758_v39, 0.0  ;;  %v10483_v49 = vadd.f32 %v3570_v45, %v11840_v22 }
 0x244   : > { %v3871_v51 = vcombine.high %v3791_v41, %v3791_v41  ;;  %v3878_v9 = vrot.slane %v3791_v41, %v12046_v38  ;;  %v3761_v53 = vadd.f32 %v10482_v43, %v12041_v32 }
 0x245   : > { %v3854_v19 = vcombine.high %v3790_v47, %v3790_v47  ;;  %v3861_v55 = vrot.slane %v3790_v47, %v12046_v38  ;;  %v3760_v57 = vadd.f32 %v10483_v49, %v12041_v32  ;;  %v10135_v60 = vpop.f32.mrb[4].mxu0 }
 0x246   : > { %v3885_v62 = vrot.slane %v3871_v51, %v12046_v38  ;;  %v3886_v1 = vcombine.high %v3878_v9, %v3878_v9  ;;  %v9037_v6 = vrot.slane %v3878_v9, 9  ;;  %v3793_v20 = vmax.f32 %v3761_v53, 0.0  ;;  %v12056_v35 = vpop.f32.mrb[5].mxu0 }
 0x247   : > { %v3868_v22 = vrot.slane %v3854_v19, %v12046_v38  ;;  %v3869_v13 = vcombine.high %v3861_v55, %v3861_v55  ;;  %v9033_v25 = vrot.slane %v3861_v55, 9  ;;  %v3792_v8 = vmax.f32 %v3760_v57, 0.0 }
 0x248   : > { %v3887_v27 = vcombine.high %v3885_v62, %v3885_v62  ;;  %v9038_v28 = vrot.slane %v3886_v1, 9  ;;  %v9039_v29 = vrot.slane %v3885_v62, 9  ;;  %v4914_v31 = vmax.f32 %v3878_v9, %v9037_v6 }
 0x249   : > { %v3870_v33 = vcombine.high %v3868_v22, %v3868_v22  ;;  %v9034_v34 = vrot.slane %v3869_v13, 9  ;;  %v9035_v36 = vrot.slane %v3868_v22, 9  ;;  %v12061_v37 = vpop.f32.mrb[6].mxu0  ;;  %v4910_v41 = vmax.f32 %v3861_v55, %v9033_v25 }
 0x24a   : > { %v9040_v39 = vrot.slane %v3887_v27, 9  ;;  %v4915_v40 = vmax.f32 %v3886_v1, %v9038_v28  ;;  %v3905_v43 = vcombine.high %v3793_v20, %v3793_v20  ;;  %v12063_v45 = vpop.f32.mrb[7].mxu0  ;;  %v4916_v47 = vmax.f32 %v3885_v62, %v9039_v29 }
 0x24b   : > { %v9036_v49 = vrot.slane %v3870_v33, 9  ;;  %v4911_v30 = vmax.f32 %v3869_v13, %v9034_v34  ;;  %v3912_v51 = vrot.slane %v3793_v20, %v12046_v38  ;;  %v4912_v53 = vmax.f32 %v3868_v22, %v9035_v36 }
 0x24c   : > { %v3919_v19 = vrot.slane %v3905_v43, %v12046_v38  ;;  %v3888_v9 = vcombine.high %v3792_v8, %v3792_v8  ;;  %v3895_v57 = vrot.slane %v3792_v8, %v12046_v38  ;;  %v12068_v6 = vmax.f32 %v3887_v27, %v9040_v39 }
 0x24d   : > { %v3920_v15 = vcombine.high %v3912_v51, %v3912_v51  ;;  %v9045_v14 = vrot.slane %v3912_v51, 9  ;;  %v10484_v55 = vadd.f32 %v10135_v60, %v11844_v23  ;;  %v12071_v1 = vpop.f32.mrb[8].mxu0 }
 0x24e   : > { %v3921_v62 = vcombine.high %v3919_v19, %v3919_v19  ;;  %v9047_v25 = vrot.slane %v3919_v19, 9  ;;  %v3902_v13 = vrot.slane %v3888_v9, %v12046_v38  ;;  %v3903_v20 = vcombine.high %v3895_v57, %v3895_v57  ;;  %v12074_v22 = vpop.f32.mrb[9].mxu0 }
 0x24f   : > { %v9046_v28 = vrot.slane %v3920_v15, 9  ;;  %v4922_v29 = vmax.f32 %v3912_v51, %v9045_v14  ;;  %v9041_v8 = vrot.slane %v3895_v57, 9  ;;  %v3763_v27 = vadd.f32 %v10484_v55, %v12041_v32 }
 0x250   : > { %v9048_v34 = vrot.slane %v3921_v62, 9  ;;  %v4924_v36 = vmax.f32 %v3919_v19, %v9047_v25  ;;  %v3904_v39 = vcombine.high %v3902_v13, %v3902_v13  ;;  %v9042_v23 = vrot.slane %v3903_v20, 9 }
 0x251   : > { %v4923_v60 = vmax.f32 %v3920_v15, %v9046_v28  ;;  %v5042_v43 = vmax.f32 %v4914_v31, %v4922_v29  ;;  %v9043_v7 = vrot.slane %v3902_v13, 9  ;;  %v4918_v12 = vmax.f32 %v3895_v57, %v9041_v8  ;;  %v12077_v9 = vpop.f32.mrb[10].mxu0 }
 0x252   : > { %v4925_v21 = vmax.f32 %v3921_v62, %v9048_v34  ;;  %v5044_v18 = vmax.f32 %v4916_v47, %v4924_v36  ;;  %v9044_v5 = vrot.slane %v3904_v39, 9  ;;  %v4919_v14 = vmax.f32 %v3903_v20, %v9042_v23  ;;  %v12079_v51 = vpop.f32.mrb[11].mxu0 }
 0x253   : > { %v4913_v55 = vmax.f32 %v3870_v33, %v9036_v49  ;;  %v5043_v10 = vmax.f32 %v4915_v40, %v4923_v60  ;;  %v4920_v19 = vmax.f32 %v3902_v13, %v9043_v7  ;;  %v5038_v25 = vmax.f32 %v4910_v41, %v4918_v12 }
 0x254   : > { %v5045_v15 = vmax.f32 %v12068_v6, %v4925_v21  ;;  %v5206_v31 = vrot.slane %v5042_v43, %v12059_v26  ;;  %v4921_v57 = vmax.f32 %v3904_v39, %v9044_v5  ;;  %v5039_v28 = vmax.f32 %v4911_v30, %v4919_v14 }
 0x255   : > { %v5210_v29 = vrot.slane %v5043_v10, %v12059_v26  ;;  %v5214_v47 = vrot.slane %v5044_v18, %v12059_v26  ;;  %v5040_v62 = vmax.f32 %v4912_v53, %v4920_v19  ;;  %v3795_v20 = vmax.f32 %v3763_v27, 0.0  ;;  %v12085_v8 = vpop.f32.mrb[12].mxu0 }
 0x256   : > { %v5041_v34 = vmax.f32 %v4913_v55, %v4921_v57  ;;  %v5190_v33 = vrot.slane %v5038_v25, %v12059_v26  ;;  %v5194_v12 = vrot.slane %v5039_v28, %v12059_v26  ;;  %v10485_v21 = vadd.f32 %v12056_v35, %v11848_v24  ;;  %v12091_v7 = vpop.f32.mrb[13].mxu0 }
 0x257   : > { %v5198_v5 = vrot.slane %v5040_v62, %v12059_v26  ;;  %v3939_v40 = vcombine.high %v3795_v20, %v3795_v20  ;;  %v3946_v10 = vrot.slane %v3795_v20, %v12046_v38  ;;  %v10486_v18 = vadd.f32 %v12061_v37, %v11904_v42 }
 0x258   : > { %v5202_v41 = vrot.slane %v5041_v34, %v12059_v26  ;;  %v5444_v49 = vsel %vm5443_vm2, %v5194_v12, %v5190_v33  ;;  %v3762_v30 = vadd.f32 %v10485_v21, %v12041_v32  ;;  %v10487_v53 = vadd.f32 %v12063_v45, %v11908_v44 }
 0x259   : > { %v5446_v24 = vsel %vm5445_vm3, %v5198_v5, %v5444_v49  ;;  %v3953_v35 = vrot.slane %v3939_v40, %v12046_v38  ;;  %v3954_v6 = vcombine.high %v3946_v10, %v3946_v10  ;;  %v9053_v13 = vrot.slane %v3946_v10, 9  ;;  %v12104_v27 = vpop.f32.mrb[14].mxu0 }
 0x25a   : > { %v5218_v36 = vrot.slane %v5045_v15, %v12059_v26  ;;  %v5448_v42 = vsel %vm5447_vm4, %v5202_v41, %v5446_v24  ;;  %v3794_v37 = vmax.f32 %v3762_v30, 0.0  ;;  %v3765_v39 = vadd.f32 %v10486_v18, %v12041_v32  ;;  %v12109_v23 = vpop.f32.mrb[15].mxu0 }
 0x25b   : > { %v5450_v60 = vsel %vm5449_vm5, %v5206_v31, %v5448_v42  ;;  %v12112_v44 = vcombine.high %v3953_v35, %v3953_v35  ;;  %v9054_v45 = vrot.slane %v3954_v6, 9  ;;  %v3764_v43 = vadd.f32 %v10487_v53, %v12041_v32 }
 0x25c   : > { %v5452_v14 = vsel %vm5451_vm6, %v5210_v29, %v5450_v60  ;;  %v9055_v55 = vrot.slane %v3953_v35, 9  ;;  %v3922_v19 = vcombine.high %v3794_v37, %v3794_v37  ;;  %v3929_v25 = vrot.slane %v3794_v37, %v12046_v38 }
 0x25d   : > { %v5454_v15 = vsel %vm5453_vm7, %v5214_v47, %v5452_v14  ;;  %v9056_v57 = vrot.slane %v12112_v44, 9  ;;  %v12119_v28 = vmax.f32 %v3946_v10, %v9053_v13  ;;  %v12121_v62 = vpop.f32.mrb[16].mxu0  ;;  %v12128_v29 = vmax.f32 %v3954_v6, %v9054_v45 }
 0x25e   : > { %v5456_v31 = vsel %vm5455_vm8, %v5218_v36, %v5454_v15  ;;  %v3936_v20 = vrot.slane %v3922_v19, %v12046_v38  ;;  %v3937_v34 = vcombine.high %v3929_v25, %v3929_v25  ;;  %v9049_v33 = vrot.slane %v3929_v25, 9  ;;  %v12125_v12 = vpop.f32.mrb[17].mxu0 }
 0x25f   : > { %5515 = vst.msk [vmem:[#allocation2 + $0x11] sm:$0xff] %vm397_vm0, %v5456_v31  ;;  %v3797_v21 = vmax.f32 %v3765_v39, 0.0  ;;  %v3796_v47 = vmax.f32 %v3764_v43, 0.0  ;;  %v10488_v5 = vadd.f32 %v12071_v1, %v11912_v46  ;;  %v12132_v40 = vmax.f32 %v3953_v35, %v9055_v55 }
 0x260   : > { %v3938_v10 = vcombine.high %v3936_v20, %v3936_v20  ;;  %v9050_v18 = vrot.slane %v3937_v34, 9  ;;  %v9051_v41 = vrot.slane %v3936_v20, 9  ;;  %v4926_v36 = vmax.f32 %v3929_v25, %v9049_v33 }
 0x261   : > { %v3973_v49 = vcombine.high %v3797_v21, %v3797_v21  ;;  %v3980_v30 = vrot.slane %v3797_v21, %v12046_v38  ;;  %v3956_v53 = vcombine.high %v3796_v47, %v3796_v47  ;;  %v3963_v24 = vrot.slane %v3796_v47, %v12046_v38  ;;  %v12136_v13 = vpop.f32.mrb[18].mxu0 }
 0x262   : > { %v9052_v6 = vrot.slane %v3938_v10, 9  ;;  %v4927_v42 = vmax.f32 %v3937_v34, %v9050_v18  ;;  %v3767_v37 = vadd.f32 %v10488_v5, %v12041_v32  ;;  %v12139_v39 = vpop.f32.mrb[19].mxu0  ;;  %v4928_v45 = vmax.f32 %v3936_v20, %v9051_v41 }
 0x263   : > { %v3987_v46 = vrot.slane %v3973_v49, %v12046_v38  ;;  %v3988_v1 = vcombine.high %v3980_v30, %v3980_v30  ;;  %v9061_v35 = vrot.slane %v3980_v30, 9  ;;  %v3970_v60 = vrot.slane %v3956_v53, %v12046_v38 }
 0x264   : > { %v3971_v43 = vcombine.high %v3963_v24, %v3963_v24  ;;  %v9057_v14 = vrot.slane %v3963_v24, 9  ;;  %v3799_v55 = vmax.f32 %v3767_v37, 0.0 }
 0x265   : > { %v3989_v19 = vcombine.high %v3987_v46, %v3987_v46  ;;  %v9062_v15 = vrot.slane %v3988_v1, 9  ;;  %v9063_v31 = vrot.slane %v3987_v46, 9  ;;  %v4938_v21 = vmax.f32 %v3980_v30, %v9061_v35  ;;  %v12143_v25 = vpop.f32.mrb[20].mxu0 }
 0x266   : > { %13153 = vst [vmem:[#allocation17_spill] sm:$0xff] %v12143_v25  ;;  %v3972_v34 = vcombine.high %v3970_v60, %v3970_v60  ;;  %v9058_v33 = vrot.slane %v3971_v43, 9  ;;  %v9059_v47 = vrot.slane %v3970_v60, 9  ;;  %v4934_v5 = vmax.f32 %v3963_v24, %v9057_v14  ;;  %v5533_v18 = vld [vmem:[#allocation2 + $0x11] sm:$0xff]  ;;  %v12145_v49 = vpop.f32.mrb[21].mxu0 }
 0x267   : > { %13154 = vst [vmem:[#allocation18_spill] sm:$0xff] %v12145_v49  ;;  %v9064_v2 = vrot.slane %v3989_v19, 9  ;;  %v4939_v11 = vmax.f32 %v3988_v1, %v9062_v15  ;;  %v4940_v53 = vmax.f32 %v3987_v46, %v9063_v31  ;;  %v5050_v20 = vmax.f32 %v12119_v28, %v4938_v21  ;;  %10178 = vmatmul.mubr.msk.f32.vlgmr.msra.gmra.mrb[32].mxu1 %vm397_vm0, %v5533_v18 }
 0x268   : > { %v9060_v41 = vrot.slane %v3972_v34, 9  ;;  %v4935_v37 = vmax.f32 %v3971_v43, %v9058_v33  ;;  %v4936_v0 = vmax.f32 %v3970_v60, %v9059_v47  ;;  %v5046_v30 = vmax.f32 %v4926_v36, %v4934_v5 }
 0x269   : > { %v4933_v35 = vmax.f32 %v12112_v44, %v9056_v57  ;;  %v4941_v17 = vmax.f32 %v3989_v19, %v9064_v2  ;;  %v5051_v25 = vmax.f32 %v12128_v29, %v4939_v11  ;;  %v5052_v24 = vmax.f32 %v12132_v40, %v4940_v53  ;;  %v12152_v14 = vpop.f32.mrb[22].mxu0 }
 0x26a   : > { %v4929_v49 = vmax.f32 %v3938_v10, %v9052_v6  ;;  %v4937_v1 = vmax.f32 %v3972_v34, %v9060_v41  ;;  %v5047_v46 = vmax.f32 %v4927_v42, %v4935_v37  ;;  %v5048_v15 = vmax.f32 %v4928_v45, %v4936_v0  ;;  %v12154_v28 = vpop.f32.mrb[23].mxu0 }
 0x26b   : > { %v5053_v31 = vmax.f32 %v4933_v35, %v4941_v17  ;;  %v5238_v43 = vrot.slane %v5050_v20, %v12059_v26  ;;  %v5222_v36 = vrot.slane %v5046_v30, %v12059_v26  ;;  %v4007_v60 = vcombine.high %v3799_v55, %v3799_v55 }
 0x26c   : > { %v5049_v44 = vmax.f32 %v4929_v49, %v4937_v1  ;;  %v5226_v2 = vrot.slane %v5047_v46, %v12059_v26  ;;  %v5230_v11 = vrot.slane %v5048_v15, %v12059_v26  ;;  %v4014_v57 = vrot.slane %v3799_v55, %v12046_v38 }
 0x26d   : > { %v5242_v29 = vrot.slane %v5051_v25, %v12059_v26  ;;  %v4021_v40 = vrot.slane %v4007_v60, %v12046_v38  ;;  %v10489_v0 = vadd.f32 %v12074_v22, %v11916_v48  ;;  %v10490_v17 = vadd.f32 %v12077_v9, %v11920_v50  ;;  %v12167_v10 = vpop.f32.mrb[24].mxu0 }
 0x26e   : > { %v5234_v6 = vrot.slane %v5049_v44, %v12059_v26  ;;  %v5457_v42 = vsel %vm5443_vm2, %v5226_v2, %v5222_v36  ;;  %v4022_v45 = vcombine.high %v4014_v57, %v4014_v57  ;;  %v9069_v19 = vrot.slane %v4014_v57, 9  ;;  %v12171_v21 = vpop.f32.mrb[25].mxu0 }
 0x26f   : > { %v5458_v55 = vsel %vm5445_vm3, %v5230_v11, %v5457_v42  ;;  %v4023_v25 = vcombine.high %v4021_v40, %v4021_v40  ;;  %v9071_v34 = vrot.slane %v4021_v40, 9  ;;  %v3766_v33 = vadd.f32 %v10489_v0, %v12041_v32 }
 0x270   : > { %v5246_v48 = vrot.slane %v5052_v24, %v12059_v26  ;;  %v5250_v50 = vrot.slane %v5053_v31, %v12059_v26  ;;  %v5459_v22 = vsel %vm5447_vm4, %v5234_v6, %v5458_v55  ;;  %v3769_v9 = vadd.f32 %v10490_v17, %v12041_v32 }
 0x271   : > { %v5460_v47 = vsel %vm5449_vm5, %v5238_v43, %v5459_v22  ;;  %v9070_v5 = vrot.slane %v4022_v45, 9  ;;  %v12180_v18 = vmax.f32 %v4014_v57, %v9069_v19  ;;  %v3798_v49 = vmax.f32 %v3766_v33, 0.0  ;;  %v12182_v53 = vpop.f32.mrb[26].mxu0 }
 0x272   : > { %v5461_v20 = vsel %vm5451_vm6, %v5242_v29, %v5460_v47  ;;  %v9072_v41 = vrot.slane %v4023_v25, 9  ;;  %v3801_v37 = vmax.f32 %v3769_v9, 0.0  ;;  %v10491_v30 = vadd.f32 %v12079_v51, %v11924_v52  ;;  %v12187_v35 = vpop.f32.mrb[27].mxu0 }
 0x273   : > { %v5462_v24 = vsel %vm5453_vm7, %v5246_v48, %v5461_v20  ;;  %v12190_v1 = vmax.f32 %v4021_v40, %v9071_v34  ;;  %v3990_v46 = vcombine.high %v3798_v49, %v3798_v49  ;;  %v3997_v15 = vrot.slane %v3798_v49, %v12046_v38 }
 0x274   : > { %v5463_v31 = vsel %vm5455_vm8, %v5250_v50, %v5462_v24  ;;  %v4041_v43 = vcombine.high %v3801_v37, %v3801_v37  ;;  %v4048_v36 = vrot.slane %v3801_v37, %v12046_v38  ;;  %v3768_v60 = vadd.f32 %v10491_v30, %v12041_v32 }
 0x275   : > { %5516 = vst.msk [vmem:[#allocation2 + $0x21] sm:$0xff] %vm397_vm0, %v5463_v31  ;;  %v4004_v52 = vrot.slane %v3990_v46, %v12046_v38  ;;  %v4005_v51 = vcombine.high %v3997_v15, %v3997_v15  ;;  %v9065_v44 = vrot.slane %v3997_v15, 9  ;;  %v10492_v2 = vadd.f32 %v12085_v8, %v11928_v54  ;;  %v12200_v11 = vpop.f32.mrb[28].mxu0 }
 0x276   : > { %v4055_v57 = vrot.slane %v4041_v43, %v12046_v38  ;;  %v4056_v29 = vcombine.high %v4048_v36, %v4048_v36  ;;  %v9077_v40 = vrot.slane %v4048_v36, 9  ;;  %v3800_v0 = vmax.f32 %v3768_v60, 0.0  ;;  %v12203_v17 = vpop.f32.mrb[29].mxu0 }
 0x277   : > { %v4947_v6 = vmax.f32 %v4022_v45, %v9070_v5  ;;  %v4006_v42 = vcombine.high %v4004_v52, %v4004_v52  ;;  %v9066_v19 = vrot.slane %v4005_v51, 9  ;;  %v9067_v55 = vrot.slane %v4004_v52, 9 }
 0x278   : > { %v4057_v34 = vcombine.high %v4055_v57, %v4055_v57  ;;  %v9078_v33 = vrot.slane %v4056_v29, 9  ;;  %v9079_v48 = vrot.slane %v4055_v57, 9  ;;  %v4954_v50 = vmax.f32 %v4048_v36, %v9077_v40 }
 0x279   : > { %v4949_v22 = vmax.f32 %v4023_v25, %v9072_v41  ;;  %v9068_v9 = vrot.slane %v4006_v42, 9  ;;  %v4942_v54 = vmax.f32 %v3997_v15, %v9065_v44  ;;  %v4024_v8 = vcombine.high %v3800_v0, %v3800_v0  ;;  %v12205_v47 = vpop.f32.mrb[30].mxu0  ;;  %v5531_v25 = vld [vmem:[%s13036_s3] sm:$0xff]  ;;  %v12219_v41 = vld [vmem:[%s13036_s3 + $0x10] sm:$0xff] }
 0x27a   : > { %v9080_v49 = vrot.slane %v4057_v34, 9  ;;  %v4955_v20 = vmax.f32 %v4056_v29, %v9078_v33  ;;  %v4956_v37 = vmax.f32 %v4055_v57, %v9079_v48  ;;  %v5058_v30 = vmax.f32 %v12180_v18, %v4954_v50  ;;  %v12208_v24 = vpop.f32.mrb[31].mxu0  ;;  %10189 = vmatprep.subr.mxu1 %v5531_v25 }
 0x27b   : > { %v4943_v45 = vmax.f32 %v4005_v51, %v9066_v19  ;;  %v4031_v5 = vrot.slane %v3800_v0, %v12046_v38  ;;  %v4038_v46 = vrot.slane %v4024_v8, %v12046_v38  ;;  %v3771_v31 = vadd.f32 %v10492_v2, %v12041_v32  ;;  %10190 = vmatpush3.msra.mxu1 %v5531_v25 }
 0x27c   : > { %v4944_v15 = vmax.f32 %v4004_v52, %v9067_v55  ;;  %v4957_v18 = vmax.f32 %v4057_v34, %v9080_v49  ;;  %v5059_v43 = vmax.f32 %v4947_v6, %v4955_v20  ;;  %v5060_v36 = vmax.f32 %v12190_v1, %v4956_v37  ;;  %v5534_v60 = vld [vmem:[#allocation2 + $0x21] sm:$0xff]  ;;  %10203 = vmatprep.subr.mxu1 %v12219_v41 }
 0x27d   : > { %v4039_v51 = vcombine.high %v4031_v5, %v4031_v5  ;;  %v4040_v44 = vcombine.high %v4038_v46, %v4038_v46  ;;  %v9073_v57 = vrot.slane %v4031_v5, 9  ;;  %v9075_v2 = vrot.slane %v4038_v46, 9  ;;  %10180 = vmatprep.mubr.msk.f32.mxu1 %vm397_vm0, %v5534_v60 }
 0x27e   : > { %v4945_v29 = vmax.f32 %v4006_v42, %v9068_v9  ;;  %v5061_v40 = vmax.f32 %v4949_v22, %v4957_v18  ;;  %v5270_v0 = vrot.slane %v5058_v30, %v12059_v26  ;;  %v3803_v19 = vmax.f32 %v3771_v31, 0.0 }
 0x27f   : > { %v9074_v52 = vrot.slane %v4039_v51, 9  ;;  %v9076_v6 = vrot.slane %v4040_v44, 9  ;;  %v4950_v55 = vmax.f32 %v4031_v5, %v9073_v57  ;;  %v4952_v1 = vmax.f32 %v4038_v46, %v9075_v2 }
 0x280   : > { %v5274_v34 = vrot.slane %v5059_v43, %v12059_v26  ;;  %v4075_v33 = vcombine.high %v3803_v19, %v3803_v19  ;;  %v4082_v48 = vrot.slane %v3803_v19, %v12046_v38  ;;  %v10493_v50 = vadd.f32 %v12091_v7, %v11932_v56 }
 0x281   : > { %v4951_v8 = vmax.f32 %v4039_v51, %v9074_v52  ;;  %v4953_v42 = vmax.f32 %v4040_v44, %v9076_v6  ;;  %v5054_v22 = vmax.f32 %v4942_v54, %v4950_v55  ;;  %v5056_v9 = vmax.f32 %v4944_v15, %v4952_v1 }
 0x282   : > { %v4089_v49 = vrot.slane %v4075_v33, %v12046_v38  ;;  %v4090_v20 = vcombine.high %v4082_v48, %v4082_v48  ;;  %v9085_v37 = vrot.slane %v4082_v48, 9  ;;  %v3770_v30 = vadd.f32 %v10493_v50, %v12041_v32 }
 0x283   : > { %v5278_v5 = vrot.slane %v5060_v36, %v12059_v26  ;;  %v5282_v46 = vrot.slane %v5061_v40, %v12059_v26  ;;  %v5055_v31 = vmax.f32 %v4943_v45, %v4951_v8  ;;  %v5057_v25 = vmax.f32 %v4945_v29, %v4953_v42 }
 0x284   : > { %v5254_v18 = vrot.slane %v5054_v22, %v12059_v26  ;;  %v5262_v56 = vrot.slane %v5056_v9, %v12059_v26  ;;  %v4091_v7 = vcombine.high %v4089_v49, %v4089_v49  ;;  %v9086_v43 = vrot.slane %v4090_v20, 9 }
 0x285   : > { %v5258_v54 = vrot.slane %v5055_v31, %v12059_v26  ;;  %v5266_v15 = vrot.slane %v5057_v25, %v12059_v26  ;;  %v3802_v60 = vmax.f32 %v3770_v30, 0.0  ;;  %v10494_v51 = vadd.f32 %v12104_v27, %v11936_v58 }
 0x286   : > { %v9087_v44 = vrot.slane %v4089_v49, 9  ;;  %v9088_v36 = vrot.slane %v4091_v7, 9  ;;  %v12239_v57 = vmax.f32 %v4082_v48, %v9085_v37  ;;  %v10495_v45 = vadd.f32 %v12109_v23, %v11940_v59 }
 0x287   : > { %v5464_v2 = vsel %vm5443_vm2, %v5258_v54, %v5254_v18  ;;  %v4058_v29 = vcombine.high %v3802_v60, %v3802_v60  ;;  %v4065_v40 = vrot.slane %v3802_v60, %v12046_v38  ;;  %v3773_v19 = vadd.f32 %v10494_v51, %v12041_v32 }
 0x288   : > { %v5465_v52 = vsel %vm5445_vm3, %v5262_v56, %v5464_v2  ;;  %v12247_v6 = vmax.f32 %v4090_v20, %v9086_v43  ;;  %v3772_v58 = vadd.f32 %v10495_v45, %v12041_v32  ;;  %v10496_v27 = vadd.f32 %v12121_v62, %v11944_v61 }
 0x289   : > { %v5466_v55 = vsel %vm5447_vm4, %v5266_v15, %v5465_v52  ;;  %v4072_v59 = vrot.slane %v4058_v29, %v12046_v38  ;;  %v4073_v23 = vcombine.high %v4065_v40, %v4065_v40  ;;  %v9081_v1 = vrot.slane %v4065_v40, 9 }
 0x28a   : > { %v5467_v33 = vsel %vm5449_vm5, %v5270_v0, %v5466_v55  ;;  %v12255_v48 = vmax.f32 %v4089_v49, %v9087_v44  ;;  %v3805_v50 = vmax.f32 %v3773_v19, 0.0  ;;  %v3804_v8 = vmax.f32 %v3772_v58, 0.0 }
 0x28b   : > { %v5468_v42 = vsel %vm5451_vm6, %v5274_v34, %v5467_v33  ;;  %v4074_v22 = vcombine.high %v4072_v59, %v4072_v59  ;;  %v9082_v9 = vrot.slane %v4073_v23, 9  ;;  %v3775_v20 = vadd.f32 %v10496_v27, %v12041_v32 }
 0x28c   : > { %v5469_v61 = vsel %vm5453_vm7, %v5278_v5, %v5468_v42  ;;  %v4965_v62 = vmax.f32 %v4091_v7, %v9088_v36  ;;  %v4109_v37 = vcombine.high %v3805_v50, %v3805_v50  ;;  %v4116_v30 = vrot.slane %v3805_v50, %v12046_v38 }
 0x28d   : > { %v5470_v31 = vsel %vm5455_vm8, %v5282_v46, %v5469_v61  ;;  %v9083_v25 = vrot.slane %v4072_v59, 9  ;;  %v9084_v0 = vrot.slane %v4074_v22, 9  ;;  %v4958_v49 = vmax.f32 %v4065_v40, %v9081_v1 }
 0x28e   : > { %5517 = vst.msk [vmem:[#allocation2 + $0x31] sm:$0xff] %vm397_vm0, %v5470_v31  ;;  %v4123_v18 = vrot.slane %v4109_v37, %v12046_v38  ;;  %v4124_v34 = vcombine.high %v4116_v30, %v4116_v30  ;;  %v9093_v56 = vrot.slane %v4116_v30, 9  ;;  %v4092_v43 = vcombine.high %v3804_v8, %v3804_v8 }
 0x28f   : > { %v4959_v54 = vmax.f32 %v4073_v23, %v9082_v9  ;;  %v4099_v15 = vrot.slane %v3804_v8, %v12046_v38  ;;  %v3807_v5 = vmax.f32 %v3775_v20, 0.0  ;;  %v10497_v7 = vadd.f32 %v12125_v12, %v11948_v63 }
 0x290   : > { %v4125_v60 = vcombine.high %v4123_v18, %v4123_v18  ;;  %v9094_v51 = vrot.slane %v4124_v34, 9  ;;  %v9095_v46 = vrot.slane %v4123_v18, 9  ;;  %v4970_v44 = vmax.f32 %v4116_v30, %v9093_v56 }
 0x291   : > { %v4960_v36 = vmax.f32 %v4072_v59, %v9083_v25  ;;  %v4106_v45 = vrot.slane %v4092_v43, %v12046_v38  ;;  %v4107_v2 = vcombine.high %v4099_v15, %v4099_v15  ;;  %v9089_v29 = vrot.slane %v4099_v15, 9 }
 0x292   : > { %v9096_v40 = vrot.slane %v4125_v60, 9  ;;  %v4971_v19 = vmax.f32 %v4124_v34, %v9094_v51  ;;  %v4972_v52 = vmax.f32 %v4123_v18, %v9095_v46  ;;  %v5066_v58 = vmax.f32 %v12239_v57, %v4970_v44 }
 0x293   : > { %v4108_v27 = vcombine.high %v4106_v45, %v4106_v45  ;;  %v9090_v55 = vrot.slane %v4107_v2, 9  ;;  %v9091_v23 = vrot.slane %v4106_v45, 9  ;;  %v4966_v1 = vmax.f32 %v4099_v15, %v9089_v29 }
 0x294   : > { %v4973_v33 = vmax.f32 %v4125_v60, %v9096_v40  ;;  %v5067_v63 = vmax.f32 %v12247_v6, %v4971_v19  ;;  %v5068_v12 = vmax.f32 %v12255_v48, %v4972_v52  ;;  %v4143_v50 = vcombine.high %v3807_v5, %v3807_v5 }
 0x295   : > { %v9092_v59 = vrot.slane %v4108_v27, 9  ;;  %v4967_v8 = vmax.f32 %v4107_v2, %v9090_v55  ;;  %v4968_v42 = vmax.f32 %v4106_v45, %v9091_v23  ;;  %v5062_v9 = vmax.f32 %v4958_v49, %v4966_v1  ;;  %v12271_v20 = vld [vmem:[#allocation2 + $0x31] sm:$0xff] }
 0x296   : > { %v4961_v61 = vmax.f32 %v4074_v22, %v9084_v0  ;;  %v5069_v37 = vmax.f32 %v4965_v62, %v4973_v33  ;;  %v5302_v57 = vrot.slane %v5066_v58, %v12059_v26  ;;  %v4150_v30 = vrot.slane %v3807_v5, %v12046_v38  ;;  %10181 = vmatmul.mubr.msk.f32.gmra.mrb[34].mxu1 %vm397_vm0, %v12271_v20 }
 0x297   : > { %v5306_v6 = vrot.slane %v5067_v63, %v12059_v26  ;;  %v4969_v31 = vmax.f32 %v4108_v27, %v9092_v59  ;;  %v5063_v48 = vmax.f32 %v4959_v54, %v4967_v8  ;;  %v5064_v25 = vmax.f32 %v4960_v36, %v4968_v42 }
 0x298   : > { %v5286_v18 = vrot.slane %v5062_v9, %v12059_v26  ;;  %v4157_v49 = vrot.slane %v4143_v50, %v12046_v38  ;;  %v4158_v34 = vcombine.high %v4150_v30, %v4150_v30  ;;  %v9101_v56 = vrot.slane %v4150_v30, 9 }
 0x299   : > { %v5065_v22 = vmax.f32 %v4961_v61, %v4969_v31  ;;  %v5290_v62 = vrot.slane %v5063_v48, %v12059_v26  ;;  %v5294_v0 = vrot.slane %v5064_v25, %v12059_v26  ;;  %v3774_v43 = vadd.f32 %v10497_v7, %v12041_v32 }
 0x29a   : > { %v5310_v15 = vrot.slane %v5068_v12, %v12059_v26  ;;  %v5314_v5 = vrot.slane %v5069_v37, %v12059_v26  ;;  %v4159_v60 = vcombine.high %v4157_v49, %v4157_v49  ;;  %v9102_v54 = vrot.slane %v4158_v34, 9 }
 0x29b   : > { %v5298_v51 = vrot.slane %v5065_v22, %v12059_v26  ;;  %v5471_v46 = vsel %vm5443_vm2, %v5290_v62, %v5286_v18  ;;  %v3806_v44 = vmax.f32 %v3774_v43, 0.0  ;;  %v10498_v36 = vadd.f32 %v12136_v13, %v11952_v3  ;;  %v13155_v13 = vld [vmem:[#allocation17_spill] sm:$0xff] }
 0x29c   : > { %v5472_v45 = vsel %vm5445_vm3, %v5294_v0, %v5471_v46  ;;  %v9103_v2 = vrot.slane %v4157_v49, 9  ;;  %v9104_v29 = vrot.slane %v4159_v60, 9  ;;  %v12290_v40 = vmax.f32 %v4150_v30, %v9101_v56 }
 0x29d   : > { %v5473_v7 = vsel %vm5447_vm4, %v5298_v51, %v5472_v45  ;;  %v4126_v19 = vcombine.high %v3806_v44, %v3806_v44  ;;  %v4133_v52 = vrot.slane %v3806_v44, %v12046_v38  ;;  %v3777_v58 = vadd.f32 %v10498_v36, %v12041_v32 }
 0x29e   : > { %v5474_v27 = vsel %vm5449_vm5, %v5302_v57, %v5473_v7  ;;  %v12296_v55 = vmax.f32 %v4158_v34, %v9102_v54  ;;  %v10499_v3 = vadd.f32 %v12139_v39, %v11956_v4  ;;  %v10500_v23 = vadd.f32 %v13155_v13, %v11960_v16 }
 0x29f   : > { %v5475_v1 = vsel %vm5451_vm6, %v5306_v6, %v5474_v27  ;;  %v4140_v33 = vrot.slane %v4126_v19, %v12046_v38  ;;  %v4141_v63 = vcombine.high %v4133_v52, %v4133_v52  ;;  %v9097_v12 = vrot.slane %v4133_v52, 9 }
 0x2a0   : > { %v5476_v50 = vsel %vm5453_vm7, %v5310_v15, %v5475_v1  ;;  %v3809_v59 = vmax.f32 %v3777_v58, 0.0  ;;  %v3776_v8 = vadd.f32 %v10499_v3, %v12041_v32  ;;  %v3779_v42 = vadd.f32 %v10500_v23, %v12041_v32 }
 0x2a1   : > { %v5477_v9 = vsel %vm5455_vm8, %v5314_v5, %v5476_v50  ;;  %v4142_v61 = vcombine.high %v4140_v33, %v4140_v33  ;;  %v9098_v4 = vrot.slane %v4141_v63, 9  ;;  %v9099_v39 = vrot.slane %v4140_v33, 9 }
 0x2a2   : > { %5518 = vst.msk [vmem:[#allocation2 + $0x41] sm:$0xff] %vm397_vm0, %v5477_v9  ;;  %v4980_v16 = vmax.f32 %v4157_v49, %v9103_v2  ;;  %v4177_v37 = vcombine.high %v3809_v59, %v3809_v59  ;;  %v4184_v57 = vrot.slane %v3809_v59, %v12046_v38  ;;  %v3808_v30 = vmax.f32 %v3776_v8, 0.0 }
 0x2a3   : > { %v4981_v6 = vmax.f32 %v4159_v60, %v9104_v29  ;;  %v9100_v31 = vrot.slane %v4142_v61, 9  ;;  %v4974_v48 = vmax.f32 %v4133_v52, %v9097_v12  ;;  %v3811_v25 = vmax.f32 %v3779_v42, 0.0 }
 0x2a4   : > { %v4191_v18 = vrot.slane %v4177_v37, %v12046_v38  ;;  %v4192_v34 = vcombine.high %v4184_v57, %v4184_v57  ;;  %v9109_v56 = vrot.slane %v4184_v57, 9  ;;  %v4160_v22 = vcombine.high %v3808_v30, %v3808_v30 }
 0x2a5   : > { %v4975_v62 = vmax.f32 %v4141_v63, %v9098_v4  ;;  %v4976_v0 = vmax.f32 %v4140_v33, %v9099_v39  ;;  %v4167_v43 = vrot.slane %v3808_v30, %v12046_v38  ;;  %v4211_v15 = vcombine.high %v3811_v25, %v3811_v25 }
 0x2a6   : > { %v4193_v5 = vcombine.high %v4191_v18, %v4191_v18  ;;  %v9110_v49 = vrot.slane %v4192_v34, 9  ;;  %v9111_v54 = vrot.slane %v4191_v18, 9  ;;  %v4986_v51 = vmax.f32 %v4184_v57, %v9109_v56 }
 0x2a7   : > { %v4174_v46 = vrot.slane %v4160_v22, %v12046_v38  ;;  %v4175_v60 = vcombine.high %v4167_v43, %v4167_v43  ;;  %v9105_v44 = vrot.slane %v4167_v43, 9  ;;  %v4218_v36 = vrot.slane %v3811_v25, %v12046_v38  ;;  %v13156_v22 = vld [vmem:[#allocation11_spill] sm:$0xff] }
 0x2a8   : > { %v9112_v45 = vrot.slane %v4193_v5, 9  ;;  %v4987_v2 = vmax.f32 %v4192_v34, %v9110_v49  ;;  %v4988_v29 = vmax.f32 %v4191_v18, %v9111_v54  ;;  %v5074_v7 = vmax.f32 %v12290_v40, %v4986_v51  ;;  %v13158_v49 = vld [vmem:[#allocation12_spill] sm:$0xff] }
 0x2a9   : > { %v4176_v19 = vcombine.high %v4174_v46, %v4174_v46  ;;  %v9106_v52 = vrot.slane %v4175_v60, 9  ;;  %v9107_v58 = vrot.slane %v4174_v46, 9  ;;  %v4982_v27 = vmax.f32 %v4167_v43, %v9105_v44  ;;  %v12315_v3 = vld [vmem:[#allocation2 + $0x41] sm:$0xff] }
 0x2aa   : > { %v4989_v13 = vmax.f32 %v4193_v5, %v9112_v45  ;;  %v5075_v23 = vmax.f32 %v12296_v55, %v4987_v2  ;;  %v5076_v1 = vmax.f32 %v4980_v16, %v4988_v29  ;;  %v4225_v33 = vrot.slane %v4211_v15, %v12046_v38  ;;  %10183 = vmatprep.mubr.msk.f32.mxu1 %vm397_vm0, %v12315_v3  ;;  %v13157_v43 = vld [vmem:[#allocation18_spill] sm:$0xff]  ;;  %v13159_v44 = vld [vmem:[#allocation13_spill] sm:$0xff] }
 0x2ab   : > { %v9108_v63 = vrot.slane %v4176_v19, 9  ;;  %v4983_v12 = vmax.f32 %v4175_v60, %v9106_v52  ;;  %v4984_v50 = vmax.f32 %v4174_v46, %v9107_v58  ;;  %v5070_v59 = vmax.f32 %v4974_v48, %v4982_v27  ;;  %v12352_v27 = vld [vmem:[%s13035_s2] ss:$0 sm:$0xff] }
 0x2ac   : > { %v4977_v40 = vmax.f32 %v4142_v61, %v9100_v31  ;;  %v5077_v8 = vmax.f32 %v4981_v6, %v4989_v13  ;;  %v5334_v42 = vrot.slane %v5074_v7, %v12059_v26  ;;  %v4226_v9 = vcombine.high %v4218_v36, %v4218_v36  ;;  %v13160_v7 = vld [vmem:[#allocation9_spill] sm:$0xff]  ;;  %v13162_v13 = vld [vmem:[#allocation10_spill] sm:$0xff] }
 0x2ad   : > { %v5338_v4 = vrot.slane %v5075_v23, %v12059_v26  ;;  %v4985_v39 = vmax.f32 %v4176_v19, %v9108_v63  ;;  %v5071_v37 = vmax.f32 %v4975_v62, %v4983_v12  ;;  %v5072_v55 = vmax.f32 %v4976_v0, %v4984_v50  ;;  %v13161_v19 = vld [vmem:[#allocation6_spill] sm:$0xff] }
 0x2ae   : > { %v5342_v16 = vrot.slane %v5076_v1, %v12059_v26  ;;  %v4227_v57 = vcombine.high %v4225_v33, %v4225_v33  ;;  %v9117_v30 = vrot.slane %v4218_v36, 9  ;;  %v9118_v25 = vrot.slane %v4226_v9, 9 }
 0x2af   : > { %v5073_v18 = vmax.f32 %v4977_v40, %v4985_v39  ;;  %v5318_v34 = vrot.slane %v5070_v59, %v12059_v26  ;;  %v5322_v48 = vrot.slane %v5071_v37, %v12059_v26  ;;  %v5326_v61 = vrot.slane %v5072_v55, %v12059_v26 }
 0x2b0   : > { %v5346_v6 = vrot.slane %v5077_v8, %v12059_v26  ;;  %v9119_v31 = vrot.slane %v4225_v33, 9  ;;  %v9120_v56 = vrot.slane %v4227_v57, 9  ;;  %v10501_v62 = vadd.f32 %v13157_v43, %v13156_v22 }
 0x2b1   : > { %v5330_v0 = vrot.slane %v5073_v18, %v12059_v26  ;;  %v5478_v15 = vsel %vm5443_vm2, %v5322_v48, %v5318_v34  ;;  %v12332_v5 = vmax.f32 %v4218_v36, %v9117_v30  ;;  %v10502_v54 = vadd.f32 %v12152_v14, %v13158_v49 }
 0x2b2   : > { %v5479_v51 = vsel %vm5445_vm3, %v5326_v61, %v5478_v15  ;;  %v12337_v46 = vmax.f32 %v4226_v9, %v9118_v25  ;;  %v3778_v60 = vadd.f32 %v10501_v62, %v12041_v32  ;;  %v10503_v45 = vadd.f32 %v12154_v28, %v13159_v44 }
 0x2b3   : > { %v5480_v2 = vsel %vm5447_vm4, %v5330_v0, %v5479_v51  ;;  %v3781_v29 = vadd.f32 %v10502_v54, %v12041_v32  ;;  %v10504_v36 = vadd.f32 %v12167_v10, %v13160_v7  ;;  %v10505_v52 = vadd.f32 %v12171_v21, %v13161_v19 }
 0x2b4   : > { %v5481_v14 = vsel %vm5449_vm5, %v5334_v42, %v5480_v2  ;;  %v3810_v58 = vmax.f32 %v3778_v60, 0.0  ;;  %v3780_v28 = vadd.f32 %v12352_v27, %v10503_v45  ;;  %v12357_v23 = vadd.f32 %v12182_v53, %v13162_v13 }
 0x2b5   : > { %v5482_v32 = vsel %vm5451_vm6, %v5338_v4, %v5481_v14  ;;  %v12360_v10 = vmax.f32 %v4225_v33, %v9119_v31  ;;  %v12362_v1 = vmax.f32 %v4227_v57, %v9120_v56  ;;  %v3813_v21 = vmax.f32 %v3781_v29, 0.0 }
 0x2b6   : > { %v5483_v63 = vsel %vm5453_vm7, %v5342_v16, %v5482_v32  ;;  %v4194_v12 = vcombine.high %v3810_v58, %v3810_v58  ;;  %v4201_v50 = vrot.slane %v3810_v58, %v12046_v38  ;;  %v3812_v59 = vmax.f32 %v3780_v28, 0.0 }
 0x2b7   : > { %v5484_v40 = vsel %vm5455_vm8, %v5346_v6, %v5483_v63  ;;  %v4245_v8 = vcombine.high %v3813_v21, %v3813_v21  ;;  %v4252_v42 = vrot.slane %v3813_v21, %v12046_v38  ;;  %v3783_v53 = vadd.f32 %v12352_v27, %v10504_v36 }
 0x2b8   : > { %5519 = vst.msk [vmem:[#allocation2 + $0x51] sm:$0xff] %vm397_vm0, %v5484_v40  ;;  %v4208_v33 = vrot.slane %v4194_v12, %v12046_v38  ;;  %v4209_v9 = vcombine.high %v4201_v50, %v4201_v50  ;;  %v9113_v4 = vrot.slane %v4201_v50, 9  ;;  %v4228_v39 = vcombine.high %v3812_v59, %v3812_v59 }
 0x2b9   : > { %v4259_v37 = vrot.slane %v4245_v8, %v12046_v38  ;;  %v4260_v55 = vcombine.high %v4252_v42, %v4252_v42  ;;  %v9125_v16 = vrot.slane %v4252_v42, 9  ;;  %v3782_v57 = vadd.f32 %v12352_v27, %v10505_v52 }
 0x2ba   : > { %v4210_v30 = vcombine.high %v4208_v33, %v4208_v33  ;;  %v9114_v25 = vrot.slane %v4209_v9, 9  ;;  %v9115_v18 = vrot.slane %v4208_v33, 9  ;;  %v4235_v34 = vrot.slane %v3812_v59, %v12046_v38 }
 0x2bb   : > { %v4261_v48 = vcombine.high %v4259_v37, %v4259_v37  ;;  %v9126_v61 = vrot.slane %v4260_v55, 9  ;;  %v9127_v6 = vrot.slane %v4259_v37, 9  ;;  %v5002_v31 = vmax.f32 %v4252_v42, %v9125_v16 }
 0x2bc   : > { %v9116_v56 = vrot.slane %v4210_v30, 9  ;;  %v4990_v22 = vmax.f32 %v4201_v50, %v9113_v4  ;;  %v4242_v43 = vrot.slane %v4228_v39, %v12046_v38  ;;  %v3815_v62 = vmax.f32 %v3783_v53, 0.0 }
 0x2bd   : > { %v9128_v0 = vrot.slane %v4261_v48, 9  ;;  %v5003_v15 = vmax.f32 %v4260_v55, %v9126_v61  ;;  %v5004_v49 = vmax.f32 %v4259_v37, %v9127_v6  ;;  %v5082_v54 = vmax.f32 %v12332_v5, %v5002_v31 }
 0x2be   : > { %v4991_v51 = vmax.f32 %v4209_v9, %v9114_v25  ;;  %v4243_v60 = vcombine.high %v4235_v34, %v4235_v34  ;;  %v4244_v44 = vcombine.high %v4242_v43, %v4242_v43  ;;  %v9121_v45 = vrot.slane %v4235_v34, 9 }
 0x2bf   : > { %v4992_v2 = vmax.f32 %v4208_v33, %v9115_v18  ;;  %v5005_v29 = vmax.f32 %v4261_v48, %v9128_v0  ;;  %v5083_v7 = vmax.f32 %v12337_v46, %v5003_v15  ;;  %v5084_v36 = vmax.f32 %v12360_v10, %v5004_v49  ;;  %v12378_v19 = vld [vmem:[#allocation2 + $0x51] sm:$0xff] }
 0x2c0   : > { %v9122_v52 = vrot.slane %v4243_v60, 9  ;;  %v9123_v14 = vrot.slane %v4242_v43, 9  ;;  %v9124_v58 = vrot.slane %v4244_v44, 9  ;;  %v4998_v28 = vmax.f32 %v4235_v34, %v9121_v45  ;;  %10184 = vmatmul.mubr.msk.f32.gmra.mrb[36].mxu1 %vm397_vm0, %v12378_v19  ;;  %v13163_v0 = vld [vmem:[#allocation7_spill] sm:$0xff] }
 0x2c1   : > { %v4993_v5 = vmax.f32 %v4210_v30, %v9116_v56  ;;  %v5085_v13 = vmax.f32 %v12362_v1, %v5005_v29  ;;  %v5366_v32 = vrot.slane %v5082_v54, %v12059_v26  ;;  %v4279_v21 = vcombine.high %v3815_v62, %v3815_v62 }
 0x2c2   : > { %v4999_v63 = vmax.f32 %v4243_v60, %v9122_v52  ;;  %v5000_v12 = vmax.f32 %v4242_v43, %v9123_v14  ;;  %v5001_v46 = vmax.f32 %v4244_v44, %v9124_v58  ;;  %v5078_v50 = vmax.f32 %v4990_v22, %v4998_v28 }
 0x2c3   : > { %v5370_v10 = vrot.slane %v5083_v7, %v12059_v26  ;;  %v4286_v59 = vrot.slane %v3815_v62, %v12046_v38  ;;  %v4293_v40 = vrot.slane %v4279_v21, %v12046_v38  ;;  %v3814_v8 = vmax.f32 %v3782_v57, 0.0 }
 0x2c4   : > { %v5079_v42 = vmax.f32 %v4991_v51, %v4999_v63  ;;  %v5080_v53 = vmax.f32 %v4992_v2, %v5000_v12  ;;  %v5081_v33 = vmax.f32 %v4993_v5, %v5001_v46  ;;  %v5350_v9 = vrot.slane %v5078_v50, %v12059_v26  ;;  %v13164_v50 = vld [vmem:[#allocation8_spill] sm:$0xff] }
 0x2c5   : > { %v4294_v1 = vcombine.high %v4286_v59, %v4286_v59  ;;  %v4295_v4 = vcombine.high %v4293_v40, %v4293_v40  ;;  %v9133_v39 = vrot.slane %v4286_v59, 9  ;;  %v9135_v37 = vrot.slane %v4293_v40, 9 }
 0x2c6   : > { %v5354_v55 = vrot.slane %v5079_v42, %v12059_v26  ;;  %v5358_v16 = vrot.slane %v5080_v53, %v12059_v26  ;;  %v5362_v30 = vrot.slane %v5081_v33, %v12059_v26  ;;  %v4262_v25 = vcombine.high %v3814_v8, %v3814_v8  ;;  %v13166_v53 = vld [vmem:[#allocation15_spill] sm:$0xff] }
 0x2c7   : > { %v5374_v18 = vrot.slane %v5084_v36, %v12059_v26  ;;  %v5378_v57 = vrot.slane %v5085_v13, %v12059_v26  ;;  %v9134_v34 = vrot.slane %v4294_v1, 9  ;;  %v9136_v48 = vrot.slane %v4295_v4, 9 }
 0x2c8   : > { %v5485_v61 = vsel %vm5443_vm2, %v5354_v55, %v5350_v9  ;;  %v4269_v6 = vrot.slane %v3814_v8, %v12046_v38  ;;  %v4276_v31 = vrot.slane %v4262_v25, %v12046_v38  ;;  %v3785_v56 = vadd.f32 %v12352_v27, %v12357_v23  ;;  %v13165_v8 = vld [vmem:[#allocation14_spill] sm:$0xff] }
 0x2c9   : > { %v5486_v22 = vsel %vm5445_vm3, %v5358_v16, %v5485_v61  ;;  %v12399_v43 = vmax.f32 %v4286_v59, %v9133_v39  ;;  %v12401_v62 = vmax.f32 %v4293_v40, %v9135_v37  ;;  %v10507_v15 = vadd.f32 %v12187_v35, %v13163_v0 }
 0x2ca   : > { %v5487_v49 = vsel %vm5447_vm4, %v5362_v30, %v5486_v22  ;;  %v4277_v54 = vcombine.high %v4269_v6, %v4269_v6  ;;  %v4278_v51 = vcombine.high %v4276_v31, %v4276_v31  ;;  %v9129_v60 = vrot.slane %v4269_v6, 9 }
 0x2cb   : > { %v5488_v44 = vsel %vm5449_vm5, %v5366_v32, %v5487_v49  ;;  %v9131_v45 = vrot.slane %v4276_v31, 9  ;;  %v3817_v2 = vmax.f32 %v3785_v56, 0.0  ;;  %v3784_v23 = vadd.f32 %v12352_v27, %v10507_v15 }
 0x2cc   : > { %v5489_v29 = vsel %vm5451_vm6, %v5370_v10, %v5488_v44  ;;  %v12409_v7 = vmax.f32 %v4294_v1, %v9134_v34  ;;  %v12411_v36 = vmax.f32 %v4295_v4, %v9136_v48  ;;  %v9130_v52 = vrot.slane %v4277_v54, 9 }
 0x2cd   : > { %v5490_v35 = vsel %vm5453_vm7, %v5374_v18, %v5489_v29  ;;  %v9132_v14 = vrot.slane %v4278_v51, 9  ;;  %v4313_v58 = vcombine.high %v3817_v2, %v3817_v2  ;;  %v4320_v28 = vrot.slane %v3817_v2, %v12046_v38 }
 0x2ce   : > { %v5491_v5 = vsel %vm5455_vm8, %v5378_v57, %v5490_v35  ;;  %v5006_v13 = vmax.f32 %v4269_v6, %v9129_v60  ;;  %v5008_v32 = vmax.f32 %v4276_v31, %v9131_v45  ;;  %v3816_v21 = vmax.f32 %v3784_v23, 0.0 }
 0x2cf   : > { %5520 = vst.msk [vmem:[#allocation2 + $0x61] sm:$0xff] %vm397_vm0, %v5491_v5  ;;  %v4327_v63 = vrot.slane %v4313_v58, %v12046_v38  ;;  %v4328_v12 = vcombine.high %v4320_v28, %v4320_v28  ;;  %v9141_v46 = vrot.slane %v4320_v28, 9  ;;  %v10508_v10 = vadd.f32 %v12200_v11, %v13164_v50 }
 0x2d0   : > { %v4296_v59 = vcombine.high %v3816_v21, %v3816_v21  ;;  %v4303_v40 = vrot.slane %v3816_v21, %v12046_v38  ;;  %v10509_v42 = vadd.f32 %v12203_v17, %v13165_v8  ;;  %v10510_v33 = vadd.f32 %v12205_v47, %v13166_v53  ;;  %v13167_v21 = vld [vmem:[#allocation16_spill] sm:$0xff] }
 0x2d1   : > { %v4329_v9 = vcombine.high %v4327_v63, %v4327_v63  ;;  %v9142_v1 = vrot.slane %v4328_v12, 9  ;;  %v9143_v4 = vrot.slane %v4327_v63, 9  ;;  %v5018_v39 = vmax.f32 %v4320_v28, %v9141_v46 }
 0x2d2   : > { %v4310_v37 = vrot.slane %v4296_v59, %v12046_v38  ;;  %v4311_v55 = vcombine.high %v4303_v40, %v4303_v40  ;;  %v9137_v16 = vrot.slane %v4303_v40, 9  ;;  %v3787_v30 = vadd.f32 %v12352_v27, %v10508_v10 }
 0x2d3   : > { %v9144_v11 = vrot.slane %v4329_v9, 9  ;;  %v5019_v25 = vmax.f32 %v4328_v12, %v9142_v1  ;;  %v5020_v18 = vmax.f32 %v4327_v63, %v9143_v4  ;;  %v5090_v57 = vmax.f32 %v12399_v43, %v5018_v39 }
 0x2d4   : > { %v4312_v34 = vcombine.high %v4310_v37, %v4310_v37  ;;  %v9138_v17 = vrot.slane %v4311_v55, 9  ;;  %v9139_v48 = vrot.slane %v4310_v37, 9  ;;  %v5014_v61 = vmax.f32 %v4303_v40, %v9137_v16 }
 0x2d5   : > { %v5007_v47 = vmax.f32 %v4277_v54, %v9130_v52  ;;  %v5021_v6 = vmax.f32 %v4329_v9, %v9144_v11  ;;  %v5091_v31 = vmax.f32 %v12409_v7, %v5019_v25  ;;  %v5092_v56 = vmax.f32 %v12401_v62, %v5020_v18 }
 0x2d6   : > { %v9140_v22 = vrot.slane %v4312_v34, 9  ;;  %v5015_v0 = vmax.f32 %v4311_v55, %v9138_v17  ;;  %v5016_v15 = vmax.f32 %v4310_v37, %v9139_v48  ;;  %v5086_v49 = vmax.f32 %v5006_v13, %v5014_v61  ;;  %v12430_v60 = vld [vmem:[#allocation2 + $0x61] sm:$0xff] }
 0x2d7   : > { %v5093_v44 = vmax.f32 %v12411_v36, %v5021_v6  ;;  %v3819_v45 = vmax.f32 %v3787_v30, 0.0  ;;  %10186 = vmatprep.mubr.msk.f32.mxu1 %vm397_vm0, %v12430_v60  ;;  %v5009_v43 = vmax.f32 %v4278_v51, %v9132_v14  ;;  %v3786_v52 = vadd.f32 %v12352_v27, %v10509_v42 }
 0x2d8   : > { %v5017_v2 = vmax.f32 %v4312_v34, %v9140_v22  ;;  %v5087_v54 = vmax.f32 %v5007_v47, %v5015_v0  ;;  %v5088_v23 = vmax.f32 %v5008_v32, %v5016_v15  ;;  %v5382_v29 = vrot.slane %v5086_v49, %v12059_v26 }
 0x2d9   : > { %v4347_v7 = vcombine.high %v3819_v45, %v3819_v45  ;;  %v4354_v62 = vrot.slane %v3819_v45, %v12046_v38  ;;  %v3789_v28 = vadd.f32 %v12352_v27, %v10510_v33  ;;  %v3818_v51 = vmax.f32 %v3786_v52, 0.0 }
 0x2da   : > { %v5089_v35 = vmax.f32 %v5009_v43, %v5017_v2  ;;  %v5386_v58 = vrot.slane %v5087_v54, %v12059_v26  ;;  %v5390_v36 = vrot.slane %v5088_v23, %v12059_v26  ;;  %v10511_v63 = vadd.f32 %v12208_v24, %v13167_v21 }
 0x2db   : > { %v4361_v5 = vrot.slane %v4347_v7, %v12046_v38  ;;  %v4362_v32 = vcombine.high %v4354_v62, %v4354_v62  ;;  %v5398_v12 = vrot.slane %v5090_v57, %v12059_v26  ;;  %v3821_v50 = vmax.f32 %v3789_v28, 0.0 }
 0x2dc   : > { %v5394_v14 = vrot.slane %v5089_v35, %v12059_v26  ;;  %v5492_v13 = vsel %vm5443_vm2, %v5386_v58, %v5382_v29  ;;  %v5402_v10 = vrot.slane %v5091_v31, %v12059_v26  ;;  %v4330_v40 = vcombine.high %v3818_v51, %v3818_v51 }
 0x2dd   : > { %v5493_v46 = vsel %vm5445_vm3, %v5390_v36, %v5492_v13  ;;  %v5406_v8 = vrot.slane %v5092_v56, %v12059_v26  ;;  %v5410_v42 = vrot.slane %v5093_v44, %v12059_v26  ;;  %v9149_v33 = vrot.slane %v4354_v62, 9  ;;  %v5523_v36 = vld [vmem:[#allocation2] sm:$0xff] }
 0x2de   : > { %v5494_v59 = vsel %vm5447_vm4, %v5394_v14, %v5493_v46  ;;  %v4363_v24 = vcombine.high %v4361_v5, %v4361_v5  ;;  %v9150_v1 = vrot.slane %v4362_v32, 9  ;;  %v4337_v4 = vrot.slane %v3818_v51, %v12046_v38 }
 0x2df   : > { %v5495_v53 = vsel %vm5449_vm5, %v5398_v12, %v5494_v59  ;;  %v4381_v37 = vcombine.high %v3821_v50, %v3821_v50  ;;  %v4388_v55 = vrot.slane %v3821_v50, %v12046_v38  ;;  %v9151_v30 = vrot.slane %v4361_v5, 9 }
 0x2e0   : > { %v5496_v9 = vsel %vm5451_vm6, %v5402_v10, %v5495_v53  ;;  %v4344_v11 = vrot.slane %v4330_v40, %v12046_v38  ;;  %v12460_v25 = vmax.f32 %v4354_v62, %v9149_v33  ;;  %v9152_v17 = vrot.slane %v4363_v24, 9  ;;  %v5524_v33 = vld [vmem:[#allocation2 + $0x10] sm:$0xff] }
 0x2e1   : > { %v5497_v39 = vsel %vm5453_vm7, %v5406_v8, %v5496_v9  ;;  %v4395_v18 = vrot.slane %v4381_v37, %v12046_v38  ;;  %v4396_v57 = vcombine.high %v4388_v55, %v4388_v55  ;;  %v9157_v34 = vrot.slane %v4388_v55, 9  ;;  %v9187_v9 = vld [vmem:[%s13036_s3 + $0x18] sm:$0xff]  ;;  %v12483_v37 = vld [vmem:[#allocation2 + $0x20] sm:$0xff] }
 0x2e2   : > { %v5498_v16 = vsel %vm5455_vm8, %v5410_v42, %v5497_v39  ;;  %v12463_v48 = vmax.f32 %v4362_v32, %v9150_v1  ;;  %v4345_v61 = vcombine.high %v4337_v4, %v4337_v4  ;;  %v3788_v47 = vadd.f32 %v12352_v27, %v10511_v63 }
 0x2e3   : > { %5521 = vst.msk [vmem:[#allocation2 + $0x71] sm:$0xff] %vm397_vm0, %v5498_v16  ;;  %v4397_v6 = vcombine.high %v4395_v18, %v4395_v18  ;;  %v9158_v31 = vrot.slane %v4396_v57, 9  ;;  %v9159_v56 = vrot.slane %v4395_v18, 9  ;;  %v5034_v22 = vmax.f32 %v4388_v55, %v9157_v34 }
 0x2e4   : > { %v12466_v0 = vmax.f32 %v4361_v5, %v9151_v30  ;;  %v4346_v15 = vcombine.high %v4344_v11, %v4344_v11  ;;  %v9145_v49 = vrot.slane %v4337_v4, 9  ;;  %v3820_v44 = vmax.f32 %v3788_v47, 0.0  ;;  %v12504_v47 = vld [vmem:[#allocation2 + $0x50] sm:$0xff] }
 0x2e5   : > { %v9160_v45 = vrot.slane %v4397_v6, 9  ;;  %v5035_v43 = vmax.f32 %v4396_v57, %v9158_v31  ;;  %v5036_v2 = vmax.f32 %v4395_v18, %v9159_v56  ;;  %v5098_v54 = vmax.f32 %v12460_v25, %v5034_v22  ;;  %v12490_v25 = vld [vmem:[#allocation2 + $0x30] sm:$0xff]  ;;  %v12494_v18 = vld [vmem:[#allocation2 + $0x40] sm:$0xff] }
 0x2e6   : > { %v5029_v23 = vmax.f32 %v4363_v24, %v9152_v17  ;;  %v9146_v29 = vrot.slane %v4345_v61, 9  ;;  %v4364_v7 = vcombine.high %v3820_v44, %v3820_v44  ;;  %v4371_v62 = vrot.slane %v3820_v44, %v12046_v38  ;;  %v12510_v56 = vld [vmem:[#allocation2 + $0x60] sm:$0xff] }
 0x2e7   : > { %v9147_v27 = vrot.slane %v4344_v11, 9  ;;  %v5037_v52 = vmax.f32 %v4397_v6, %v9160_v45  ;;  %v5099_v35 = vmax.f32 %v12463_v48, %v5035_v43  ;;  %v5100_v58 = vmax.f32 %v12466_v0, %v5036_v2  ;;  %v9196_v43 = vld [vmem:[%s13036_s3 + $0x20] sm:$0xff] }
 0x2e8   : > { %v4378_v28 = vrot.slane %v4364_v7, %v12046_v38  ;;  %v4379_v5 = vcombine.high %v4371_v62, %v4371_v62  ;;  %v9153_v51 = vrot.slane %v4371_v62, 9  ;;  %v9148_v13 = vrot.slane %v4346_v15, 9  ;;  %v12528_v2 = vld [vmem:[#allocation2 + $0x22] sm:$0xff] }
 0x2e9   : > { %v5022_v32 = vmax.f32 %v4337_v4, %v9145_v49  ;;  %v5101_v21 = vmax.f32 %v5029_v23, %v5037_v52  ;;  %v5023_v10 = vmax.f32 %v4345_v61, %v9146_v29  ;;  %v5024_v59 = vmax.f32 %v4344_v11, %v9147_v27  ;;  %v5800_v49 = vld [vmem:[#allocation2 + $0x2] sm:$0xff]  ;;  %v12540_v29 = vld [vmem:[#allocation2 + $0x52] sm:$0xff] }
 0x2ea   : > { %v12473_v14 = vld [vmem:[#allocation2 + $0x71] sm:$0xff]  ;;  %v4380_v63 = vcombine.high %v4378_v28, %v4378_v28  ;;  %v9154_v12 = vrot.slane %v4379_v5, 9  ;;  %v9155_v46 = vrot.slane %v4378_v28, 9  ;;  %v5030_v50 = vmax.f32 %v4371_v62, %v9153_v51  ;;  %v12536_v23 = vld [vmem:[#allocation2 + $0x42] sm:$0xff] }
 0x2eb   : > { %10187 = vmatmul.mubr.msk.f32.gmra.mrb[38].mxu1 %vm397_vm0, %v12473_v14  ;;  %v5025_v24 = vmax.f32 %v4346_v15, %v9148_v13  ;;  %v5430_v34 = vrot.slane %v5098_v54, %v12059_v26  ;;  %v5434_v48 = vrot.slane %v5099_v35, %v12059_v26  ;;  %v5438_v6 = vrot.slane %v5100_v58, %v12059_v26  ;;  %v12518_v45 = vld [vmem:[#allocation2 + $0x70] sm:$0xff]  ;;  %v12544_v7 = vld [vmem:[#allocation2 + $0x62] sm:$0xff] }
 0x2ec   : > { %10191 = vmatprep.mubr.msk.f32.mxu1 %vm397_vm0, %v5523_v36  ;;  %v9156_v40 = vrot.slane %v4380_v63, 9  ;;  %v5031_v8 = vmax.f32 %v4379_v5, %v9154_v12  ;;  %v5032_v42 = vmax.f32 %v4378_v28, %v9155_v46  ;;  %v5094_v53 = vmax.f32 %v5022_v32, %v5030_v50  ;;  %v12532_v54 = vld [vmem:[#allocation2 + $0x32] sm:$0xff]  ;;  %v9205_v27 = vld [vmem:[%s13036_s3 + $0x28] sm:$0xff]  ;;  %v9232_v13 = vld [vmem:[%s13036_s3 + $0x40] sm:$0xff] }
 0x2ed   : > { %v5442_v22 = vrot.slane %v5101_v21, %v12059_v26  ;;  %v12548_v62 = vld [vmem:[#allocation2 + $0x72] sm:$0xff]  ;;  %v10846_v36 = vld [vmem:[#allocation2 + $0x21] sm:$0xff]  ;;  %v10913_v21 = vmov 0.0|0.0   ;;  %v12659_v12 = vld [vmem:[%s13037_s4] ss:$0 sm:$0xff] }
 0x2ee   : > { %v5033_v1 = vmax.f32 %v4380_v63, %v9156_v40  ;;  %v5095_v4 = vmax.f32 %v5023_v10, %v5031_v8  ;;  %v5096_v39 = vmax.f32 %v5024_v59, %v5032_v42  ;;  %v5414_v16 = vrot.slane %v5094_v53, %v12059_v26  ;;  %v10845_v35 = vld [vmem:[#allocation2 + $0x11] sm:$0xff]  ;;  %v12664_v50 = vld [vmem:[%s13038_s5] sm:$0xff]  ;;  %v12669_v10 = vld [vmem:[%s13038_s5 + $0x8] sm:$0xff] }
 0x2ef   : > { %10192 = vmatmul.mubr.msk.f32.vlgmr.msra.gmra.mrb[32].mxu1 %vm397_vm0, %v5524_v33  ;;  %v9214_v58 = vld [vmem:[%s13036_s3 + $0x30] sm:$0xff]  ;;  %v9223_v5 = vld [vmem:[%s13036_s3 + $0x38] sm:$0xff]  ;;  %v12674_v59 = vld [vmem:[%s13038_s5 + $0x20] sm:$0xff] }
 0x2f0   : > { %10204 = vmatpush3.msra.mxu1 %v12219_v41  ;;  %10194 = vmatprep.mubr.msk.f32.mxu1 %vm397_vm0, %v12483_v37  ;;  %v5097_v55 = vmax.f32 %v5025_v24, %v5033_v1  ;;  %v5418_v30 = vrot.slane %v5095_v4, %v12059_v26  ;;  %v5422_v11 = vrot.slane %v5096_v39, %v12059_v26  ;;  %v6396_v32 = vld [vmem:[#allocation2 + $0x90] sm:$0xff]  ;;  %v12680_v42 = vld [vmem:[%s13038_s5 + $0x28] sm:$0xff]  ;;  %v12696_v24 = vld [vmem:[%s13038_s5 + $0x40] sm:$0xff] }
 0x2f1   : > { %10217 = vmatprep.subr.mxu1 %v9187_v9  ;;  %v6543_v63 = vld [vmem:[#allocation2 + $0x91] sm:$0xff]  ;;  %v12701_v1 = vld [vmem:[%s13038_s5 + $0x48] sm:$0xff] }
 0x2f2   : > { %v5426_v41 = vrot.slane %v5097_v55, %v12059_v26  ;;  %v5499_v57 = vsel %vm5443_vm2, %v5418_v30, %v5414_v16  ;;  %v5801_v26 = vld [vmem:[#allocation2 + $0x12] sm:$0xff]  ;;  %v10428_v30 = vpack.c.bf16 %v12669_v10, %v12664_v50 }
 0x2f3   : > { %10195 = vmatmul.mubr.msk.f32.gmra.mrb[34].mxu1 %vm397_vm0, %v12490_v25  ;;  %v5500_v17 = vsel %vm5445_vm3, %v5422_v11, %v5499_v57  ;;  %v12685_v53 = vld [vmem:[%s13038_s5 + $0x30] sm:$0xff]  ;;  %v10431_v11 = vpack.c.bf16 %v12680_v42, %v12674_v59 }
 0x2f4   : > { %10197 = vmatprep.mubr.msk.f32.mxu1 %vm397_vm0, %v12494_v18  ;;  %v5501_v61 = vsel %vm5447_vm4, %v5426_v41, %v5500_v17  ;;  %v12706_v39 = vld [vmem:[%s13038_s5 + $0x50] sm:$0xff]  ;;  %v10437_v17 = vpack.c.bf16 %v12701_v1, %v12696_v24  ;;  %v7629_v24 = vld [vmem:[%s13038_s5 + $0x68] sm:$0xff] }
 0x2f5   : > { %v5502_v31 = vsel %vm5449_vm5, %v5430_v34, %v5501_v61 }
 0x2f6   : > { %v5503_v0 = vsel %vm5451_vm6, %v5434_v48, %v5502_v31 }
 0x2f7   : > { %10198 = vmatmul.mubr.msk.f32.gmra.mrb[36].mxu1 %vm397_vm0, %v12504_v47  ;;  %v5504_v15 = vsel %vm5453_vm7, %v5438_v6, %v5503_v0 }
 0x2f8   : > { %10200 = vmatprep.mubr.msk.f32.mxu1 %vm397_vm0, %v12510_v56  ;;  %v5505_v44 = vsel %vm5455_vm8, %v5442_v22, %v5504_v15 }
 0x2f9   : > { %5522 = vst.msk [vmem:[#allocation2 + $0x81] sm:$0xff] %vm397_vm0, %v5505_v44 }
 0x2fb   : > { %10201 = vmatmul.mubr.msk.f32.gmra.mrb[38].mxu1 %vm397_vm0, %v12518_v45 }
 0x2fc   : > { %10205 = vmatprep.mubr.msk.f32.mxu1 %vm397_vm0, %v5800_v49 }
 0x2ff   : > { %10206 = vmatmul.mubr.msk.f32.vlgmr.msra.gmra.mrb[32].mxu1 %vm397_vm0, %v5801_v26 }
 0x300   : > { %10218 = vmatpush3.msra.mxu1 %v9187_v9  ;;  %10208 = vmatprep.mubr.msk.f32.mxu1 %vm397_vm0, %v12528_v2  ;;  %v5954_v52 = vld [vmem:[#allocation2 + $0x80] sm:$0xff] }
 0x301   : > { %10231 = vmatprep.subr.mxu1 %v9196_v43  ;;  %v6101_v28 = vld [vmem:[#allocation2 + $0x81] sm:$0xff] }
 0x302   : > { %v6248_v51 = vld [vmem:[#allocation2 + $0x82] sm:$0xff] }
 0x303   : > { %10209 = vmatmul.mubr.msk.f32.gmra.mrb[34].mxu1 %vm397_vm0, %v12532_v54 }
 0x304   : > { %10211 = vmatprep.mubr.msk.f32.mxu1 %vm397_vm0, %v12536_v23 }
 0x307   : > { %10212 = vmatmul.mubr.msk.f32.gmra.mrb[36].mxu1 %vm397_vm0, %v12540_v29 }
 0x308   : > { %10214 = vmatprep.mubr.msk.f32.mxu1 %vm397_vm0, %v12544_v7 }
 0x30b   : > { %10215 = vmatmul.mubr.msk.f32.gmra.mrb[38].mxu1 %vm397_vm0, %v12548_v62 }
 0x30c   : > { %10219 = vmatprep.mubr.msk.f32.mxu1 %vm397_vm0, %v5524_v33  ;;  %v12690_v33 = vld [vmem:[%s13038_s5 + $0x38] sm:$0xff] }
 0x30f   : > { %10220 = vmatmul.mubr.msk.f32.vlgmr.msra.gmra.mrb[32].mxu1 %vm397_vm0, %v12483_v37 }
 0x310   : > { %10232 = vmatpush3.msra.mxu1 %v9196_v43  ;;  %10222 = vmatprep.mubr.msk.f32.mxu1 %vm397_vm0, %v12490_v25 }
 0x311   : > { %10245 = vmatprep.subr.mxu1 %v9205_v27 }
 0x313   : > { %10223 = vmatmul.mubr.msk.f32.gmra.mrb[34].mxu1 %vm397_vm0, %v12494_v18 }
 0x314   : > { %10225 = vmatprep.mubr.msk.f32.mxu1 %vm397_vm0, %v12504_v47 }
 0x317   : > { %10226 = vmatmul.mubr.msk.f32.gmra.mrb[36].mxu1 %vm397_vm0, %v12510_v56 }
 0x318   : > { %10228 = vmatprep.mubr.msk.f32.mxu1 %vm397_vm0, %v12518_v45 }
 0x31b   : > { %10229 = vmatmul.mubr.msk.f32.gmra.mrb[38].mxu1 %vm397_vm0, %v5954_v52 }
 0x31c   : > { %10233 = vmatprep.mubr.msk.f32.mxu1 %vm397_vm0, %v10845_v35 }
 0x31f   : > { %10234 = vmatmul.mubr.msk.f32.vlgmr.msra.gmra.mrb[32].mxu1 %vm397_vm0, %v10846_v36 }
 0x320   : > { %10246 = vmatpush3.msra.mxu1 %v9205_v27  ;;  %10236 = vmatprep.mubr.msk.f32.mxu1 %vm397_vm0, %v12271_v20 }
 0x321   : > { %10259 = vmatprep.subr.mxu1 %v9214_v58 }
 0x323   : > { %10237 = vmatmul.mubr.msk.f32.gmra.mrb[34].mxu1 %vm397_vm0, %v12315_v3 }
 0x324   : > { %10239 = vmatprep.mubr.msk.f32.mxu1 %vm397_vm0, %v12378_v19 }
 0x327   : > { %10240 = vmatmul.mubr.msk.f32.gmra.mrb[36].mxu1 %vm397_vm0, %v12430_v60 }
 0x328   : > { %10242 = vmatprep.mubr.msk.f32.mxu1 %vm397_vm0, %v12473_v14 }
 0x32b   : > { %10243 = vmatmul.mubr.msk.f32.gmra.mrb[38].mxu1 %vm397_vm0, %v6101_v28 }
 0x32c   : > { %10247 = vmatprep.mubr.msk.f32.mxu1 %vm397_vm0, %v5801_v26 }
 0x32f   : > { %10248 = vmatmul.mubr.msk.f32.vlgmr.msra.gmra.mrb[32].mxu1 %vm397_vm0, %v12528_v2 }
 0x330   : > { %10260 = vmatpush3.msra.mxu1 %v9214_v58  ;;  %10250 = vmatprep.mubr.msk.f32.mxu1 %vm397_vm0, %v12532_v54 }
 0x331   : > { %10273 = vmatprep.subr.mxu1 %v9223_v5 }
 0x333   : > { %10251 = vmatmul.mubr.msk.f32.gmra.mrb[34].mxu1 %vm397_vm0, %v12536_v23 }
 0x334   : > { %10253 = vmatprep.mubr.msk.f32.mxu1 %vm397_vm0, %v12540_v29 }
 0x337   : > { %10254 = vmatmul.mubr.msk.f32.gmra.mrb[36].mxu1 %vm397_vm0, %v12544_v7 }
 0x338   : > { %10256 = vmatprep.mubr.msk.f32.mxu1 %vm397_vm0, %v12548_v62 }
 0x33b   : > { %10257 = vmatmul.mubr.msk.f32.gmra.mrb[38].mxu1 %vm397_vm0, %v6248_v51 }
 0x33c   : > { %10261 = vmatprep.mubr.msk.f32.mxu1 %vm397_vm0, %v12483_v37  ;;  %v12711_v37 = vld [vmem:[%s13038_s5 + $0x58] sm:$0xff] }
 0x33d   : > { %v10440_v6 = vpack.c.bf16 %v12711_v37, %v12706_v39 }
 0x33f   : > { %10262 = vmatmul.mubr.msk.f32.vlgmr.msra.gmra.mrb[32].mxu1 %vm397_vm0, %v12490_v25  ;;  %v10434_v25 = vpack.c.bf16 %v12690_v33, %v12685_v53 }
 0x340   : > { %10274 = vmatpush3.msra.mxu1 %v9223_v5  ;;  %10264 = vmatprep.mubr.msk.f32.mxu1 %vm397_vm0, %v12494_v18 }
 0x341   : > { %10287 = vmatprep.subr.mxu1 %v9232_v13 }
 0x343   : > { %10265 = vmatmul.mubr.msk.f32.gmra.mrb[34].mxu1 %vm397_vm0, %v12504_v47 }
 0x344   : > { %10267 = vmatprep.mubr.msk.f32.mxu1 %vm397_vm0, %v12510_v56 }
 0x347   : > { %10268 = vmatmul.mubr.msk.f32.gmra.mrb[36].mxu1 %vm397_vm0, %v12518_v45 }
 0x348   : > { %10270 = vmatprep.mubr.msk.f32.mxu1 %vm397_vm0, %v5954_v52 }
 0x34b   : > { %10271 = vmatmul.mubr.msk.f32.gmra.mrb[38].mxu1 %vm397_vm0, %v6396_v32 }
 0x34c   : > { %10275 = vmatprep.mubr.msk.f32.mxu1 %vm397_vm0, %v10846_v36 }
 0x34f   : > { %10276 = vmatmul.mubr.msk.f32.vlgmr.msra.gmra.mrb[32].mxu1 %vm397_vm0, %v12271_v20  ;;  %v6690_v20 = vld [vmem:[#allocation2 + $0x92] sm:$0xff] }
 0x350   : > { %10288 = vmatpush3.msra.mxu1 %v9232_v13  ;;  %10278 = vmatprep.mubr.msk.f32.mxu1 %vm397_vm0, %v12315_v3  ;;  %v7175_v3 = vld [vmem:[%s13038_s5 + $0x10] sm:$0xff] }
 0x351   : > { %10424 = vmatprep.subr.bf16.mxu1 %v10913_v21 }
 0x353   : > { %10279 = vmatmul.mubr.msk.f32.gmra.mrb[34].mxu1 %vm397_vm0, %v12378_v19  ;;  %v7176_v19 = vld [vmem:[%s13038_s5 + $0x18] sm:$0xff] }
 0x354   : > { %10281 = vmatprep.mubr.msk.f32.mxu1 %vm397_vm0, %v12430_v60  ;;  %v10425_v60 = vpack.c.bf16 %v7176_v19, %v7175_v3 }
 0x357   : > { %10282 = vmatmul.mubr.msk.f32.gmra.mrb[36].mxu1 %vm397_vm0, %v12473_v14  ;;  %v13168_v14 = vmov 0.0  }
 0x358   : > { %10284 = vmatprep.mubr.msk.f32.mxu1 %vm397_vm0, %v6101_v28 }
 0x35b   : > { %10285 = vmatmul.mubr.msk.f32.gmra.mrb[38].mxu1 %vm397_vm0, %v6543_v63 }
 0x35c   : > { %10289 = vmatprep.mubr.msk.f32.mxu1 %vm397_vm0, %v12528_v2 }
 0x35f   : > { %10290 = vmatmul.mubr.msk.f32.vlgmr.msra.gmra.mrb[32].mxu1 %vm397_vm0, %v12532_v54 }
 0x360   : > { %10292 = vmatprep.mubr.msk.f32.mxu1 %vm397_vm0, %v12536_v23  ;;  %10426 = vmatpush3.bf16.msra.mxu1 %v10425_v60 }
 0x361   : > { %10427 = vmatprep.subr.bf16.mxu1 %v10913_v21 }
 0x363   : > { %10293 = vmatmul.mubr.msk.f32.gmra.mrb[34].mxu1 %vm397_vm0, %v12540_v29 }
 0x364   : > { %10295 = vmatprep.mubr.msk.f32.mxu1 %vm397_vm0, %v12544_v7 }
 0x367   : > { %10296 = vmatmul.mubr.msk.f32.gmra.mrb[36].mxu1 %vm397_vm0, %v12548_v62 }
 0x368   : > { %10298 = vmatprep.mubr.msk.f32.mxu1 %vm397_vm0, %v6248_v51 }
 0x36b   : > { %10299 = vmatmul.mubr.msk.f32.gmra.mrb[38].mxu1 %vm397_vm0, %v6690_v20 }
 0x36c   : > { %10305 = vmatprep.mubr.msk.f32.mxu1 %vm10914_vm9, %v13168_v14 }
 0x432   : > { %v10291_v46 = vpop.f32.mrb[32].mxu1 }
 0x433   : > { %v6838_v40 = vadd.f32 %v10291_v46, %v12659_v12  ;;  %v6783_v8 = vpop.f32.mrb[33].mxu1 }
 0x434   : > { %v6837_v9 = vadd.f32 %v12659_v12, %v6783_v8 }
 0x435   : > { %v6846_v4 = vmax.f32 %v6838_v40, 0.0 }
 0x436   : > { %v6845_v55 = vmax.f32 %v6837_v9, 0.0  ;;  %v10294_v16 = vpop.f32.mrb[34].mxu1 }
 0x437   : > { %v6878_v18 = vcombine.high %v6846_v4, %v6846_v4  ;;  %v6885_v41 = vrot.slane %v6846_v4, %v12046_v38  ;;  %v6840_v57 = vadd.f32 %v10294_v16, %v12659_v12  ;;  %v6793_v34 = vpop.f32.mrb[35].mxu1 }
 0x438   : > { %v6861_v48 = vcombine.high %v6845_v55, %v6845_v55  ;;  %v6868_v61 = vrot.slane %v6845_v55, %v12046_v38  ;;  %v6839_v47 = vadd.f32 %v12659_v12, %v6793_v34 }
 0x439   : > { %v6892_v31 = vrot.slane %v6878_v18, %v12046_v38  ;;  %v6893_v56 = vcombine.high %v6885_v41, %v6885_v41  ;;  %v9246_v22 = vrot.slane %v6885_v41, 9  ;;  %v6848_v0 = vmax.f32 %v6840_v57, 0.0 }
 0x43a   : > { %v6875_v15 = vrot.slane %v6861_v48, %v12046_v38  ;;  %v6876_v49 = vcombine.high %v6868_v61, %v6868_v61  ;;  %v9242_v44 = vrot.slane %v6868_v61, 9  ;;  %v6847_v45 = vmax.f32 %v6839_v47, 0.0  ;;  %v10297_v26 = vpop.f32.mrb[36].mxu1 }
 0x43b   : > { %v6894_v43 = vcombine.high %v6892_v31, %v6892_v31  ;;  %v9247_v2 = vrot.slane %v6893_v56, 9  ;;  %v9248_v54 = vrot.slane %v6892_v31, 9  ;;  %v7129_v23 = vmax.f32 %v6885_v41, %v9246_v22  ;;  %v6803_v29 = vpop.f32.mrb[37].mxu1 }
 0x43c   : > { %v6877_v7 = vcombine.high %v6875_v15, %v6875_v15  ;;  %v9243_v62 = vrot.slane %v6876_v49, 9  ;;  %v9244_v27 = vrot.slane %v6875_v15, 9  ;;  %v7125_v52 = vmax.f32 %v6868_v61, %v9242_v44 }
 0x43d   : > { %v9249_v35 = vrot.slane %v6894_v43, 9  ;;  %v7130_v58 = vmax.f32 %v6893_v56, %v9247_v2  ;;  %v12729_v36 = vmax.f32 %v6892_v31, %v9248_v54  ;;  %v6912_v28 = vcombine.high %v6848_v0, %v6848_v0 }
 0x43e   : > { %v9245_v5 = vrot.slane %v6877_v7, 9  ;;  %v7126_v51 = vmax.f32 %v6876_v49, %v9243_v62  ;;  %v7127_v13 = vmax.f32 %v6875_v15, %v9244_v27  ;;  %v7157_v32 = vmax.f32 %v7125_v52, %v7129_v23  ;;  %v10300_v63 = vpop.f32.mrb[38].mxu1 }
 0x43f   : > { %v12731_v20 = vmax.f32 %v6894_v43, %v9249_v35  ;;  %v6919_v3 = vrot.slane %v6848_v0, %v12046_v38  ;;  %v6926_v19 = vrot.slane %v6912_v28, %v12046_v38  ;;  %v6895_v60 = vcombine.high %v6847_v45, %v6847_v45  ;;  %v6813_v46 = vpop.f32.mrb[39].mxu1 }
 0x440   : > { %v12735_v50 = vmax.f32 %v6877_v7, %v9245_v5  ;;  %v7158_v10 = vmax.f32 %v7126_v51, %v7130_v58  ;;  %v7159_v40 = vmax.f32 %v7127_v13, %v12729_v36  ;;  %v6902_v8 = vrot.slane %v6847_v45, %v12046_v38 }
 0x441   : > { %v6927_v9 = vcombine.high %v6919_v3, %v6919_v3  ;;  %v6928_v4 = vcombine.high %v6926_v19, %v6926_v19  ;;  %v9254_v55 = vrot.slane %v6919_v3, 9  ;;  %v9256_v16 = vrot.slane %v6926_v19, 9 }
 0x442   : > { %v6909_v18 = vrot.slane %v6895_v60, %v12046_v38  ;;  %v6910_v41 = vcombine.high %v6902_v8, %v6902_v8  ;;  %v9250_v57 = vrot.slane %v6902_v8, 9  ;;  %v6842_v34 = vadd.f32 %v10297_v26, %v12659_v12  ;;  %10306 = vmatmul.mubr.msk.f32.vlgmr.msra.gmra.mrb[40].mxu1 %vm7177_vm10, %v7158_v10 }
 0x443   : > { %v9255_v48 = vrot.slane %v6927_v9, 9  ;;  %v9257_v61 = vrot.slane %v6928_v4, 9  ;;  %v12742_v47 = vmax.f32 %v6919_v3, %v9254_v55  ;;  %v12744_v31 = vmax.f32 %v6926_v19, %v9256_v16  ;;  %10429 = vmatpush3.bf16.msra.mxu1 %v10428_v30  ;;  %10312 = vmatprep.mubr.msk.f32.mxu1 %vm10914_vm9, %v13168_v14 }
 0x444   : > { %v6911_v56 = vcombine.high %v6909_v18, %v6909_v18  ;;  %v9251_v22 = vrot.slane %v6910_v41, 9  ;;  %v9252_v0 = vrot.slane %v6909_v18, 9  ;;  %v12748_v15 = vmax.f32 %v6902_v8, %v9250_v57  ;;  %10430 = vmatprep.subr.bf16.mxu1 %v10913_v21 }
 0x445   : > { %v12751_v49 = vmax.f32 %v6927_v9, %v9255_v48  ;;  %v12753_v44 = vmax.f32 %v6928_v4, %v9257_v61  ;;  %v6850_v45 = vmax.f32 %v6842_v34, 0.0  ;;  %v6841_v26 = vadd.f32 %v12659_v12, %v6803_v29  ;;  %v7628_v48 = vld [vmem:[%s13038_s5 + $0x60] sm:$0xff] }
 0x446   : > { %v9253_v43 = vrot.slane %v6911_v56, 9  ;;  %v12756_v2 = vmax.f32 %v6910_v41, %v9251_v22  ;;  %v12758_v30 = vmax.f32 %v6909_v18, %v9252_v0  ;;  %v7161_v54 = vmax.f32 %v12748_v15, %v12742_v47  ;;  %10313 = vmatmul.mubr.msk.f32.vlgmr.msra.gmra.mrb[42].mxu1 %vm7177_vm10, %v7157_v32 }
 0x447   : > { %v6946_v23 = vcombine.high %v6850_v45, %v6850_v45  ;;  %v6953_v7 = vrot.slane %v6850_v45, %v12046_v38  ;;  %v6849_v62 = vmax.f32 %v6841_v26, 0.0  ;;  %v6844_v27 = vadd.f32 %v10300_v63, %v12659_v12  ;;  %10432 = vmatpush3.bf16.msra.mxu1 %v10431_v11  ;;  %10319 = vmatprep.mubr.msk.f32.mxu1 %vm10914_vm9, %v13168_v14 }
 0x448   : > { %v12770_v29 = vmax.f32 %v6911_v56, %v9253_v43  ;;  %v7162_v52 = vmax.f32 %v12756_v2, %v12751_v49  ;;  %v7163_v35 = vmax.f32 %v12758_v30, %v12744_v31  ;;  %v6843_v58 = vadd.f32 %v12659_v12, %v6813_v46  ;;  %10433 = vmatprep.subr.bf16.mxu1 %v10913_v21  ;;  %v7780_v49 = vld [vmem:[%s13038_s5 + $0x80] sm:$0xff]  ;;  %v7781_v2 = vld [vmem:[%s13038_s5 + $0x88] sm:$0xff] }
 0x449   : > { %v6960_v36 = vrot.slane %v6946_v23, %v12046_v38  ;;  %v6961_v28 = vcombine.high %v6953_v7, %v6953_v7  ;;  %v9262_v59 = vrot.slane %v6953_v7, 9  ;;  %v6929_v42 = vcombine.high %v6849_v62, %v6849_v62 }
 0x44a   : > { %v6936_v11 = vrot.slane %v6849_v62, %v12046_v38  ;;  %v6852_v5 = vmax.f32 %v6844_v27, 0.0  ;;  %v6851_v51 = vmax.f32 %v6843_v58, 0.0  ;;  %10320 = vmatmul.mubr.msk.f32.vlgmr.msra.gmra.mrb[44].mxu1 %vm7177_vm10, %v7159_v40  ;;  %v7160_v13 = vmax.f32 %v12735_v50, %v12731_v20 }
 0x44b   : > { %v6962_v32 = vcombine.high %v6960_v36, %v6960_v36  ;;  %v9263_v63 = vrot.slane %v6961_v28, 9  ;;  %v9264_v3 = vrot.slane %v6960_v36, 9  ;;  %v12783_v12 = vmax.f32 %v6953_v7, %v9262_v59  ;;  %10435 = vmatpush3.bf16.msra.mxu1 %v10434_v25  ;;  %10326 = vmatprep.mubr.msk.f32.mxu1 %vm10914_vm9, %v13168_v14  ;;  %v7705_v7 = vld [vmem:[%s13038_s5 + $0x78] sm:$0xff] }
 0x44c   : > { %v6943_v19 = vrot.slane %v6929_v42, %v12046_v38  ;;  %v6944_v60 = vcombine.high %v6936_v11, %v6936_v11  ;;  %v9258_v46 = vrot.slane %v6936_v11, 9  ;;  %v6980_v10 = vcombine.high %v6852_v5, %v6852_v5  ;;  %10436 = vmatprep.subr.bf16.mxu1 %v10913_v21 }
 0x44d   : > { %v9265_v20 = vrot.slane %v6962_v32, 9  ;;  %v12792_v50 = vmax.f32 %v6961_v28, %v9263_v63  ;;  %v12794_v40 = vmax.f32 %v6960_v36, %v9264_v3  ;;  %v6987_v8 = vrot.slane %v6852_v5, %v12046_v38 }
 0x44e   : > { %v6945_v9 = vcombine.high %v6943_v19, %v6943_v19  ;;  %v9259_v53 = vrot.slane %v6944_v60, 9  ;;  %v9260_v33 = vrot.slane %v6943_v19, 9  ;;  %v12797_v25 = vmax.f32 %v6936_v11, %v9258_v46  ;;  %10327 = vmatmul.mubr.msk.f32.vlgmr.msra.gmra.mrb[46].mxu1 %vm7177_vm10, %v7160_v13  ;;  %v7933_v46 = vld [vmem:[%s13038_s5 + $0xa8] sm:$0xff] }
 0x44f   : > { %v12800_v4 = vmax.f32 %v6962_v32, %v9265_v20  ;;  %v6994_v55 = vrot.slane %v6980_v10, %v12046_v38  ;;  %v6995_v16 = vcombine.high %v6987_v8, %v6987_v8  ;;  %10438 = vmatpush3.bf16.msra.mxu1 %v10437_v17  ;;  %10333 = vmatprep.mubr.msk.f32.mxu1 %vm10914_vm9, %v13168_v14  ;;  %v9270_v17 = vrot.slane %v6987_v8, 9  ;;  %v8008_v20 = vld [vmem:[%s13038_s5 + $0xb0] sm:$0xff] }
 0x450   : > { %v9261_v18 = vrot.slane %v6945_v9, 9  ;;  %v12808_v41 = vmax.f32 %v6944_v60, %v9259_v53  ;;  %v12810_v57 = vmax.f32 %v6943_v19, %v9260_v33  ;;  %v7165_v34 = vmax.f32 %v12797_v25, %v12783_v12  ;;  %10439 = vmatprep.subr.bf16.mxu1 %v10913_v21  ;;  %v7856_v19 = vld [vmem:[%s13038_s5 + $0x90] sm:$0xff]  ;;  %v7857_v60 = vld [vmem:[%s13038_s5 + $0x98] sm:$0xff] }
 0x451   : > { %v6996_v1 = vcombine.high %v6994_v55, %v6994_v55  ;;  %v9272_v61 = vrot.slane %v6994_v55, 9  ;;  %v6963_v0 = vcombine.high %v6851_v51, %v6851_v51  ;;  %v9271_v15 = vrot.slane %v6995_v16, 9  ;;  %v8160_v33 = vld [vmem:[%s13038_s5 + $0xd0] sm:$0xff]  ;;  %v8161_v25 = vld [vmem:[%s13038_s5 + $0xd8] sm:$0xff] }
 0x452   : > { %v12821_v47 = vmax.f32 %v6945_v9, %v9261_v18  ;;  %v7166_v56 = vmax.f32 %v12808_v41, %v12792_v50  ;;  %v7167_v22 = vmax.f32 %v12810_v57, %v12794_v40  ;;  %10334 = vmatmul.mubr.msk.f32.vlgmr.msra.gmra.mrb[48].mxu1 %vm7177_vm10, %v7161_v54  ;;  %v6970_v45 = vrot.slane %v6851_v51, %v12046_v38  ;;  %v7704_v54 = vld [vmem:[%s13038_s5 + $0x70] sm:$0xff]  ;;  %v8009_v50 = vld [vmem:[%s13038_s5 + $0xb8] sm:$0xff]  ;;  %v8085_v9 = vld [vmem:[%s13038_s5 + $0xc8] sm:$0xff] }
 0x453   : > { %10441 = vmatpush3.bf16.msra.mxu1 %v10440_v6  ;;  %10340 = vmatprep.mubr.msk.f32.mxu1 %vm10914_vm9, %v13168_v14  ;;  %v10443_v26 = vpack.c.bf16 %v7629_v24, %v7628_v48  ;;  %v9273_v43 = vrot.slane %v6996_v1, 9  ;;  %v6977_v23 = vrot.slane %v6963_v0, %v12046_v38  ;;  %v7164_v39 = vmax.f32 %v12770_v29, %v12753_v44  ;;  %v8312_v18 = vld [vmem:[%s13038_s5 + $0xf0] sm:$0xff]  ;;  %v8313_v41 = vld [vmem:[%s13038_s5 + $0xf8] sm:$0xff]  ;;  %v8392_v48 = vld [vmem:[%s13040_s7 + $0x8] sm:$0xff] }
 0x454   : > { %10442 = vmatprep.subr.bf16.mxu1 %v10913_v21  ;;  %v7168_v37 = vmax.f32 %v12821_v47, %v12800_v4  ;;  %v12846_v6 = vmax.f32 %v6987_v8, %v9270_v17  ;;  %v6978_v62 = vcombine.high %v6970_v45, %v6970_v45  ;;  %v9266_v38 = vrot.slane %v6970_v45, 9  ;;  %v8084_v8 = vld [vmem:[%s13038_s5 + $0xc0] sm:$0xff]  ;;  %v8393_v24 = vld [vmem:[%s13040_s7 + $0x10] sm:$0xff]  ;;  %v8394_v17 = vld [vmem:[%s13040_s7 + $0x18] sm:$0xff] }
 0x455   : > { %v12848_v27 = vmax.f32 %v6994_v55, %v9272_v61  ;;  %v6979_v58 = vcombine.high %v6977_v23, %v6977_v23  ;;  %v9268_v36 = vrot.slane %v6977_v23, 9  ;;  %v12854_v28 = vmax.f32 %v6995_v16, %v9271_v15  ;;  %v8236_v4 = vld [vmem:[%s13038_s5 + $0xe0] sm:$0xff]  ;;  %v8237_v55 = vld [vmem:[%s13038_s5 + $0xe8] sm:$0xff] }
 0x456   : > { %10341 = vmatmul.mubr.msk.f32.vlgmr.msra.gmra.mrb[50].mxu1 %vm7177_vm10, %v7162_v52  ;;  %v9267_v59 = vrot.slane %v6978_v62, 9  ;;  %v7149_v44 = vmax.f32 %v6970_v45, %v9266_v38  ;;  %v10446_v29 = vpack.c.bf16 %v7705_v7, %v7704_v54  ;;  %v12858_v42 = vmax.f32 %v6996_v1, %v9273_v43 }
 0x457   : > { %10444 = vmatpush3.bf16.msra.mxu1 %v10443_v26  ;;  %10347 = vmatprep.mubr.msk.f32.mxu1 %vm10914_vm9, %v13168_v14  ;;  %v9269_v11 = vrot.slane %v6979_v58, 9  ;;  %v12860_v5 = vmax.f32 %v6977_v23, %v9268_v36  ;;  %v10449_v3 = vpack.c.bf16 %v7781_v2, %v7780_v49  ;;  %v10452_v30 = vpack.c.bf16 %v7857_v60, %v7856_v19 }
 0x458   : > { %10445 = vmatprep.subr.bf16.mxu1 %v10913_v21  ;;  %v7150_v52 = vmax.f32 %v6978_v62, %v9267_v59  ;;  %v7169_v51 = vmax.f32 %v7149_v44, %v12846_v6  ;;  %v10458_v12 = vpack.c.bf16 %v8009_v50, %v8008_v20  ;;  %v10461_v53 = vpack.c.bf16 %v8085_v9, %v8084_v8 }
 0x459   : > { %v12870_v13 = vmax.f32 %v6979_v58, %v9269_v11  ;;  %v7171_v32 = vmax.f32 %v12860_v5, %v12848_v27  ;;  %v10464_v40 = vpack.c.bf16 %v8161_v25, %v8160_v33  ;;  %v10467_v16 = vpack.c.bf16 %v8237_v55, %v8236_v4  ;;  %v8395_v25 = vld [vmem:[%s13041_s8] sm:$0x1] }
 0x45a   : > { %10348 = vmatmul.mubr.msk.f32.vlgmr.msra.gmra.mrb[52].mxu1 %vm7177_vm10, %v7163_v35  ;;  %v7170_v63 = vmax.f32 %v7150_v52, %v12854_v28  ;;  %v7932_v35 = vld [vmem:[%s13038_s5 + $0xa0] sm:$0xff]  ;;  %v10470_v57 = vpack.c.bf16 %v8313_v41, %v8312_v18  ;;  %v10476_v61 = vpack.c.bf16 %v8394_v17, %v8393_v24 }
 0x45b   : > { %10447 = vmatpush3.bf16.msra.mxu1 %v10446_v29  ;;  %10354 = vmatprep.mubr.msk.f32.mxu1 %vm10914_vm9, %v13168_v14  ;;  %v7172_v31 = vmax.f32 %v12870_v13, %v12858_v42  ;;  %v10455_v10 = vpack.c.bf16 %v7933_v46, %v7932_v35 }
 0x45c   : > { %10448 = vmatprep.subr.bf16.mxu1 %v10913_v21 }
 0x45e   : > { %10355 = vmatmul.mubr.msk.f32.vlgmr.msra.gmra.mrb[54].mxu1 %vm7177_vm10, %v7164_v39 }
 0x45f   : > { %10450 = vmatpush3.bf16.msra.mxu1 %v10449_v3  ;;  %10361 = vmatprep.mubr.msk.f32.mxu1 %vm10914_vm9, %v13168_v14 }
 0x460   : > { %10451 = vmatprep.subr.bf16.mxu1 %v10913_v21 }
 0x462   : > { %10362 = vmatmul.mubr.msk.f32.vlgmr.msra.gmra.mrb[56].mxu1 %vm7177_vm10, %v7165_v34  ;;  %v8391_v34 = vld [vmem:[%s13040_s7] sm:$0xff] }
 0x463   : > { %10453 = vmatpush3.bf16.msra.mxu1 %v10452_v30  ;;  %10368 = vmatprep.mubr.msk.f32.mxu1 %vm10914_vm9, %v13168_v14  ;;  %v10473_v1 = vpack.c.bf16 %v8392_v48, %v8391_v34 }
 0x464   : > { %10454 = vmatprep.subr.bf16.mxu1 %v10913_v21 }
 0x466   : > { %10369 = vmatmul.mubr.msk.f32.vlgmr.msra.gmra.mrb[58].mxu1 %vm7177_vm10, %v7166_v56 }
 0x467   : > { %10456 = vmatpush3.bf16.msra.mxu1 %v10455_v10  ;;  %10375 = vmatprep.mubr.msk.f32.mxu1 %vm10914_vm9, %v13168_v14 }
 0x468   : > { %10457 = vmatprep.subr.bf16.mxu1 %v10913_v21 }
 0x46a   : > { %10376 = vmatmul.mubr.msk.f32.vlgmr.msra.gmra.mrb[60].mxu1 %vm7177_vm10, %v7167_v22 }
 0x46b   : > { %10459 = vmatpush3.bf16.msra.mxu1 %v10458_v12  ;;  %10382 = vmatprep.mubr.msk.f32.mxu1 %vm10914_vm9, %v13168_v14  ;;  %v8388_v12 = vld [vmem:[%s13039_s6] sm:$0x1] }
 0x46c   : > { %10460 = vmatprep.subr.bf16.mxu1 %v10913_v21 }
 0x46e   : > { %10383 = vmatmul.mubr.msk.f32.vlgmr.msra.gmra.mrb[62].mxu1 %vm7177_vm10, %v7168_v37 }
 0x46f   : > { %10462 = vmatpush3.bf16.msra.mxu1 %v10461_v53  ;;  %10389 = vmatprep.mubr.msk.f32.mxu1 %vm10914_vm9, %v13168_v14 }
 0x470   : > { %10463 = vmatprep.subr.bf16.mxu1 %v10913_v21 }
 0x472   : > { %10390 = vmatmul.mubr.msk.f32.vlgmr.msra.gmra.mrb[64].mxu1 %vm7177_vm10, %v7169_v51 }
 0x473   : > { %10465 = vmatpush3.bf16.msra.mxu1 %v10464_v40  ;;  %10396 = vmatprep.mubr.msk.f32.mxu1 %vm10914_vm9, %v13168_v14 }
 0x474   : > { %10466 = vmatprep.subr.bf16.mxu1 %v10913_v21 }
 0x476   : > { %10397 = vmatmul.mubr.msk.f32.vlgmr.msra.gmra.mrb[66].mxu1 %vm7177_vm10, %v7170_v63 }
 0x477   : > { %10468 = vmatpush3.bf16.msra.mxu1 %v10467_v16  ;;  %10403 = vmatprep.mubr.msk.f32.mxu1 %vm10914_vm9, %v13168_v14 }
 0x478   : > { %10469 = vmatprep.subr.bf16.mxu1 %v10913_v21 }
 0x47a   : > { %10404 = vmatmul.mubr.msk.f32.vlgmr.msra.gmra.mrb[68].mxu1 %vm7177_vm10, %v7171_v32 }
 0x47b   : > { %10471 = vmatpush3.bf16.msra.mxu1 %v10470_v57  ;;  %10410 = vmatprep.mubr.msk.f32.mxu1 %vm10914_vm9, %v13168_v14 }
 0x47c   : > { %10472 = vmatprep.subr.bf16.mxu1 %v10913_v21 }
 0x47e   : > { %10411 = vmatmul.mubr.msk.f32.vlgmr.msra.gmra.mrb[70].mxu1 %vm7177_vm10, %v7172_v31 }
 0x47f   : > { %10421 = vmatprep.mubr.msk.f32.mxu1 %vm10914_vm9, %v13168_v14  ;;  %10474 = vmatpush3.bf16.msra.mxu1 %v10473_v1 }
 0x480   : > { %10475 = vmatprep.subr.bf16.mxu1 %v10913_v21 }
 0x483   : > { %10477 = vmatpush3.bf16.msra.mxu1 %v10476_v61 }
 0x515   : > { %v7247_v14 = vpop.f32.mrb[40].mxu1 }
 0x516   : > { %v10307_v47 = vpop.f32.mrb[41].mxu1 }
 0x519   : > { %v7320_v56 = vpop.f32.mrb[42].mxu1 }
 0x51a   : > { %v7321_v22 = vadd.f32 %v7320_v56, %v7247_v14  ;;  %v10314_v0 = vpop.f32.mrb[43].mxu1 }
 0x51d   : > { %v7395_v15 = vpop.f32.mrb[44].mxu1 }
 0x51e   : > { %v7399_v45 = vadd.f32 %v7395_v15, %v7321_v22  ;;  %v10321_v26 = vpop.f32.mrb[45].mxu1 }
 0x521   : > { %v7471_v43 = vpop.f32.mrb[46].mxu1 }
 0x522   : > { %v7475_v23 = vadd.f32 %v7471_v43, %v7399_v45  ;;  %v10328_v54 = vpop.f32.mrb[47].mxu1 }
 0x525   : > { %v7547_v7 = vpop.f32.mrb[48].mxu1 }
 0x526   : > { %v7551_v39 = vadd.f32 %v7547_v7, %v7475_v23  ;;  %v10335_v37 = vpop.f32.mrb[49].mxu1 }
 0x529   : > { %v7623_v6 = vpop.f32.mrb[50].mxu1 }
 0x52a   : > { %v7627_v62 = vadd.f32 %v7623_v6, %v7551_v39  ;;  %v10342_v38 = vpop.f32.mrb[51].mxu1 }
 0x52d   : > { %v7699_v27 = vpop.f32.mrb[52].mxu1 }
 0x52e   : > { %v7703_v21 = vadd.f32 %v7699_v27, %v7627_v62  ;;  %v10349_v58 = vpop.f32.mrb[53].mxu1 }
 0x531   : > { %v7775_v36 = vpop.f32.mrb[54].mxu1 }
 0x532   : > { %v7779_v28 = vadd.f32 %v7775_v36, %v7703_v21  ;;  %v10356_v59 = vpop.f32.mrb[55].mxu1 }
 0x535   : > { %v7851_v44 = vpop.f32.mrb[56].mxu1 }
 0x536   : > { %v7855_v29 = vadd.f32 %v7851_v44, %v7779_v28  ;;  %v10363_v42 = vpop.f32.mrb[57].mxu1 }
 0x539   : > { %v7927_v11 = vpop.f32.mrb[58].mxu1 }
 0x53a   : > { %v7931_v5 = vadd.f32 %v7927_v11, %v7855_v29  ;;  %v10370_v49 = vpop.f32.mrb[59].mxu1 }
 0x53d   : > { %v8003_v2 = vpop.f32.mrb[60].mxu1 }
 0x53e   : > { %v8007_v52 = vadd.f32 %v8003_v2, %v7931_v5  ;;  %v10377_v51 = vpop.f32.mrb[61].mxu1 }
 0x541   : > { %v8079_v13 = vpop.f32.mrb[62].mxu1 }
 0x542   : > { %v8083_v32 = vadd.f32 %v8079_v13, %v8007_v52  ;;  %v10384_v63 = vpop.f32.mrb[63].mxu1 }
 0x545   : > { %v8155_v3 = vpop.f32.mrb[64].mxu1 }
 0x546   : > { %v8159_v19 = vadd.f32 %v8155_v3, %v8083_v32  ;;  %v10391_v60 = vpop.f32.mrb[65].mxu1 }
 0x549   : > { %v8231_v31 = vpop.f32.mrb[66].mxu1 }
 0x54a   : > { %v8235_v30 = vadd.f32 %v8231_v31, %v8159_v19  ;;  %v10398_v35 = vpop.f32.mrb[67].mxu1 }
 0x54d   : > { %v8307_v46 = vpop.f32.mrb[68].mxu1 }
 0x54e   : > { %v8311_v10 = vadd.f32 %v8307_v46, %v8235_v30  ;;  %v10405_v20 = vpop.f32.mrb[69].mxu1 }
 0x551   : > { %v8383_v50 = vpop.f32.mrb[70].mxu1 }
 0x552   : > { %v8387_v8 = vadd.f32 %v8383_v50, %v8311_v10  ;;  %v10412_v9 = vpop.f32.mrb[71].mxu1 }
 0x554   : > { %v8389_v53 = vadd.f32 %v8388_v12, %v8387_v8 }
 0x556   : > { %v8390_v33 = vmax.f32 %v8389_v53, 0.0 }
 0x558   : > { %10422 = vmatmul.mubr.msk.f32.vlgmr.msra.gmra.mrb[72].mxu1 %vm8396_vm11, %v8390_v33 }
 0x62b   : > { %v8466_v40 = vpop.f32.mrb[72].mxu1 }
 0x62c   : > { %v8467_v4 = vadd.f32 %v8466_v40, %v8395_v25  ;;  %v10423_v55 = vpop.f32.mrb[73].mxu1 }
 0x62e   : > { %8470 = vst [vmem:[%s324_s26] sm:$0x1] %v8467_v4 }
 0x62f   : > { %10860 = shalt.err (!%p10857_p3)
}
 0x630   : > { %s10861_s22 = scalar_lea.hbm %s12991_s14, 16  ;;  %s10865_s26 = scalar_lea.hbm %s13042_s9, 32 }
 0x631   : > { %p10862_p4 = scmp.ne.s32.totalorder %s12991_s14, %s10861_s22  ;;  %p10866_p9 = scmp.lt.u32.totalorder %s12991_s14, %s13042_s9 }
 0x632   : > { %p10867_p10 = scmp.lt.u32.totalorder %s10865_s26, %s10861_s22  ;;  %p10869_p12 = scmp.lt.u32.totalorder %s10861_s22, %s12991_s14 }
 0x633   : > { %p10863_p7 = pnand %p10862_p4, %p11004_p5 }
 0x634   : > { %p10868_p11 = por %p10867_p10, %p10866_p9 }
 0x635   : > { %p10864_p8 = pneg %p10863_p7 }
 0x636   : > { %p10870_p13 = por %p10869_p12, %p10868_p11 }
 0x638   : > { %p10871_p0 = pnand %p10870_p13, %p10864_p8 }
 0x63a   : > { %10874 = shalt.err (!%p10871_p0)
}
 0x63b   : > { %10801 = dma.vmem_to_hbm [thread:$0]  (%p11004_p5), %s12993_s27, 16, %s12991_s14, %s8472_s17  }
 0x63c PF: > { %p10807_p1 = scmp.ge.s32.totalorder %s10909_s12, 2  ;;  %s8496_s16 = sand.u32 1, %s10897_s30  }
 0x63d   : > { %s8497_s13 = scalar_lea.sflag [#allocation4], %s8496_s16 }
 0x63e   : > { %p10804_p2 = pnand %p10807_p1, %p11008_p6 }
 0x640   : > { %10892 = dma.done.wait (!%p10804_p2), %s8497_s13, 16  }
 0x641   : > { %10894 = vsyncadd (!%p10804_p2), %s8497_s13, 4294967280  ;;  %p19_p3 = scmp.ge.s32.totalorder %s10991_s15, 4   ;;  %s13169_s30 = smov %s10901_s10 }
 0x642   : > { %s13170_s10 = smov %s10905_s11  ;;  %s13171_s11 = smov %s11002_s18 }
 0x643   : > { %s13172_s12 = smov %s10991_s15  ;;  %21 = sbr.rel (!%p19_p3) target bundleno = 3 (0x3), region = 111 }
 0x64a   :  { %8501 = vsyncpa [#allocation4], 1 }
 0x64b   :  { %8503 = vsyncpa [#allocation4 + $0x1], 1 }

</bundles_post_ra>
